<compile_context>
chip_gen: v7x
topology: tpu7x:2x2x1
jax: 0.10.0
libtpu: 0.0.40
codegen_flags: <defaults>
</compile_context>

<pallas_src>
import functools

import jax
import jax.numpy as jnp
from jax import lax
from jax.experimental import pallas as pl
from jax.experimental.pallas import tpu as pltpu

COMPUTE_DTYPE = jnp.bfloat16           # MXU input dtype; accumulation stays f32


def _detect_vmem_bytes():
    """Best-effort VMEM capacity query; falls back to the v7x-safe 64 MiB."""
    try:
        info = pltpu.get_tpu_info()
        for attr in ("vmem_capacity_bytes", "vmem_bytes", "vmem_size_bytes"):
            v = getattr(info, attr, None)
            if v:
                return int(v)
    except Exception:
        pass
    return 64 << 20


_VMEM_BYTES = _detect_vmem_bytes()
_BIG_VMEM = _VMEM_BYTES >= (100 << 20)            # v5e/v6e: 128 MiB; v7x: 64 MiB
_VMEM_LIMIT = (96 << 20) if _BIG_VMEM else (48 << 20)
_TM = 256
_TN = 1024 if _BIG_VMEM else 512                  # multiples of 256 (MXU width)
_TK = 1024 if _BIG_VMEM else 512


def _tile(dim, target, align):
    """Largest tile <= target that is a multiple of `align` and divides `dim`
    (falls back to the full dim for small/odd sizes)."""
    if dim <= target:
        return dim
    t = (min(target, dim) // align) * align
    while t > align and dim % t != 0:
        t -= align
    if t >= align and dim % t == 0:
        return t
    return dim


# ----------------------------- Pallas kernels ------------------------------


def _matmul_kernel(x_ref, w_ref, b_ref, o_ref, acc_ref, *, activation):
    """Tiled matmul with f32 accumulator; bias (+ optional ReLU) fused at flush."""
    k = pl.program_id(2)

    @pl.when(k == 0)
    def _():
        acc_ref[...] = jnp.zeros_like(acc_ref)

    acc_ref[...] += jnp.dot(
        x_ref[...], w_ref[...], preferred_element_type=jnp.float32
    )

    @pl.when(k == pl.num_programs(2) - 1)
    def _():
        out = acc_ref[...] + b_ref[...]
        if activation == "relu":
            out = jnp.maximum(out, 0.0)
        o_ref[...] = out.astype(o_ref.dtype)


def _ln_finish(x, g_ref, b_ref, o_ref):
    mean = jnp.mean(x, axis=-1, keepdims=True)
    xc = x - mean
    var = jnp.mean(xc * xc, axis=-1, keepdims=True)
    inv = lax.rsqrt(var + 1e-5)
    o_ref[...] = (xc * inv * g_ref[...] + b_ref[...]).astype(o_ref.dtype)


def _layernorm_kernel(x_ref, g_ref, b_ref, o_ref):
    _ln_finish(x_ref[...].astype(jnp.float32), g_ref, b_ref, o_ref)


def _add_layernorm_kernel(x_ref, r_ref, g_ref, b_ref, o_ref):
    # Residual add fused into the LayerNorm pass (saves one full HBM round trip).
    x = x_ref[...].astype(jnp.float32) + r_ref[...].astype(jnp.float32)
    _ln_finish(x, g_ref, b_ref, o_ref)


def _mha_core(q, k, v, o_ref, acc_ref, n_head):
    """q (pre-scaled), k, v: (S*, E) bf16. Per-head results land in the f32 VMEM
    scratch acc_ref (Sq, E); one lane-dense store at the end."""
    e = q.shape[-1]
    dh = e // n_head
    for h in range(n_head):
        sl = slice(h * dh, (h + 1) * dh)
        # Contract on head_dim of both operands (no k.T / XLU transpose).
        s = lax.dot_general(
            q[:, sl], k[:, sl], (((1,), (1,)), ((), ())),
            preferred_element_type=jnp.float32,
        )                                                    # (Sq, Sk) f32
        m = jnp.max(s, axis=-1, keepdims=True)
        p = jnp.exp(s - m)
        p = p * pl.reciprocal(jnp.sum(p, axis=-1, keepdims=True), approx=True)
        acc_ref[:, sl] = jnp.dot(p.astype(v.dtype), v[:, sl],
                                 preferred_element_type=jnp.float32)
    o_ref[0] = acc_ref[...].astype(o_ref.dtype)


def _self_attention_kernel(qkv_ref, o_ref, acc_ref, *, n_head):
    """One batch element per grid step; packed (1, S, 3E) qkv sliced in-kernel."""
    x = qkv_ref[0]                      # (S, 3E) bf16
    e = x.shape[-1] // 3
    scale = 1.0 / ((e // n_head) ** 0.5)
    q = (x[:, :e].astype(jnp.float32) * scale).astype(x.dtype)   # scale folded once
    _mha_core(q, x[:, e:2 * e], x[:, 2 * e:], o_ref, acc_ref, n_head)


def _cross_attention_kernel(q_ref, kv_ref, o_ref, acc_ref, *, n_head):
    """Queries (1, Sq, E); packed (1, Sk, 2E) kv sliced in-kernel."""
    q_in = q_ref[0]                     # (Sq, E)
    kv = kv_ref[0]                      # (Sk, 2E)
    e = q_in.shape[-1]
    scale = 1.0 / ((e // n_head) ** 0.5)
    q = (q_in.astype(jnp.float32) * scale).astype(q_in.dtype)
    _mha_core(q, kv[:, :e], kv[:, e:], o_ref, acc_ref, n_head)


# ----------------------------- Pallas wrappers ------------------------------


def linear(x, w, b, activation=None, out_dtype=COMPUTE_DTYPE):
    """x: (M, K); w: (K, N) pre-transposed bf16; b: (N,) f32. Returns (M, N)."""
    M, K = x.shape
    N = w.shape[1]
    tm = _tile(M, _TM, 16)              # 16-row alignment (bf16 sublane packing)
    tn = _tile(N, _TN, 128)
    tk = _tile(K, _TK, 128)
    grid = (M // tm, N // tn, K // tk)

    w_idx = lambda i, j, k: (k, j)
    w_spec = pl.BlockSpec((tk, tn), w_idx)
    if grid[2] >= 3:
        try:    # deeper pipelining on the weight stream (hides DMA on v5e HBM BW)
            w_spec = pl.BlockSpec((tk, tn), w_idx, pipeline_mode=pl.Buffered(3))
        except Exception:
            pass

    kernel = functools.partial(_matmul_kernel, activation=activation)
    return pl.pallas_call(
        kernel,
        grid=grid,
        out_shape=jax.ShapeDtypeStruct((M, N), out_dtype),
        in_specs=[
            pl.BlockSpec((tm, tk), lambda i, j, k: (i, k)),
            w_spec,
            pl.BlockSpec((1, tn), lambda i, j, k: (0, j)),
        ],
        out_specs=pl.BlockSpec((tm, tn), lambda i, j, k: (i, j)),
        scratch_shapes=[pltpu.VMEM((tm, tn), jnp.float32)],
        compiler_params=pltpu.CompilerParams(
            dimension_semantics=("parallel", "parallel", "arbitrary"),
            vmem_limit_bytes=_VMEM_LIMIT,
        ),
    )(x, w, b.reshape(1, N))


def layernorm(x, p, residual=None):
    """x (and optional residual): (B, S, E). Row-tiled LN with fused residual add."""
    B, S, E = x.shape
    T = B * S
    tr = _tile(T, 512, 16)
    row_spec = pl.BlockSpec((tr, E), lambda i: (i, 0))
    vec_spec = pl.BlockSpec((1, E), lambda i: (0, 0))

    args = [x.reshape(T, E)]
    if residual is None:
        kernel = _layernorm_kernel
        in_specs = [row_spec, vec_spec, vec_spec]
    else:
        kernel = _add_layernorm_kernel
        args.append(residual.reshape(T, E))
        in_specs = [row_spec, row_spec, vec_spec, vec_spec]
    args += [p["g"].reshape(1, E), p["b"].reshape(1, E)]

    out = pl.pallas_call(
        kernel,
        grid=(T // tr,),
        out_shape=jax.ShapeDtypeStruct((T, E), COMPUTE_DTYPE),
        in_specs=in_specs,
        out_specs=row_spec,
        compiler_params=pltpu.CompilerParams(
            dimension_semantics=("parallel",),
            vmem_limit_bytes=_VMEM_LIMIT,
        ),
    )(*args)
    return out.reshape(B, S, E)


def attention_self(qkv, n_head):
    """qkv: (B, S, 3E) packed projection. Returns (B, S, E)."""
    B, S, E3 = qkv.shape
    E = E3 // 3
    kernel = functools.partial(_self_attention_kernel, n_head=n_head)
    return pl.pallas_call(
        kernel,
        grid=(B,),
        out_shape=jax.ShapeDtypeStruct((B, S, E), COMPUTE_DTYPE),
        in_specs=[pl.BlockSpec((1, S, E3), lambda b: (b, 0, 0))],
        out_specs=pl.BlockSpec((1, S, E), lambda b: (b, 0, 0)),
        scratch_shapes=[pltpu.VMEM((S, E), jnp.float32)],
        compiler_params=pltpu.CompilerParams(
            dimension_semantics=("parallel",),
            vmem_limit_bytes=_VMEM_LIMIT,
        ),
    )(qkv)


def attention_cross(q, kv, n_head):
    """q: (B, Sq, E); kv: (B, Sk, 2E) packed. Returns (B, Sq, E)."""
    B, Sq, E = q.shape
    Sk = kv.shape[1]
    kernel = functools.partial(_cross_attention_kernel, n_head=n_head)
    return pl.pallas_call(
        kernel,
        grid=(B,),
        out_shape=jax.ShapeDtypeStruct((B, Sq, E), COMPUTE_DTYPE),
        in_specs=[
            pl.BlockSpec((1, Sq, E), lambda b: (b, 0, 0)),
            pl.BlockSpec((1, Sk, 2 * E), lambda b: (b, 0, 0)),
        ],
        out_specs=pl.BlockSpec((1, Sq, E), lambda b: (b, 0, 0)),
        scratch_shapes=[pltpu.VMEM((Sq, E), jnp.float32)],
        compiler_params=pltpu.CompilerParams(
            dimension_semantics=("parallel",),
            vmem_limit_bytes=_VMEM_LIMIT,
        ),
    )(q, kv)


# --------------------------- Transformer modules ----------------------------


def self_attention(x, p, n_head):
    """x: (B, S, E). Fused QKV projection -> attention (in-kernel slicing) -> out proj."""
    B, S, E = x.shape
    qkv = linear(x.reshape(B * S, E), p["w_qkv"], p["b_qkv"])       # (B*S, 3E)
    o = attention_self(qkv.reshape(B, S, 3 * E), n_head)            # (B, S, E)
    o = linear(o.reshape(B * S, E), p["w_out"], p["b_out"])
    return o.reshape(B, S, E)


def cross_attention(x, mem, p, n_head):
    """x: (B, Sq, E) queries; mem: (B, Sk, E) keys/values (fused KV projection)."""
    B, Sq, E = x.shape
    Sk = mem.shape[1]
    q = linear(x.reshape(B * Sq, E), p["w_q"], p["b_q"]).reshape(B, Sq, E)
    kv = linear(mem.reshape(B * Sk, E), p["w_kv"], p["b_kv"]).reshape(B, Sk, 2 * E)
    o = attention_cross(q, kv, n_head)
    o = linear(o.reshape(B * Sq, E), p["w_out"], p["b_out"])
    return o.reshape(B, Sq, E)


def ffn(x, p):
    B, S, E = x.shape
    h = linear(x.reshape(B * S, E), p["w1"], p["b1"], activation="relu")
    o = linear(h, p["w2"], p["b2"])
    return o.reshape(B, S, E)


def encoder_layer(x, p, n_head):
    a = self_attention(x, p["self_attn"], n_head)
    x = layernorm(x, p["norm1"], residual=a)
    f = ffn(x, p)
    x = layernorm(x, p["norm2"], residual=f)
    return x


def decoder_layer(x, mem, p, n_head):
    a = self_attention(x, p["self_attn"], n_head)
    x = layernorm(x, p["norm1"], residual=a)
    a = cross_attention(x, mem, p["cross_attn"], n_head)
    x = layernorm(x, p["norm2"], residual=a)
    f = ffn(x, p)
    x = layernorm(x, p["norm3"], residual=f)
    return x


@functools.partial(jax.jit, static_argnames=("n_head",))
def transformer_model_forward(params, tokens, n_head):
    """tokens: (seq, batch) int32 -> logits (seq, batch, vocab) f32."""
    S, N = tokens.shape
    E = params["embedding"].shape[1]

    # Embedding lookup (XLA gather glue), directly into batch-first layout.
    x = jnp.take(params["embedding"], tokens.T, axis=0)              # (N, S, E) bf16

    # Encoder (src = x).  No masks: matches nn.Transformer(x, x) with default args.
    mem = x
    for lp in params["encoder"]:
        mem = encoder_layer(mem, lp, n_head)
    mem = layernorm(mem, params["enc_norm"])

    # Decoder (tgt = x, memory = encoder output).
    out = x
    for lp in params["decoder"]:
        out = decoder_layer(out, mem, lp, n_head)
    out = layernorm(out, params["dec_norm"])

    # Transpose only the tiny (N, S, E) activation; the vocab projection then writes
    # the large (S, N, V) f32 logits directly in output layout (no big XLA transpose).
    out = jnp.transpose(out, (1, 0, 2))                              # (S, N, E)
    logits = linear(out.reshape(S * N, E), params["fc"]["w"], params["fc"]["b"],
                    out_dtype=jnp.float32)
    return logits.reshape(S, N, -1)


# ----------------------------- Param init -----------------------------------


class _KeyGen:
    def __init__(self, key):
        self._key = key
        self._i = 0

    def __call__(self):
        self._i += 1
        return jax.random.fold_in(self._key, self._i)


def init_params(key, vocab_size, n_embd, n_layer, d_ff):
    """Weights are stored PRE-TRANSPOSED as (in_dim, out_dim) and in bf16 so no
    per-call transpose / cast is needed; biases / LN params stay f32."""
    kg = _KeyGen(key)
    E = n_embd

    def w(in_d, out_d):
        return (0.02 * jax.random.normal(kg(), (in_d, out_d), jnp.float32)
                ).astype(COMPUTE_DTYPE)

    def ln():
        return {"g": jnp.ones((E,), jnp.float32), "b": jnp.zeros((E,), jnp.float32)}

    def self_attn():
        return {"w_qkv": w(E, 3 * E), "b_qkv": jnp.zeros((3 * E,), jnp.float32),
                "w_out": w(E, E), "b_out": jnp.zeros((E,), jnp.float32)}

    def cross_attn():
        return {"w_q": w(E, E), "b_q": jnp.zeros((E,), jnp.float32),
                "w_kv": w(E, 2 * E), "b_kv": jnp.zeros((2 * E,), jnp.float32),
                "w_out": w(E, E), "b_out": jnp.zeros((E,), jnp.float32)}

    def enc_layer():
        return {"self_attn": self_attn(),
                "w1": w(E, d_ff), "b1": jnp.zeros((d_ff,), jnp.float32),
                "w2": w(d_ff, E), "b2": jnp.zeros((E,), jnp.float32),
                "norm1": ln(), "norm2": ln()}

    def dec_layer():
        return {"self_attn": self_attn(), "cross_attn": cross_attn(),
                "w1": w(E, d_ff), "b1": jnp.zeros((d_ff,), jnp.float32),
                "w2": w(d_ff, E), "b2": jnp.zeros((E,), jnp.float32),
                "norm1": ln(), "norm2": ln(), "norm3": ln()}

    return {
        "embedding": w(vocab_size, E),
        "encoder": [enc_layer() for _ in range(n_layer)],
        "enc_norm": ln(),
        "decoder": [dec_layer() for _ in range(n_layer)],
        "dec_norm": ln(),
        "fc": {"w": w(E, vocab_size), "b": jnp.zeros((vocab_size,), jnp.float32)},
    }


# --------------------------------- main --------------------------------------

if __name__ == "__main__":
    # Small config, lane-aligned dims (multiples of 128 where it matters).
    VOCAB, N_EMBD, N_LAYER, N_HEAD, D_FF = 1024, 128, 2, 4, 512
    SEQ, BATCH = 8, 2

    root = jax.random.PRNGKey(0)
    k_params, k_tokens = jax.random.split(root)

    params = init_params(k_params, VOCAB, N_EMBD, N_LAYER, D_FF)
    tokens = jax.random.randint(k_tokens, (SEQ, BATCH), 0, VOCAB, dtype=jnp.int32)

    logits = transformer_model_forward(params, tokens, n_head=N_HEAD)
    jax.block_until_ready(logits)

    assert logits.shape == (SEQ, BATCH, VOCAB), logits.shape
    assert logits.dtype == jnp.float32
    assert bool(jnp.all(jnp.isfinite(logits)))
    print("KERNEL_OK")
</pallas_src>

<mosaic_0001>
module attributes {stable_mosaic.version = 11 : i64} {
  func.func @_matmul_kernel(%arg0: i32, %arg1: i32, %arg2: i32, %arg3: memref<16x128xbf16, #tpu.memory_space<vmem>>, %arg4: memref<128x384xbf16, #tpu.memory_space<vmem>>, %arg5: memref<1x384xf32, #tpu.memory_space<vmem>>, %arg6: memref<16x384xbf16, #tpu.memory_space<vmem>>, %arg7: memref<16x384xf32, #tpu.memory_space<vmem>>) attributes {dimension_semantics = [#tpu.dimension_semantics<parallel>, #tpu.dimension_semantics<parallel>, #tpu.dimension_semantics<arbitrary>], iteration_bounds = array<i64: 1, 1, 1>, scalar_prefetch = 0 : i64, scratch_operands = 1 : i64, tpu.core_type = #tpu.core_type<tc>, window_params = [{transform_indices = @transform_0, window_bounds = array<i64: 16, 128>}, {transform_indices = @transform_1, window_bounds = array<i64: 128, 384>}, {transform_indices = @transform_2, window_bounds = array<i64: 1, 384>}, {transform_indices = @transform_3, window_bounds = array<i64: 16, 384>}]} {
    %c0_i32 = arith.constant 0 : i32
    %0 = arith.cmpi eq, %arg2, %c0_i32 : i32
    %1 = arith.extui %0 : i1 to i32
    %c0_i32_0 = arith.constant 0 : i32
    %2 = arith.cmpi ne, %1, %c0_i32_0 : i32
    scf.if %2 {
      %cst_10 = arith.constant 0.000000e+00 : f32
      %12 = vector.broadcast %cst_10 : f32 to vector<16x384xf32>
      %c0_11 = arith.constant 0 : index
      %c0_12 = arith.constant 0 : index
      %13 = vector.load %arg7[%c0_11, %c0_12] : memref<16x384xf32, #tpu.memory_space<vmem>>, vector<16x384xf32>
      tpu.vector_store %arg7[%c0_11, %c0_12], %12 {strides = array<i32>} : memref<16x384xf32, #tpu.memory_space<vmem>>, vector<16x384xf32>,
    } else {
    }
    %c0 = arith.constant 0 : index
    %c0_1 = arith.constant 0 : index
    %3 = vector.load %arg7[%c0, %c0_1] : memref<16x384xf32, #tpu.memory_space<vmem>>, vector<16x384xf32>
    %c0_2 = arith.constant 0 : index
    %c0_3 = arith.constant 0 : index
    %4 = vector.load %arg3[%c0_2, %c0_3] : memref<16x128xbf16, #tpu.memory_space<vmem>>, vector<16x128xbf16>
    %c0_4 = arith.constant 0 : index
    %c0_5 = arith.constant 0 : index
    %5 = vector.load %arg4[%c0_4, %c0_5] : memref<128x384xbf16, #tpu.memory_space<vmem>>, vector<128x384xbf16>
    %cst = arith.constant dense<0.000000e+00> : vector<16x384xf32>
    %6 = tpu.matmul %4, %5, %cst {dimension_numbers = #tpu.dot_dimension_numbers<[1], [0], [0], [1], [0, 0, 1, 1], [], []>} : vector<16x128xbf16>, vector<128x384xbf16>, vector<16x384xf32> -> vector<16x384xf32>
    %7 = arith.addf %3, %6 : vector<16x384xf32>
    %c0_6 = arith.constant 0 : index
    %c0_7 = arith.constant 0 : index
    %8 = vector.load %arg7[%c0_6, %c0_7] : memref<16x384xf32, #tpu.memory_space<vmem>>, vector<16x384xf32>
    tpu.vector_store %arg7[%c0_6, %c0_7], %7 {strides = array<i32>} : memref<16x384xf32, #tpu.memory_space<vmem>>, vector<16x384xf32>,
    %c0_i32_8 = arith.constant 0 : i32
    %9 = arith.cmpi eq, %arg2, %c0_i32_8 : i32
    %10 = arith.extui %9 : i1 to i32
    %c0_i32_9 = arith.constant 0 : i32
    %11 = arith.cmpi ne, %10, %c0_i32_9 : i32
    scf.if %11 {
      %c0_10 = arith.constant 0 : index
      %c0_11 = arith.constant 0 : index
      %12 = vector.load %arg7[%c0_10, %c0_11] : memref<16x384xf32, #tpu.memory_space<vmem>>, vector<16x384xf32>
      %c0_12 = arith.constant 0 : index
      %c0_13 = arith.constant 0 : index
      %13 = vector.load %arg5[%c0_12, %c0_13] : memref<1x384xf32, #tpu.memory_space<vmem>>, vector<1x384xf32>
      %14 = vector.broadcast %13 : vector<1x384xf32> to vector<16x384xf32>
      %15 = arith.addf %12, %14 : vector<16x384xf32>
      %16 = arith.truncf %15 : vector<16x384xf32> to vector<16x384xbf16>
      %c0_14 = arith.constant 0 : index
      %c0_15 = arith.constant 0 : index
      %17 = vector.load %arg6[%c0_14, %c0_15] : memref<16x384xbf16, #tpu.memory_space<vmem>>, vector<16x384xbf16>
      tpu.vector_store %arg6[%c0_14, %c0_15], %16 {strides = array<i32>} : memref<16x384xbf16, #tpu.memory_space<vmem>>, vector<16x384xbf16>,
    } else {
    }
    return
  }
  func.func @transform_0(%arg0: i32, %arg1: i32, %arg2: i32) -> (i32, i32) {
    %c0_i32 = arith.constant 0 : i32
    return %arg0, %arg2 : i32, i32
  }
  func.func @transform_1(%arg0: i32, %arg1: i32, %arg2: i32) -> (i32, i32) {
    %c0_i32 = arith.constant 0 : i32
    return %arg2, %arg1 : i32, i32
  }
  func.func @transform_2(%arg0: i32, %arg1: i32, %arg2: i32) -> (i32, i32) {
    %c0_i32 = arith.constant 0 : i32
    %c0_i32_0 = arith.constant 0 : i32
    return %c0_i32, %arg1 : i32, i32
  }
  func.func @transform_3(%arg0: i32, %arg1: i32, %arg2: i32) -> (i32, i32) {
    %c0_i32 = arith.constant 0 : i32
    return %arg0, %arg1 : i32, i32
  }
}

module attributes {stable_mosaic.version = 11 : i64} {
  func.func @_self_attention_kernel(%arg0: i32, %arg1: memref<1x8x384xbf16, #tpu.memory_space<vmem>>, %arg2: memref<1x8x128xbf16, #tpu.memory_space<vmem>>, %arg3: memref<8x128xf32, #tpu.memory_space<vmem>>) attributes {dimension_semantics = [#tpu.dimension_semantics<parallel>], iteration_bounds = array<i64: 2>, scalar_prefetch = 0 : i64, scratch_operands = 1 : i64, tpu.core_type = #tpu.core_type<tc>, window_params = [{transform_indices = @transform_0, window_bounds = array<i64: 1, 8, 384>}, {transform_indices = @transform_1, window_bounds = array<i64: 1, 8, 128>}]} {
    %c0 = arith.constant 0 : index
    %c0_0 = arith.constant 0 : index
    %c0_1 = arith.constant 0 : index
    %0 = vector.load %arg1[%c0, %c0_0, %c0_1] : memref<1x8x384xbf16, #tpu.memory_space<vmem>>, vector<1x8x384xbf16>
    %1 = vector.shape_cast %0 : vector<1x8x384xbf16> to vector<8x384xbf16>
    %2 = vector.extract_strided_slice %1 {offsets = [0, 0], sizes = [8, 128], strides = [1, 1]} : vector<8x384xbf16> to vector<8x128xbf16>
    %3 = arith.extf %2 : vector<8x128xbf16> to vector<8x128xf32>
    %cst = arith.constant 0.176776692 : f32
    %4 = vector.broadcast %cst : f32 to vector<8x128xf32>
    %5 = arith.mulf %3, %4 : vector<8x128xf32>
    %6 = arith.truncf %5 : vector<8x128xf32> to vector<8x128xbf16>
    %7 = vector.extract_strided_slice %1 {offsets = [0, 128], sizes = [8, 128], strides = [1, 1]} : vector<8x384xbf16> to vector<8x128xbf16>
    %8 = vector.extract_strided_slice %1 {offsets = [0, 256], sizes = [8, 128], strides = [1, 1]} : vector<8x384xbf16> to vector<8x128xbf16>
    %9 = vector.extract_strided_slice %6 {offsets = [0, 0], sizes = [8, 32], strides = [1, 1]} : vector<8x128xbf16> to vector<8x32xbf16>
    %10 = vector.extract_strided_slice %7 {offsets = [0, 0], sizes = [8, 32], strides = [1, 1]} : vector<8x128xbf16> to vector<8x32xbf16>
    %cst_2 = arith.constant dense<0.000000e+00> : vector<8x8xf32>
    %11 = tpu.matmul %9, %10, %cst_2 {dimension_numbers = #tpu.dot_dimension_numbers<[1], [1], [0], [0], [0, 0, 1, 0], [], []>} : vector<8x32xbf16>, vector<8x32xbf16>, vector<8x8xf32> -> vector<8x8xf32>
    %cst_3 = arith.constant dense<0xFF800000> : vector<8xf32>
    %12 = vector.multi_reduction <maximumf>, %11, %cst_3 [1] : vector<8x8xf32> to vector<8xf32>
    %13 = vector.shape_cast %12 : vector<8xf32> to vector<8x1xf32>
    %14 = vector.broadcast %13 : vector<8x1xf32> to vector<8x8xf32>
    %15 = arith.subf %11, %14 : vector<8x8xf32>
    %16 = math.exp %15 : vector<8x8xf32>
    %cst_4 = arith.constant dense<0.000000e+00> : vector<8xf32>
    %17 = vector.multi_reduction <add>, %16, %cst_4 [1] : vector<8x8xf32> to vector<8xf32>
    %18 = vector.shape_cast %17 : vector<8xf32> to vector<8x1xf32>
    %19 = tpu.reciprocal %18 {approx = true} : vector<8x1xf32> -> vector<8x1xf32>
    %20 = vector.broadcast %19 : vector<8x1xf32> to vector<8x8xf32>
    %21 = arith.mulf %16, %20 : vector<8x8xf32>
    %22 = arith.truncf %21 : vector<8x8xf32> to vector<8x8xbf16>
    %23 = vector.extract_strided_slice %8 {offsets = [0, 0], sizes = [8, 32], strides = [1, 1]} : vector<8x128xbf16> to vector<8x32xbf16>
    %cst_5 = arith.constant dense<0.000000e+00> : vector<8x32xf32>
    %24 = tpu.matmul %22, %23, %cst_5 {dimension_numbers = #tpu.dot_dimension_numbers<[1], [0], [0], [1], [0, 0, 1, 1], [], []>} : vector<8x8xbf16>, vector<8x32xbf16>, vector<8x32xf32> -> vector<8x32xf32>
    %c0_6 = arith.constant 0 : index
    %c0_7 = arith.constant 0 : index
    %25 = vector.load %arg3[%c0_6, %c0_7] : memref<8x128xf32, #tpu.memory_space<vmem>>, vector<8x32xf32>
    tpu.vector_store %arg3[%c0_6, %c0_7], %24 {strides = array<i32>} : memref<8x128xf32, #tpu.memory_space<vmem>>, vector<8x32xf32>,
    %26 = vector.extract_strided_slice %6 {offsets = [0, 32], sizes = [8, 32], strides = [1, 1]} : vector<8x128xbf16> to vector<8x32xbf16>
    %27 = vector.extract_strided_slice %7 {offsets = [0, 32], sizes = [8, 32], strides = [1, 1]} : vector<8x128xbf16> to vector<8x32xbf16>
    %cst_8 = arith.constant dense<0.000000e+00> : vector<8x8xf32>
    %28 = tpu.matmul %26, %27, %cst_8 {dimension_numbers = #tpu.dot_dimension_numbers<[1], [1], [0], [0], [0, 0, 1, 0], [], []>} : vector<8x32xbf16>, vector<8x32xbf16>, vector<8x8xf32> -> vector<8x8xf32>
    %cst_9 = arith.constant dense<0xFF800000> : vector<8xf32>
    %29 = vector.multi_reduction <maximumf>, %28, %cst_9 [1] : vector<8x8xf32> to vector<8xf32>
    %30 = vector.shape_cast %29 : vector<8xf32> to vector<8x1xf32>
    %31 = vector.broadcast %30 : vector<8x1xf32> to vector<8x8xf32>
    %32 = arith.subf %28, %31 : vector<8x8xf32>
    %33 = math.exp %32 : vector<8x8xf32>
    %cst_10 = arith.constant dense<0.000000e+00> : vector<8xf32>
    %34 = vector.multi_reduction <add>, %33, %cst_10 [1] : vector<8x8xf32> to vector<8xf32>
    %35 = vector.shape_cast %34 : vector<8xf32> to vector<8x1xf32>
    %36 = tpu.reciprocal %35 {approx = true} : vector<8x1xf32> -> vector<8x1xf32>
    %37 = vector.broadcast %36 : vector<8x1xf32> to vector<8x8xf32>
    %38 = arith.mulf %33, %37 : vector<8x8xf32>
    %39 = arith.truncf %38 : vector<8x8xf32> to vector<8x8xbf16>
    %40 = vector.extract_strided_slice %8 {offsets = [0, 32], sizes = [8, 32], strides = [1, 1]} : vector<8x128xbf16> to vector<8x32xbf16>
    %cst_11 = arith.constant dense<0.000000e+00> : vector<8x32xf32>
    %41 = tpu.matmul %39, %40, %cst_11 {dimension_numbers = #tpu.dot_dimension_numbers<[1], [0], [0], [1], [0, 0, 1, 1], [], []>} : vector<8x8xbf16>, vector<8x32xbf16>, vector<8x32xf32> -> vector<8x32xf32>
    %c0_12 = arith.constant 0 : index
    %c32 = arith.constant 32 : index
    %42 = vector.load %arg3[%c0_12, %c32] : memref<8x128xf32, #tpu.memory_space<vmem>>, vector<8x32xf32>
    tpu.vector_store %arg3[%c0_12, %c32], %41 {strides = array<i32>} : memref<8x128xf32, #tpu.memory_space<vmem>>, vector<8x32xf32>,
    %43 = vector.extract_strided_slice %6 {offsets = [0, 64], sizes = [8, 32], strides = [1, 1]} : vector<8x128xbf16> to vector<8x32xbf16>
    %44 = vector.extract_strided_slice %7 {offsets = [0, 64], sizes = [8, 32], strides = [1, 1]} : vector<8x128xbf16> to vector<8x32xbf16>
    %cst_13 = arith.constant dense<0.000000e+00> : vector<8x8xf32>
    %45 = tpu.matmul %43, %44, %cst_13 {dimension_numbers = #tpu.dot_dimension_numbers<[1], [1], [0], [0], [0, 0, 1, 0], [], []>} : vector<8x32xbf16>, vector<8x32xbf16>, vector<8x8xf32> -> vector<8x8xf32>
    %cst_14 = arith.constant dense<0xFF800000> : vector<8xf32>
    %46 = vector.multi_reduction <maximumf>, %45, %cst_14 [1] : vector<8x8xf32> to vector<8xf32>
    %47 = vector.shape_cast %46 : vector<8xf32> to vector<8x1xf32>
    %48 = vector.broadcast %47 : vector<8x1xf32> to vector<8x8xf32>
    %49 = arith.subf %45, %48 : vector<8x8xf32>
    %50 = math.exp %49 : vector<8x8xf32>
    %cst_15 = arith.constant dense<0.000000e+00> : vector<8xf32>
    %51 = vector.multi_reduction <add>, %50, %cst_15 [1] : vector<8x8xf32> to vector<8xf32>
    %52 = vector.shape_cast %51 : vector<8xf32> to vector<8x1xf32>
    %53 = tpu.reciprocal %52 {approx = true} : vector<8x1xf32> -> vector<8x1xf32>
    %54 = vector.broadcast %53 : vector<8x1xf32> to vector<8x8xf32>
    %55 = arith.mulf %50, %54 : vector<8x8xf32>
    %56 = arith.truncf %55 : vector<8x8xf32> to vector<8x8xbf16>
    %57 = vector.extract_strided_slice %8 {offsets = [0, 64], sizes = [8, 32], strides = [1, 1]} : vector<8x128xbf16> to vector<8x32xbf16>
    %cst_16 = arith.constant dense<0.000000e+00> : vector<8x32xf32>
    %58 = tpu.matmul %56, %57, %cst_16 {dimension_numbers = #tpu.dot_dimension_numbers<[1], [0], [0], [1], [0, 0, 1, 1], [], []>} : vector<8x8xbf16>, vector<8x32xbf16>, vector<8x32xf32> -> vector<8x32xf32>
    %c0_17 = arith.constant 0 : index
    %c64 = arith.constant 64 : index
    %59 = vector.load %arg3[%c0_17, %c64] : memref<8x128xf32, #tpu.memory_space<vmem>>, vector<8x32xf32>
    tpu.vector_store %arg3[%c0_17, %c64], %58 {strides = array<i32>} : memref<8x128xf32, #tpu.memory_space<vmem>>, vector<8x32xf32>,
    %60 = vector.extract_strided_slice %6 {offsets = [0, 96], sizes = [8, 32], strides = [1, 1]} : vector<8x128xbf16> to vector<8x32xbf16>
    %61 = vector.extract_strided_slice %7 {offsets = [0, 96], sizes = [8, 32], strides = [1, 1]} : vector<8x128xbf16> to vector<8x32xbf16>
    %cst_18 = arith.constant dense<0.000000e+00> : vector<8x8xf32>
    %62 = tpu.matmul %60, %61, %cst_18 {dimension_numbers = #tpu.dot_dimension_numbers<[1], [1], [0], [0], [0, 0, 1, 0], [], []>} : vector<8x32xbf16>, vector<8x32xbf16>, vector<8x8xf32> -> vector<8x8xf32>
    %cst_19 = arith.constant dense<0xFF800000> : vector<8xf32>
    %63 = vector.multi_reduction <maximumf>, %62, %cst_19 [1] : vector<8x8xf32> to vector<8xf32>
    %64 = vector.shape_cast %63 : vector<8xf32> to vector<8x1xf32>
    %65 = vector.broadcast %64 : vector<8x1xf32> to vector<8x8xf32>
    %66 = arith.subf %62, %65 : vector<8x8xf32>
    %67 = math.exp %66 : vector<8x8xf32>
    %cst_20 = arith.constant dense<0.000000e+00> : vector<8xf32>
    %68 = vector.multi_reduction <add>, %67, %cst_20 [1] : vector<8x8xf32> to vector<8xf32>
    %69 = vector.shape_cast %68 : vector<8xf32> to vector<8x1xf32>
    %70 = tpu.reciprocal %69 {approx = true} : vector<8x1xf32> -> vector<8x1xf32>
    %71 = vector.broadcast %70 : vector<8x1xf32> to vector<8x8xf32>
    %72 = arith.mulf %67, %71 : vector<8x8xf32>
    %73 = arith.truncf %72 : vector<8x8xf32> to vector<8x8xbf16>
    %74 = vector.extract_strided_slice %8 {offsets = [0, 96], sizes = [8, 32], strides = [1, 1]} : vector<8x128xbf16> to vector<8x32xbf16>
    %cst_21 = arith.constant dense<0.000000e+00> : vector<8x32xf32>
    %75 = tpu.matmul %73, %74, %cst_21 {dimension_numbers = #tpu.dot_dimension_numbers<[1], [0], [0], [1], [0, 0, 1, 1], [], []>} : vector<8x8xbf16>, vector<8x32xbf16>, vector<8x32xf32> -> vector<8x32xf32>
    %c0_22 = arith.constant 0 : index
    %c96 = arith.constant 96 : index
    %76 = vector.load %arg3[%c0_22, %c96] : memref<8x128xf32, #tpu.memory_space<vmem>>, vector<8x32xf32>
    tpu.vector_store %arg3[%c0_22, %c96], %75 {strides = array<i32>} : memref<8x128xf32, #tpu.memory_space<vmem>>, vector<8x32xf32>,
    %c0_23 = arith.constant 0 : index
    %c0_24 = arith.constant 0 : index
    %77 = vector.load %arg3[%c0_23, %c0_24] : memref<8x128xf32, #tpu.memory_space<vmem>>, vector<8x128xf32>
    %78 = arith.truncf %77 : vector<8x128xf32> to vector<8x128xbf16>
    %c0_25 = arith.constant 0 : index
    %c0_26 = arith.constant 0 : index
    %c0_27 = arith.constant 0 : index
    %79 = vector.load %arg2[%c0_25, %c0_26, %c0_27] : memref<1x8x128xbf16, #tpu.memory_space<vmem>>, vector<1x8x128xbf16>
    %80 = vector.shape_cast %79 : vector<1x8x128xbf16> to vector<8x128xbf16>
    %81 = vector.shape_cast %78 : vector<8x128xbf16> to vector<1x8x128xbf16>
    tpu.vector_store %arg2[%c0_25, %c0_26, %c0_27], %81 {strides = array<i32>} : memref<1x8x128xbf16, #tpu.memory_space<vmem>>, vector<1x8x128xbf16>,
    return
  }
  func.func @transform_0(%arg0: i32) -> (i32, i32, i32) {
    %c0_i32 = arith.constant 0 : i32
    %c0_i32_0 = arith.constant 0 : i32
    %c0_i32_1 = arith.constant 0 : i32
    return %arg0, %c0_i32, %c0_i32_0 : i32, i32, i32
  }
  func.func @transform_1(%arg0: i32) -> (i32, i32, i32) {
    %c0_i32 = arith.constant 0 : i32
    %c0_i32_0 = arith.constant 0 : i32
    %c0_i32_1 = arith.constant 0 : i32
    return %arg0, %c0_i32, %c0_i32_0 : i32, i32, i32
  }
}

module attributes {stable_mosaic.version = 11 : i64} {
  func.func @_matmul_kernel(%arg0: i32, %arg1: i32, %arg2: i32, %arg3: memref<16x128xbf16, #tpu.memory_space<vmem>>, %arg4: memref<128x128xbf16, #tpu.memory_space<vmem>>, %arg5: memref<1x128xf32, #tpu.memory_space<vmem>>, %arg6: memref<16x128xbf16, #tpu.memory_space<vmem>>, %arg7: memref<16x128xf32, #tpu.memory_space<vmem>>) attributes {dimension_semantics = [#tpu.dimension_semantics<parallel>, #tpu.dimension_semantics<parallel>, #tpu.dimension_semantics<arbitrary>], iteration_bounds = array<i64: 1, 1, 1>, scalar_prefetch = 0 : i64, scratch_operands = 1 : i64, tpu.core_type = #tpu.core_type<tc>, window_params = [{transform_indices = @transform_0, window_bounds = array<i64: 16, 128>}, {transform_indices = @transform_1, window_bounds = array<i64: 128, 128>}, {transform_indices = @transform_2, window_bounds = array<i64: 1, 128>}, {transform_indices = @transform_3, window_bounds = array<i64: 16, 128>}]} {
    %c0_i32 = arith.constant 0 : i32
    %0 = arith.cmpi eq, %arg2, %c0_i32 : i32
    %1 = arith.extui %0 : i1 to i32
    %c0_i32_0 = arith.constant 0 : i32
    %2 = arith.cmpi ne, %1, %c0_i32_0 : i32
    scf.if %2 {
      %cst_10 = arith.constant 0.000000e+00 : f32
      %12 = vector.broadcast %cst_10 : f32 to vector<16x128xf32>
      %c0_11 = arith.constant 0 : index
      %c0_12 = arith.constant 0 : index
      %13 = vector.load %arg7[%c0_11, %c0_12] : memref<16x128xf32, #tpu.memory_space<vmem>>, vector<16x128xf32>
      tpu.vector_store %arg7[%c0_11, %c0_12], %12 {strides = array<i32>} : memref<16x128xf32, #tpu.memory_space<vmem>>, vector<16x128xf32>,
    } else {
    }
    %c0 = arith.constant 0 : index
    %c0_1 = arith.constant 0 : index
    %3 = vector.load %arg7[%c0, %c0_1] : memref<16x128xf32, #tpu.memory_space<vmem>>, vector<16x128xf32>
    %c0_2 = arith.constant 0 : index
    %c0_3 = arith.constant 0 : index
    %4 = vector.load %arg3[%c0_2, %c0_3] : memref<16x128xbf16, #tpu.memory_space<vmem>>, vector<16x128xbf16>
    %c0_4 = arith.constant 0 : index
    %c0_5 = arith.constant 0 : index
    %5 = vector.load %arg4[%c0_4, %c0_5] : memref<128x128xbf16, #tpu.memory_space<vmem>>, vector<128x128xbf16>
    %cst = arith.constant dense<0.000000e+00> : vector<16x128xf32>
    %6 = tpu.matmul %4, %5, %cst {dimension_numbers = #tpu.dot_dimension_numbers<[1], [0], [0], [1], [0, 0, 1, 1], [], []>} : vector<16x128xbf16>, vector<128x128xbf16>, vector<16x128xf32> -> vector<16x128xf32>
    %7 = arith.addf %3, %6 : vector<16x128xf32>
    %c0_6 = arith.constant 0 : index
    %c0_7 = arith.constant 0 : index
    %8 = vector.load %arg7[%c0_6, %c0_7] : memref<16x128xf32, #tpu.memory_space<vmem>>, vector<16x128xf32>
    tpu.vector_store %arg7[%c0_6, %c0_7], %7 {strides = array<i32>} : memref<16x128xf32, #tpu.memory_space<vmem>>, vector<16x128xf32>,
    %c0_i32_8 = arith.constant 0 : i32
    %9 = arith.cmpi eq, %arg2, %c0_i32_8 : i32
    %10 = arith.extui %9 : i1 to i32
    %c0_i32_9 = arith.constant 0 : i32
    %11 = arith.cmpi ne, %10, %c0_i32_9 : i32
    scf.if %11 {
      %c0_10 = arith.constant 0 : index
      %c0_11 = arith.constant 0 : index
      %12 = vector.load %arg7[%c0_10, %c0_11] : memref<16x128xf32, #tpu.memory_space<vmem>>, vector<16x128xf32>
      %c0_12 = arith.constant 0 : index
      %c0_13 = arith.constant 0 : index
      %13 = vector.load %arg5[%c0_12, %c0_13] : memref<1x128xf32, #tpu.memory_space<vmem>>, vector<1x128xf32>
      %14 = vector.broadcast %13 : vector<1x128xf32> to vector<16x128xf32>
      %15 = arith.addf %12, %14 : vector<16x128xf32>
      %16 = arith.truncf %15 : vector<16x128xf32> to vector<16x128xbf16>
      %c0_14 = arith.constant 0 : index
      %c0_15 = arith.constant 0 : index
      %17 = vector.load %arg6[%c0_14, %c0_15] : memref<16x128xbf16, #tpu.memory_space<vmem>>, vector<16x128xbf16>
      tpu.vector_store %arg6[%c0_14, %c0_15], %16 {strides = array<i32>} : memref<16x128xbf16, #tpu.memory_space<vmem>>, vector<16x128xbf16>,
    } else {
    }
    return
  }
  func.func @transform_0(%arg0: i32, %arg1: i32, %arg2: i32) -> (i32, i32) {
    %c0_i32 = arith.constant 0 : i32
    return %arg0, %arg2 : i32, i32
  }
  func.func @transform_1(%arg0: i32, %arg1: i32, %arg2: i32) -> (i32, i32) {
    %c0_i32 = arith.constant 0 : i32
    return %arg2, %arg1 : i32, i32
  }
  func.func @transform_2(%arg0: i32, %arg1: i32, %arg2: i32) -> (i32, i32) {
    %c0_i32 = arith.constant 0 : i32
    %c0_i32_0 = arith.constant 0 : i32
    return %c0_i32, %arg1 : i32, i32
  }
  func.func @transform_3(%arg0: i32, %arg1: i32, %arg2: i32) -> (i32, i32) {
    %c0_i32 = arith.constant 0 : i32
    return %arg0, %arg1 : i32, i32
  }
}

module attributes {stable_mosaic.version = 11 : i64} {
  func.func @_add_layernorm_kernel(%arg0: i32, %arg1: memref<16x128xbf16, #tpu.memory_space<vmem>>, %arg2: memref<16x128xbf16, #tpu.memory_space<vmem>>, %arg3: memref<1x128xf32, #tpu.memory_space<vmem>>, %arg4: memref<1x128xf32, #tpu.memory_space<vmem>>, %arg5: memref<16x128xbf16, #tpu.memory_space<vmem>>) attributes {dimension_semantics = [#tpu.dimension_semantics<parallel>], iteration_bounds = array<i64: 1>, scalar_prefetch = 0 : i64, scratch_operands = 0 : i64, tpu.core_type = #tpu.core_type<tc>, window_params = [{transform_indices = @transform_0, window_bounds = array<i64: 16, 128>}, {transform_indices = @transform_1, window_bounds = array<i64: 16, 128>}, {pipeline_mode = #tpu.pipeline_mode<synchronous>, transform_indices = @transform_2, window_bounds = array<i64: 1, 128>}, {pipeline_mode = #tpu.pipeline_mode<synchronous>, transform_indices = @transform_3, window_bounds = array<i64: 1, 128>}, {transform_indices = @transform_4, window_bounds = array<i64: 16, 128>}]} {
    %c0 = arith.constant 0 : index
    %c0_0 = arith.constant 0 : index
    %0 = vector.load %arg1[%c0, %c0_0] : memref<16x128xbf16, #tpu.memory_space<vmem>>, vector<16x128xbf16>
    %1 = arith.extf %0 : vector<16x128xbf16> to vector<16x128xf32>
    %c0_1 = arith.constant 0 : index
    %c0_2 = arith.constant 0 : index
    %2 = vector.load %arg2[%c0_1, %c0_2] : memref<16x128xbf16, #tpu.memory_space<vmem>>, vector<16x128xbf16>
    %3 = arith.extf %2 : vector<16x128xbf16> to vector<16x128xf32>
    %4 = arith.addf %1, %3 : vector<16x128xf32>
    %cst = arith.constant dense<0.000000e+00> : vector<16xf32>
    %5 = vector.multi_reduction <add>, %4, %cst [1] : vector<16x128xf32> to vector<16xf32>
    %6 = vector.shape_cast %5 : vector<16xf32> to vector<16x1xf32>
    %cst_3 = arith.constant 1.280000e+02 : f32
    %7 = vector.broadcast %cst_3 : f32 to vector<16x1xf32>
    %8 = arith.divf %6, %7 : vector<16x1xf32>
    %9 = vector.broadcast %8 : vector<16x1xf32> to vector<16x128xf32>
    %10 = arith.subf %4, %9 : vector<16x128xf32>
    %11 = arith.mulf %10, %10 : vector<16x128xf32>
    %cst_4 = arith.constant dense<0.000000e+00> : vector<16xf32>
    %12 = vector.multi_reduction <add>, %11, %cst_4 [1] : vector<16x128xf32> to vector<16xf32>
    %13 = vector.shape_cast %12 : vector<16xf32> to vector<16x1xf32>
    %cst_5 = arith.constant 1.280000e+02 : f32
    %14 = vector.broadcast %cst_5 : f32 to vector<16x1xf32>
    %15 = arith.divf %13, %14 : vector<16x1xf32>
    %cst_6 = arith.constant 9.99999974E-6 : f32
    %16 = vector.broadcast %cst_6 : f32 to vector<16x1xf32>
    %17 = arith.addf %15, %16 : vector<16x1xf32>
    %18 = math.rsqrt %17 : vector<16x1xf32>
    %19 = vector.broadcast %18 : vector<16x1xf32> to vector<16x128xf32>
    %20 = arith.mulf %10, %19 : vector<16x128xf32>
    %c0_7 = arith.constant 0 : index
    %c0_8 = arith.constant 0 : index
    %21 = vector.load %arg3[%c0_7, %c0_8] : memref<1x128xf32, #tpu.memory_space<vmem>>, vector<1x128xf32>
    %22 = vector.broadcast %21 : vector<1x128xf32> to vector<16x128xf32>
    %23 = arith.mulf %20, %22 : vector<16x128xf32>
    %c0_9 = arith.constant 0 : index
    %c0_10 = arith.constant 0 : index
    %24 = vector.load %arg4[%c0_9, %c0_10] : memref<1x128xf32, #tpu.memory_space<vmem>>, vector<1x128xf32>
    %25 = vector.broadcast %24 : vector<1x128xf32> to vector<16x128xf32>
    %26 = arith.addf %23, %25 : vector<16x128xf32>
    %27 = arith.truncf %26 : vector<16x128xf32> to vector<16x128xbf16>
    %c0_11 = arith.constant 0 : index
    %c0_12 = arith.constant 0 : index
    %28 = vector.load %arg5[%c0_11, %c0_12] : memref<16x128xbf16, #tpu.memory_space<vmem>>, vector<16x128xbf16>
    tpu.vector_store %arg5[%c0_11, %c0_12], %27 {strides = array<i32>} : memref<16x128xbf16, #tpu.memory_space<vmem>>, vector<16x128xbf16>,
    return
  }
  func.func @transform_0(%arg0: i32) -> (i32, i32) {
    %c0_i32 = arith.constant 0 : i32
    %c0_i32_0 = arith.constant 0 : i32
    return %arg0, %c0_i32 : i32, i32
  }
  func.func @transform_1(%arg0: i32) -> (i32, i32) {
    %c0_i32 = arith.constant 0 : i32
    %c0_i32_0 = arith.constant 0 : i32
    return %arg0, %c0_i32 : i32, i32
  }
  func.func @transform_2(%arg0: i32) -> (i32, i32) {
    %c0_i32 = arith.constant 0 : i32
    %c0_i32_0 = arith.constant 0 : i32
    %c0_i32_1 = arith.constant 0 : i32
    return %c0_i32, %c0_i32_0 : i32, i32
  }
  func.func @transform_3(%arg0: i32) -> (i32, i32) {
    %c0_i32 = arith.constant 0 : i32
    %c0_i32_0 = arith.constant 0 : i32
    %c0_i32_1 = arith.constant 0 : i32
    return %c0_i32, %c0_i32_0 : i32, i32
  }
  func.func @transform_4(%arg0: i32) -> (i32, i32) {
    %c0_i32 = arith.constant 0 : i32
    %c0_i32_0 = arith.constant 0 : i32
    return %arg0, %c0_i32 : i32, i32
  }
}

module attributes {stable_mosaic.version = 11 : i64} {
  func.func @_matmul_kernel(%arg0: i32, %arg1: i32, %arg2: i32, %arg3: memref<16x128xbf16, #tpu.memory_space<vmem>>, %arg4: memref<128x512xbf16, #tpu.memory_space<vmem>>, %arg5: memref<1x512xf32, #tpu.memory_space<vmem>>, %arg6: memref<16x512xbf16, #tpu.memory_space<vmem>>, %arg7: memref<16x512xf32, #tpu.memory_space<vmem>>) attributes {dimension_semantics = [#tpu.dimension_semantics<parallel>, #tpu.dimension_semantics<parallel>, #tpu.dimension_semantics<arbitrary>], iteration_bounds = array<i64: 1, 1, 1>, scalar_prefetch = 0 : i64, scratch_operands = 1 : i64, tpu.core_type = #tpu.core_type<tc>, window_params = [{transform_indices = @transform_0, window_bounds = array<i64: 16, 128>}, {transform_indices = @transform_1, window_bounds = array<i64: 128, 512>}, {transform_indices = @transform_2, window_bounds = array<i64: 1, 512>}, {transform_indices = @transform_3, window_bounds = array<i64: 16, 512>}]} {
    %c0_i32 = arith.constant 0 : i32
    %0 = arith.cmpi eq, %arg2, %c0_i32 : i32
    %1 = arith.extui %0 : i1 to i32
    %c0_i32_0 = arith.constant 0 : i32
    %2 = arith.cmpi ne, %1, %c0_i32_0 : i32
    scf.if %2 {
      %cst_10 = arith.constant 0.000000e+00 : f32
      %12 = vector.broadcast %cst_10 : f32 to vector<16x512xf32>
      %c0_11 = arith.constant 0 : index
      %c0_12 = arith.constant 0 : index
      %13 = vector.load %arg7[%c0_11, %c0_12] : memref<16x512xf32, #tpu.memory_space<vmem>>, vector<16x512xf32>
      tpu.vector_store %arg7[%c0_11, %c0_12], %12 {strides = array<i32>} : memref<16x512xf32, #tpu.memory_space<vmem>>, vector<16x512xf32>,
    } else {
    }
    %c0 = arith.constant 0 : index
    %c0_1 = arith.constant 0 : index
    %3 = vector.load %arg7[%c0, %c0_1] : memref<16x512xf32, #tpu.memory_space<vmem>>, vector<16x512xf32>
    %c0_2 = arith.constant 0 : index
    %c0_3 = arith.constant 0 : index
    %4 = vector.load %arg3[%c0_2, %c0_3] : memref<16x128xbf16, #tpu.memory_space<vmem>>, vector<16x128xbf16>
    %c0_4 = arith.constant 0 : index
    %c0_5 = arith.constant 0 : index
    %5 = vector.load %arg4[%c0_4, %c0_5] : memref<128x512xbf16, #tpu.memory_space<vmem>>, vector<128x512xbf16>
    %cst = arith.constant dense<0.000000e+00> : vector<16x512xf32>
    %6 = tpu.matmul %4, %5, %cst {dimension_numbers = #tpu.dot_dimension_numbers<[1], [0], [0], [1], [0, 0, 1, 1], [], []>} : vector<16x128xbf16>, vector<128x512xbf16>, vector<16x512xf32> -> vector<16x512xf32>
    %7 = arith.addf %3, %6 : vector<16x512xf32>
    %c0_6 = arith.constant 0 : index
    %c0_7 = arith.constant 0 : index
    %8 = vector.load %arg7[%c0_6, %c0_7] : memref<16x512xf32, #tpu.memory_space<vmem>>, vector<16x512xf32>
    tpu.vector_store %arg7[%c0_6, %c0_7], %7 {strides = array<i32>} : memref<16x512xf32, #tpu.memory_space<vmem>>, vector<16x512xf32>,
    %c0_i32_8 = arith.constant 0 : i32
    %9 = arith.cmpi eq, %arg2, %c0_i32_8 : i32
    %10 = arith.extui %9 : i1 to i32
    %c0_i32_9 = arith.constant 0 : i32
    %11 = arith.cmpi ne, %10, %c0_i32_9 : i32
    scf.if %11 {
      %c0_10 = arith.constant 0 : index
      %c0_11 = arith.constant 0 : index
      %12 = vector.load %arg7[%c0_10, %c0_11] : memref<16x512xf32, #tpu.memory_space<vmem>>, vector<16x512xf32>
      %c0_12 = arith.constant 0 : index
      %c0_13 = arith.constant 0 : index
      %13 = vector.load %arg5[%c0_12, %c0_13] : memref<1x512xf32, #tpu.memory_space<vmem>>, vector<1x512xf32>
      %14 = vector.broadcast %13 : vector<1x512xf32> to vector<16x512xf32>
      %15 = arith.addf %12, %14 : vector<16x512xf32>
      %cst_14 = arith.constant 0.000000e+00 : f32
      %16 = vector.broadcast %cst_14 : f32 to vector<16x512xf32>
      %17 = arith.maximumf %15, %16 : vector<16x512xf32>
      %18 = arith.truncf %17 : vector<16x512xf32> to vector<16x512xbf16>
      %c0_15 = arith.constant 0 : index
      %c0_16 = arith.constant 0 : index
      %19 = vector.load %arg6[%c0_15, %c0_16] : memref<16x512xbf16, #tpu.memory_space<vmem>>, vector<16x512xbf16>
      tpu.vector_store %arg6[%c0_15, %c0_16], %18 {strides = array<i32>} : memref<16x512xbf16, #tpu.memory_space<vmem>>, vector<16x512xbf16>,
    } else {
    }
    return
  }
  func.func @transform_0(%arg0: i32, %arg1: i32, %arg2: i32) -> (i32, i32) {
    %c0_i32 = arith.constant 0 : i32
    return %arg0, %arg2 : i32, i32
  }
  func.func @transform_1(%arg0: i32, %arg1: i32, %arg2: i32) -> (i32, i32) {
    %c0_i32 = arith.constant 0 : i32
    return %arg2, %arg1 : i32, i32
  }
  func.func @transform_2(%arg0: i32, %arg1: i32, %arg2: i32) -> (i32, i32) {
    %c0_i32 = arith.constant 0 : i32
    %c0_i32_0 = arith.constant 0 : i32
    return %c0_i32, %arg1 : i32, i32
  }
  func.func @transform_3(%arg0: i32, %arg1: i32, %arg2: i32) -> (i32, i32) {
    %c0_i32 = arith.constant 0 : i32
    return %arg0, %arg1 : i32, i32
  }
}

module attributes {stable_mosaic.version = 11 : i64} {
  func.func @_matmul_kernel(%arg0: i32, %arg1: i32, %arg2: i32, %arg3: memref<16x512xbf16, #tpu.memory_space<vmem>>, %arg4: memref<512x128xbf16, #tpu.memory_space<vmem>>, %arg5: memref<1x128xf32, #tpu.memory_space<vmem>>, %arg6: memref<16x128xbf16, #tpu.memory_space<vmem>>, %arg7: memref<16x128xf32, #tpu.memory_space<vmem>>) attributes {dimension_semantics = [#tpu.dimension_semantics<parallel>, #tpu.dimension_semantics<parallel>, #tpu.dimension_semantics<arbitrary>], iteration_bounds = array<i64: 1, 1, 1>, scalar_prefetch = 0 : i64, scratch_operands = 1 : i64, tpu.core_type = #tpu.core_type<tc>, window_params = [{transform_indices = @transform_0, window_bounds = array<i64: 16, 512>}, {transform_indices = @transform_1, window_bounds = array<i64: 512, 128>}, {transform_indices = @transform_2, window_bounds = array<i64: 1, 128>}, {transform_indices = @transform_3, window_bounds = array<i64: 16, 128>}]} {
    %c0_i32 = arith.constant 0 : i32
    %0 = arith.cmpi eq, %arg2, %c0_i32 : i32
    %1 = arith.extui %0 : i1 to i32
    %c0_i32_0 = arith.constant 0 : i32
    %2 = arith.cmpi ne, %1, %c0_i32_0 : i32
    scf.if %2 {
      %cst_10 = arith.constant 0.000000e+00 : f32
      %12 = vector.broadcast %cst_10 : f32 to vector<16x128xf32>
      %c0_11 = arith.constant 0 : index
      %c0_12 = arith.constant 0 : index
      %13 = vector.load %arg7[%c0_11, %c0_12] : memref<16x128xf32, #tpu.memory_space<vmem>>, vector<16x128xf32>
      tpu.vector_store %arg7[%c0_11, %c0_12], %12 {strides = array<i32>} : memref<16x128xf32, #tpu.memory_space<vmem>>, vector<16x128xf32>,
    } else {
    }
    %c0 = arith.constant 0 : index
    %c0_1 = arith.constant 0 : index
    %3 = vector.load %arg7[%c0, %c0_1] : memref<16x128xf32, #tpu.memory_space<vmem>>, vector<16x128xf32>
    %c0_2 = arith.constant 0 : index
    %c0_3 = arith.constant 0 : index
    %4 = vector.load %arg3[%c0_2, %c0_3] : memref<16x512xbf16, #tpu.memory_space<vmem>>, vector<16x512xbf16>
    %c0_4 = arith.constant 0 : index
    %c0_5 = arith.constant 0 : index
    %5 = vector.load %arg4[%c0_4, %c0_5] : memref<512x128xbf16, #tpu.memory_space<vmem>>, vector<512x128xbf16>
    %cst = arith.constant dense<0.000000e+00> : vector<16x128xf32>
    %6 = tpu.matmul %4, %5, %cst {dimension_numbers = #tpu.dot_dimension_numbers<[1], [0], [0], [1], [0, 0, 1, 1], [], []>} : vector<16x512xbf16>, vector<512x128xbf16>, vector<16x128xf32> -> vector<16x128xf32>
    %7 = arith.addf %3, %6 : vector<16x128xf32>
    %c0_6 = arith.constant 0 : index
    %c0_7 = arith.constant 0 : index
    %8 = vector.load %arg7[%c0_6, %c0_7] : memref<16x128xf32, #tpu.memory_space<vmem>>, vector<16x128xf32>
    tpu.vector_store %arg7[%c0_6, %c0_7], %7 {strides = array<i32>} : memref<16x128xf32, #tpu.memory_space<vmem>>, vector<16x128xf32>,
    %c0_i32_8 = arith.constant 0 : i32
    %9 = arith.cmpi eq, %arg2, %c0_i32_8 : i32
    %10 = arith.extui %9 : i1 to i32
    %c0_i32_9 = arith.constant 0 : i32
    %11 = arith.cmpi ne, %10, %c0_i32_9 : i32
    scf.if %11 {
      %c0_10 = arith.constant 0 : index
      %c0_11 = arith.constant 0 : index
      %12 = vector.load %arg7[%c0_10, %c0_11] : memref<16x128xf32, #tpu.memory_space<vmem>>, vector<16x128xf32>
      %c0_12 = arith.constant 0 : index
      %c0_13 = arith.constant 0 : index
      %13 = vector.load %arg5[%c0_12, %c0_13] : memref<1x128xf32, #tpu.memory_space<vmem>>, vector<1x128xf32>
      %14 = vector.broadcast %13 : vector<1x128xf32> to vector<16x128xf32>
      %15 = arith.addf %12, %14 : vector<16x128xf32>
      %16 = arith.truncf %15 : vector<16x128xf32> to vector<16x128xbf16>
      %c0_14 = arith.constant 0 : index
      %c0_15 = arith.constant 0 : index
      %17 = vector.load %arg6[%c0_14, %c0_15] : memref<16x128xbf16, #tpu.memory_space<vmem>>, vector<16x128xbf16>
      tpu.vector_store %arg6[%c0_14, %c0_15], %16 {strides = array<i32>} : memref<16x128xbf16, #tpu.memory_space<vmem>>, vector<16x128xbf16>,
    } else {
    }
    return
  }
  func.func @transform_0(%arg0: i32, %arg1: i32, %arg2: i32) -> (i32, i32) {
    %c0_i32 = arith.constant 0 : i32
    return %arg0, %arg2 : i32, i32
  }
  func.func @transform_1(%arg0: i32, %arg1: i32, %arg2: i32) -> (i32, i32) {
    %c0_i32 = arith.constant 0 : i32
    return %arg2, %arg1 : i32, i32
  }
  func.func @transform_2(%arg0: i32, %arg1: i32, %arg2: i32) -> (i32, i32) {
    %c0_i32 = arith.constant 0 : i32
    %c0_i32_0 = arith.constant 0 : i32
    return %c0_i32, %arg1 : i32, i32
  }
  func.func @transform_3(%arg0: i32, %arg1: i32, %arg2: i32) -> (i32, i32) {
    %c0_i32 = arith.constant 0 : i32
    return %arg0, %arg1 : i32, i32
  }
}

module attributes {stable_mosaic.version = 11 : i64} {
  func.func @_layernorm_kernel(%arg0: i32, %arg1: memref<16x128xbf16, #tpu.memory_space<vmem>>, %arg2: memref<1x128xf32, #tpu.memory_space<vmem>>, %arg3: memref<1x128xf32, #tpu.memory_space<vmem>>, %arg4: memref<16x128xbf16, #tpu.memory_space<vmem>>) attributes {dimension_semantics = [#tpu.dimension_semantics<parallel>], iteration_bounds = array<i64: 1>, scalar_prefetch = 0 : i64, scratch_operands = 0 : i64, tpu.core_type = #tpu.core_type<tc>, window_params = [{transform_indices = @transform_0, window_bounds = array<i64: 16, 128>}, {pipeline_mode = #tpu.pipeline_mode<synchronous>, transform_indices = @transform_1, window_bounds = array<i64: 1, 128>}, {pipeline_mode = #tpu.pipeline_mode<synchronous>, transform_indices = @transform_2, window_bounds = array<i64: 1, 128>}, {transform_indices = @transform_3, window_bounds = array<i64: 16, 128>}]} {
    %c0 = arith.constant 0 : index
    %c0_0 = arith.constant 0 : index
    %0 = vector.load %arg1[%c0, %c0_0] : memref<16x128xbf16, #tpu.memory_space<vmem>>, vector<16x128xbf16>
    %1 = arith.extf %0 : vector<16x128xbf16> to vector<16x128xf32>
    %cst = arith.constant dense<0.000000e+00> : vector<16xf32>
    %2 = vector.multi_reduction <add>, %1, %cst [1] : vector<16x128xf32> to vector<16xf32>
    %3 = vector.shape_cast %2 : vector<16xf32> to vector<16x1xf32>
    %cst_1 = arith.constant 1.280000e+02 : f32
    %4 = vector.broadcast %cst_1 : f32 to vector<16x1xf32>
    %5 = arith.divf %3, %4 : vector<16x1xf32>
    %6 = vector.broadcast %5 : vector<16x1xf32> to vector<16x128xf32>
    %7 = arith.subf %1, %6 : vector<16x128xf32>
    %8 = arith.mulf %7, %7 : vector<16x128xf32>
    %cst_2 = arith.constant dense<0.000000e+00> : vector<16xf32>
    %9 = vector.multi_reduction <add>, %8, %cst_2 [1] : vector<16x128xf32> to vector<16xf32>
    %10 = vector.shape_cast %9 : vector<16xf32> to vector<16x1xf32>
    %cst_3 = arith.constant 1.280000e+02 : f32
    %11 = vector.broadcast %cst_3 : f32 to vector<16x1xf32>
    %12 = arith.divf %10, %11 : vector<16x1xf32>
    %cst_4 = arith.constant 9.99999974E-6 : f32
    %13 = vector.broadcast %cst_4 : f32 to vector<16x1xf32>
    %14 = arith.addf %12, %13 : vector<16x1xf32>
    %15 = math.rsqrt %14 : vector<16x1xf32>
    %16 = vector.broadcast %15 : vector<16x1xf32> to vector<16x128xf32>
    %17 = arith.mulf %7, %16 : vector<16x128xf32>
    %c0_5 = arith.constant 0 : index
    %c0_6 = arith.constant 0 : index
    %18 = vector.load %arg2[%c0_5, %c0_6] : memref<1x128xf32, #tpu.memory_space<vmem>>, vector<1x128xf32>
    %19 = vector.broadcast %18 : vector<1x128xf32> to vector<16x128xf32>
    %20 = arith.mulf %17, %19 : vector<16x128xf32>
    %c0_7 = arith.constant 0 : index
    %c0_8 = arith.constant 0 : index
    %21 = vector.load %arg3[%c0_7, %c0_8] : memref<1x128xf32, #tpu.memory_space<vmem>>, vector<1x128xf32>
    %22 = vector.broadcast %21 : vector<1x128xf32> to vector<16x128xf32>
    %23 = arith.addf %20, %22 : vector<16x128xf32>
    %24 = arith.truncf %23 : vector<16x128xf32> to vector<16x128xbf16>
    %c0_9 = arith.constant 0 : index
    %c0_10 = arith.constant 0 : index
    %25 = vector.load %arg4[%c0_9, %c0_10] : memref<16x128xbf16, #tpu.memory_space<vmem>>, vector<16x128xbf16>
    tpu.vector_store %arg4[%c0_9, %c0_10], %24 {strides = array<i32>} : memref<16x128xbf16, #tpu.memory_space<vmem>>, vector<16x128xbf16>,
    return
  }
  func.func @transform_0(%arg0: i32) -> (i32, i32) {
    %c0_i32 = arith.constant 0 : i32
    %c0_i32_0 = arith.constant 0 : i32
    return %arg0, %c0_i32 : i32, i32
  }
  func.func @transform_1(%arg0: i32) -> (i32, i32) {
    %c0_i32 = arith.constant 0 : i32
    %c0_i32_0 = arith.constant 0 : i32
    %c0_i32_1 = arith.constant 0 : i32
    return %c0_i32, %c0_i32_0 : i32, i32
  }
  func.func @transform_2(%arg0: i32) -> (i32, i32) {
    %c0_i32 = arith.constant 0 : i32
    %c0_i32_0 = arith.constant 0 : i32
    %c0_i32_1 = arith.constant 0 : i32
    return %c0_i32, %c0_i32_0 : i32, i32
  }
  func.func @transform_3(%arg0: i32) -> (i32, i32) {
    %c0_i32 = arith.constant 0 : i32
    %c0_i32_0 = arith.constant 0 : i32
    return %arg0, %c0_i32 : i32, i32
  }
}

module attributes {stable_mosaic.version = 11 : i64} {
  func.func @_matmul_kernel(%arg0: i32, %arg1: i32, %arg2: i32, %arg3: memref<16x128xbf16, #tpu.memory_space<vmem>>, %arg4: memref<128x256xbf16, #tpu.memory_space<vmem>>, %arg5: memref<1x256xf32, #tpu.memory_space<vmem>>, %arg6: memref<16x256xbf16, #tpu.memory_space<vmem>>, %arg7: memref<16x256xf32, #tpu.memory_space<vmem>>) attributes {dimension_semantics = [#tpu.dimension_semantics<parallel>, #tpu.dimension_semantics<parallel>, #tpu.dimension_semantics<arbitrary>], iteration_bounds = array<i64: 1, 1, 1>, scalar_prefetch = 0 : i64, scratch_operands = 1 : i64, tpu.core_type = #tpu.core_type<tc>, window_params = [{transform_indices = @transform_0, window_bounds = array<i64: 16, 128>}, {transform_indices = @transform_1, window_bounds = array<i64: 128, 256>}, {transform_indices = @transform_2, window_bounds = array<i64: 1, 256>}, {transform_indices = @transform_3, window_bounds = array<i64: 16, 256>}]} {
    %c0_i32 = arith.constant 0 : i32
    %0 = arith.cmpi eq, %arg2, %c0_i32 : i32
    %1 = arith.extui %0 : i1 to i32
    %c0_i32_0 = arith.constant 0 : i32
    %2 = arith.cmpi ne, %1, %c0_i32_0 : i32
    scf.if %2 {
      %cst_10 = arith.constant 0.000000e+00 : f32
      %12 = vector.broadcast %cst_10 : f32 to vector<16x256xf32>
      %c0_11 = arith.constant 0 : index
      %c0_12 = arith.constant 0 : index
      %13 = vector.load %arg7[%c0_11, %c0_12] : memref<16x256xf32, #tpu.memory_space<vmem>>, vector<16x256xf32>
      tpu.vector_store %arg7[%c0_11, %c0_12], %12 {strides = array<i32>} : memref<16x256xf32, #tpu.memory_space<vmem>>, vector<16x256xf32>,
    } else {
    }
    %c0 = arith.constant 0 : index
    %c0_1 = arith.constant 0 : index
    %3 = vector.load %arg7[%c0, %c0_1] : memref<16x256xf32, #tpu.memory_space<vmem>>, vector<16x256xf32>
    %c0_2 = arith.constant 0 : index
    %c0_3 = arith.constant 0 : index
    %4 = vector.load %arg3[%c0_2, %c0_3] : memref<16x128xbf16, #tpu.memory_space<vmem>>, vector<16x128xbf16>
    %c0_4 = arith.constant 0 : index
    %c0_5 = arith.constant 0 : index
    %5 = vector.load %arg4[%c0_4, %c0_5] : memref<128x256xbf16, #tpu.memory_space<vmem>>, vector<128x256xbf16>
    %cst = arith.constant dense<0.000000e+00> : vector<16x256xf32>
    %6 = tpu.matmul %4, %5, %cst {dimension_numbers = #tpu.dot_dimension_numbers<[1], [0], [0], [1], [0, 0, 1, 1], [], []>} : vector<16x128xbf16>, vector<128x256xbf16>, vector<16x256xf32> -> vector<16x256xf32>
    %7 = arith.addf %3, %6 : vector<16x256xf32>
    %c0_6 = arith.constant 0 : index
    %c0_7 = arith.constant 0 : index
    %8 = vector.load %arg7[%c0_6, %c0_7] : memref<16x256xf32, #tpu.memory_space<vmem>>, vector<16x256xf32>
    tpu.vector_store %arg7[%c0_6, %c0_7], %7 {strides = array<i32>} : memref<16x256xf32, #tpu.memory_space<vmem>>, vector<16x256xf32>,
    %c0_i32_8 = arith.constant 0 : i32
    %9 = arith.cmpi eq, %arg2, %c0_i32_8 : i32
    %10 = arith.extui %9 : i1 to i32
    %c0_i32_9 = arith.constant 0 : i32
    %11 = arith.cmpi ne, %10, %c0_i32_9 : i32
    scf.if %11 {
      %c0_10 = arith.constant 0 : index
      %c0_11 = arith.constant 0 : index
      %12 = vector.load %arg7[%c0_10, %c0_11] : memref<16x256xf32, #tpu.memory_space<vmem>>, vector<16x256xf32>
      %c0_12 = arith.constant 0 : index
      %c0_13 = arith.constant 0 : index
      %13 = vector.load %arg5[%c0_12, %c0_13] : memref<1x256xf32, #tpu.memory_space<vmem>>, vector<1x256xf32>
      %14 = vector.broadcast %13 : vector<1x256xf32> to vector<16x256xf32>
      %15 = arith.addf %12, %14 : vector<16x256xf32>
      %16 = arith.truncf %15 : vector<16x256xf32> to vector<16x256xbf16>
      %c0_14 = arith.constant 0 : index
      %c0_15 = arith.constant 0 : index
      %17 = vector.load %arg6[%c0_14, %c0_15] : memref<16x256xbf16, #tpu.memory_space<vmem>>, vector<16x256xbf16>
      tpu.vector_store %arg6[%c0_14, %c0_15], %16 {strides = array<i32>} : memref<16x256xbf16, #tpu.memory_space<vmem>>, vector<16x256xbf16>,
    } else {
    }
    return
  }
  func.func @transform_0(%arg0: i32, %arg1: i32, %arg2: i32) -> (i32, i32) {
    %c0_i32 = arith.constant 0 : i32
    return %arg0, %arg2 : i32, i32
  }
  func.func @transform_1(%arg0: i32, %arg1: i32, %arg2: i32) -> (i32, i32) {
    %c0_i32 = arith.constant 0 : i32
    return %arg2, %arg1 : i32, i32
  }
  func.func @transform_2(%arg0: i32, %arg1: i32, %arg2: i32) -> (i32, i32) {
    %c0_i32 = arith.constant 0 : i32
    %c0_i32_0 = arith.constant 0 : i32
    return %c0_i32, %arg1 : i32, i32
  }
  func.func @transform_3(%arg0: i32, %arg1: i32, %arg2: i32) -> (i32, i32) {
    %c0_i32 = arith.constant 0 : i32
    return %arg0, %arg1 : i32, i32
  }
}

module attributes {stable_mosaic.version = 11 : i64} {
  func.func @_cross_attention_kernel(%arg0: i32, %arg1: memref<1x8x128xbf16, #tpu.memory_space<vmem>>, %arg2: memref<1x8x256xbf16, #tpu.memory_space<vmem>>, %arg3: memref<1x8x128xbf16, #tpu.memory_space<vmem>>, %arg4: memref<8x128xf32, #tpu.memory_space<vmem>>) attributes {dimension_semantics = [#tpu.dimension_semantics<parallel>], iteration_bounds = array<i64: 2>, scalar_prefetch = 0 : i64, scratch_operands = 1 : i64, tpu.core_type = #tpu.core_type<tc>, window_params = [{transform_indices = @transform_0, window_bounds = array<i64: 1, 8, 128>}, {transform_indices = @transform_1, window_bounds = array<i64: 1, 8, 256>}, {transform_indices = @transform_2, window_bounds = array<i64: 1, 8, 128>}]} {
    %c0 = arith.constant 0 : index
    %c0_0 = arith.constant 0 : index
    %c0_1 = arith.constant 0 : index
    %0 = vector.load %arg1[%c0, %c0_0, %c0_1] : memref<1x8x128xbf16, #tpu.memory_space<vmem>>, vector<1x8x128xbf16>
    %1 = vector.shape_cast %0 : vector<1x8x128xbf16> to vector<8x128xbf16>
    %c0_2 = arith.constant 0 : index
    %c0_3 = arith.constant 0 : index
    %c0_4 = arith.constant 0 : index
    %2 = vector.load %arg2[%c0_2, %c0_3, %c0_4] : memref<1x8x256xbf16, #tpu.memory_space<vmem>>, vector<1x8x256xbf16>
    %3 = vector.shape_cast %2 : vector<1x8x256xbf16> to vector<8x256xbf16>
    %4 = arith.extf %1 : vector<8x128xbf16> to vector<8x128xf32>
    %cst = arith.constant 0.176776692 : f32
    %5 = vector.broadcast %cst : f32 to vector<8x128xf32>
    %6 = arith.mulf %4, %5 : vector<8x128xf32>
    %7 = arith.truncf %6 : vector<8x128xf32> to vector<8x128xbf16>
    %8 = vector.extract_strided_slice %3 {offsets = [0, 0], sizes = [8, 128], strides = [1, 1]} : vector<8x256xbf16> to vector<8x128xbf16>
    %9 = vector.extract_strided_slice %3 {offsets = [0, 128], sizes = [8, 128], strides = [1, 1]} : vector<8x256xbf16> to vector<8x128xbf16>
    %10 = vector.extract_strided_slice %7 {offsets = [0, 0], sizes = [8, 32], strides = [1, 1]} : vector<8x128xbf16> to vector<8x32xbf16>
    %11 = vector.extract_strided_slice %8 {offsets = [0, 0], sizes = [8, 32], strides = [1, 1]} : vector<8x128xbf16> to vector<8x32xbf16>
    %cst_5 = arith.constant dense<0.000000e+00> : vector<8x8xf32>
    %12 = tpu.matmul %10, %11, %cst_5 {dimension_numbers = #tpu.dot_dimension_numbers<[1], [1], [0], [0], [0, 0, 1, 0], [], []>} : vector<8x32xbf16>, vector<8x32xbf16>, vector<8x8xf32> -> vector<8x8xf32>
    %cst_6 = arith.constant dense<0xFF800000> : vector<8xf32>
    %13 = vector.multi_reduction <maximumf>, %12, %cst_6 [1] : vector<8x8xf32> to vector<8xf32>
    %14 = vector.shape_cast %13 : vector<8xf32> to vector<8x1xf32>
    %15 = vector.broadcast %14 : vector<8x1xf32> to vector<8x8xf32>
    %16 = arith.subf %12, %15 : vector<8x8xf32>
    %17 = math.exp %16 : vector<8x8xf32>
    %cst_7 = arith.constant dense<0.000000e+00> : vector<8xf32>
    %18 = vector.multi_reduction <add>, %17, %cst_7 [1] : vector<8x8xf32> to vector<8xf32>
    %19 = vector.shape_cast %18 : vector<8xf32> to vector<8x1xf32>
    %20 = tpu.reciprocal %19 {approx = true} : vector<8x1xf32> -> vector<8x1xf32>
    %21 = vector.broadcast %20 : vector<8x1xf32> to vector<8x8xf32>
    %22 = arith.mulf %17, %21 : vector<8x8xf32>
    %23 = arith.truncf %22 : vector<8x8xf32> to vector<8x8xbf16>
    %24 = vector.extract_strided_slice %9 {offsets = [0, 0], sizes = [8, 32], strides = [1, 1]} : vector<8x128xbf16> to vector<8x32xbf16>
    %cst_8 = arith.constant dense<0.000000e+00> : vector<8x32xf32>
    %25 = tpu.matmul %23, %24, %cst_8 {dimension_numbers = #tpu.dot_dimension_numbers<[1], [0], [0], [1], [0, 0, 1, 1], [], []>} : vector<8x8xbf16>, vector<8x32xbf16>, vector<8x32xf32> -> vector<8x32xf32>
    %c0_9 = arith.constant 0 : index
    %c0_10 = arith.constant 0 : index
    %26 = vector.load %arg4[%c0_9, %c0_10] : memref<8x128xf32, #tpu.memory_space<vmem>>, vector<8x32xf32>
    tpu.vector_store %arg4[%c0_9, %c0_10], %25 {strides = array<i32>} : memref<8x128xf32, #tpu.memory_space<vmem>>, vector<8x32xf32>,
    %27 = vector.extract_strided_slice %7 {offsets = [0, 32], sizes = [8, 32], strides = [1, 1]} : vector<8x128xbf16> to vector<8x32xbf16>
    %28 = vector.extract_strided_slice %8 {offsets = [0, 32], sizes = [8, 32], strides = [1, 1]} : vector<8x128xbf16> to vector<8x32xbf16>
    %cst_11 = arith.constant dense<0.000000e+00> : vector<8x8xf32>
    %29 = tpu.matmul %27, %28, %cst_11 {dimension_numbers = #tpu.dot_dimension_numbers<[1], [1], [0], [0], [0, 0, 1, 0], [], []>} : vector<8x32xbf16>, vector<8x32xbf16>, vector<8x8xf32> -> vector<8x8xf32>
    %cst_12 = arith.constant dense<0xFF800000> : vector<8xf32>
    %30 = vector.multi_reduction <maximumf>, %29, %cst_12 [1] : vector<8x8xf32> to vector<8xf32>
    %31 = vector.shape_cast %30 : vector<8xf32> to vector<8x1xf32>
    %32 = vector.broadcast %31 : vector<8x1xf32> to vector<8x8xf32>
    %33 = arith.subf %29, %32 : vector<8x8xf32>
    %34 = math.exp %33 : vector<8x8xf32>
    %cst_13 = arith.constant dense<0.000000e+00> : vector<8xf32>
    %35 = vector.multi_reduction <add>, %34, %cst_13 [1] : vector<8x8xf32> to vector<8xf32>
    %36 = vector.shape_cast %35 : vector<8xf32> to vector<8x1xf32>
    %37 = tpu.reciprocal %36 {approx = true} : vector<8x1xf32> -> vector<8x1xf32>
    %38 = vector.broadcast %37 : vector<8x1xf32> to vector<8x8xf32>
    %39 = arith.mulf %34, %38 : vector<8x8xf32>
    %40 = arith.truncf %39 : vector<8x8xf32> to vector<8x8xbf16>
    %41 = vector.extract_strided_slice %9 {offsets = [0, 32], sizes = [8, 32], strides = [1, 1]} : vector<8x128xbf16> to vector<8x32xbf16>
    %cst_14 = arith.constant dense<0.000000e+00> : vector<8x32xf32>
    %42 = tpu.matmul %40, %41, %cst_14 {dimension_numbers = #tpu.dot_dimension_numbers<[1], [0], [0], [1], [0, 0, 1, 1], [], []>} : vector<8x8xbf16>, vector<8x32xbf16>, vector<8x32xf32> -> vector<8x32xf32>
    %c0_15 = arith.constant 0 : index
    %c32 = arith.constant 32 : index
    %43 = vector.load %arg4[%c0_15, %c32] : memref<8x128xf32, #tpu.memory_space<vmem>>, vector<8x32xf32>
    tpu.vector_store %arg4[%c0_15, %c32], %42 {strides = array<i32>} : memref<8x128xf32, #tpu.memory_space<vmem>>, vector<8x32xf32>,
    %44 = vector.extract_strided_slice %7 {offsets = [0, 64], sizes = [8, 32], strides = [1, 1]} : vector<8x128xbf16> to vector<8x32xbf16>
    %45 = vector.extract_strided_slice %8 {offsets = [0, 64], sizes = [8, 32], strides = [1, 1]} : vector<8x128xbf16> to vector<8x32xbf16>
    %cst_16 = arith.constant dense<0.000000e+00> : vector<8x8xf32>
    %46 = tpu.matmul %44, %45, %cst_16 {dimension_numbers = #tpu.dot_dimension_numbers<[1], [1], [0], [0], [0, 0, 1, 0], [], []>} : vector<8x32xbf16>, vector<8x32xbf16>, vector<8x8xf32> -> vector<8x8xf32>
    %cst_17 = arith.constant dense<0xFF800000> : vector<8xf32>
    %47 = vector.multi_reduction <maximumf>, %46, %cst_17 [1] : vector<8x8xf32> to vector<8xf32>
    %48 = vector.shape_cast %47 : vector<8xf32> to vector<8x1xf32>
    %49 = vector.broadcast %48 : vector<8x1xf32> to vector<8x8xf32>
    %50 = arith.subf %46, %49 : vector<8x8xf32>
    %51 = math.exp %50 : vector<8x8xf32>
    %cst_18 = arith.constant dense<0.000000e+00> : vector<8xf32>
    %52 = vector.multi_reduction <add>, %51, %cst_18 [1] : vector<8x8xf32> to vector<8xf32>
    %53 = vector.shape_cast %52 : vector<8xf32> to vector<8x1xf32>
    %54 = tpu.reciprocal %53 {approx = true} : vector<8x1xf32> -> vector<8x1xf32>
    %55 = vector.broadcast %54 : vector<8x1xf32> to vector<8x8xf32>
    %56 = arith.mulf %51, %55 : vector<8x8xf32>
    %57 = arith.truncf %56 : vector<8x8xf32> to vector<8x8xbf16>
    %58 = vector.extract_strided_slice %9 {offsets = [0, 64], sizes = [8, 32], strides = [1, 1]} : vector<8x128xbf16> to vector<8x32xbf16>
    %cst_19 = arith.constant dense<0.000000e+00> : vector<8x32xf32>
    %59 = tpu.matmul %57, %58, %cst_19 {dimension_numbers = #tpu.dot_dimension_numbers<[1], [0], [0], [1], [0, 0, 1, 1], [], []>} : vector<8x8xbf16>, vector<8x32xbf16>, vector<8x32xf32> -> vector<8x32xf32>
    %c0_20 = arith.constant 0 : index
    %c64 = arith.constant 64 : index
    %60 = vector.load %arg4[%c0_20, %c64] : memref<8x128xf32, #tpu.memory_space<vmem>>, vector<8x32xf32>
    tpu.vector_store %arg4[%c0_20, %c64], %59 {strides = array<i32>} : memref<8x128xf32, #tpu.memory_space<vmem>>, vector<8x32xf32>,
    %61 = vector.extract_strided_slice %7 {offsets = [0, 96], sizes = [8, 32], strides = [1, 1]} : vector<8x128xbf16> to vector<8x32xbf16>
    %62 = vector.extract_strided_slice %8 {offsets = [0, 96], sizes = [8, 32], strides = [1, 1]} : vector<8x128xbf16> to vector<8x32xbf16>
    %cst_21 = arith.constant dense<0.000000e+00> : vector<8x8xf32>
    %63 = tpu.matmul %61, %62, %cst_21 {dimension_numbers = #tpu.dot_dimension_numbers<[1], [1], [0], [0], [0, 0, 1, 0], [], []>} : vector<8x32xbf16>, vector<8x32xbf16>, vector<8x8xf32> -> vector<8x8xf32>
    %cst_22 = arith.constant dense<0xFF800000> : vector<8xf32>
    %64 = vector.multi_reduction <maximumf>, %63, %cst_22 [1] : vector<8x8xf32> to vector<8xf32>
    %65 = vector.shape_cast %64 : vector<8xf32> to vector<8x1xf32>
    %66 = vector.broadcast %65 : vector<8x1xf32> to vector<8x8xf32>
    %67 = arith.subf %63, %66 : vector<8x8xf32>
    %68 = math.exp %67 : vector<8x8xf32>
    %cst_23 = arith.constant dense<0.000000e+00> : vector<8xf32>
    %69 = vector.multi_reduction <add>, %68, %cst_23 [1] : vector<8x8xf32> to vector<8xf32>
    %70 = vector.shape_cast %69 : vector<8xf32> to vector<8x1xf32>
    %71 = tpu.reciprocal %70 {approx = true} : vector<8x1xf32> -> vector<8x1xf32>
    %72 = vector.broadcast %71 : vector<8x1xf32> to vector<8x8xf32>
    %73 = arith.mulf %68, %72 : vector<8x8xf32>
    %74 = arith.truncf %73 : vector<8x8xf32> to vector<8x8xbf16>
    %75 = vector.extract_strided_slice %9 {offsets = [0, 96], sizes = [8, 32], strides = [1, 1]} : vector<8x128xbf16> to vector<8x32xbf16>
    %cst_24 = arith.constant dense<0.000000e+00> : vector<8x32xf32>
    %76 = tpu.matmul %74, %75, %cst_24 {dimension_numbers = #tpu.dot_dimension_numbers<[1], [0], [0], [1], [0, 0, 1, 1], [], []>} : vector<8x8xbf16>, vector<8x32xbf16>, vector<8x32xf32> -> vector<8x32xf32>
    %c0_25 = arith.constant 0 : index
    %c96 = arith.constant 96 : index
    %77 = vector.load %arg4[%c0_25, %c96] : memref<8x128xf32, #tpu.memory_space<vmem>>, vector<8x32xf32>
    tpu.vector_store %arg4[%c0_25, %c96], %76 {strides = array<i32>} : memref<8x128xf32, #tpu.memory_space<vmem>>, vector<8x32xf32>,
    %c0_26 = arith.constant 0 : index
    %c0_27 = arith.constant 0 : index
    %78 = vector.load %arg4[%c0_26, %c0_27] : memref<8x128xf32, #tpu.memory_space<vmem>>, vector<8x128xf32>
    %79 = arith.truncf %78 : vector<8x128xf32> to vector<8x128xbf16>
    %c0_28 = arith.constant 0 : index
    %c0_29 = arith.constant 0 : index
    %c0_30 = arith.constant 0 : index
    %80 = vector.load %arg3[%c0_28, %c0_29, %c0_30] : memref<1x8x128xbf16, #tpu.memory_space<vmem>>, vector<1x8x128xbf16>
    %81 = vector.shape_cast %80 : vector<1x8x128xbf16> to vector<8x128xbf16>
    %82 = vector.shape_cast %79 : vector<8x128xbf16> to vector<1x8x128xbf16>
    tpu.vector_store %arg3[%c0_28, %c0_29, %c0_30], %82 {strides = array<i32>} : memref<1x8x128xbf16, #tpu.memory_space<vmem>>, vector<1x8x128xbf16>,
    return
  }
  func.func @transform_0(%arg0: i32) -> (i32, i32, i32) {
    %c0_i32 = arith.constant 0 : i32
    %c0_i32_0 = arith.constant 0 : i32
    %c0_i32_1 = arith.constant 0 : i32
    return %arg0, %c0_i32, %c0_i32_0 : i32, i32, i32
  }
  func.func @transform_1(%arg0: i32) -> (i32, i32, i32) {
    %c0_i32 = arith.constant 0 : i32
    %c0_i32_0 = arith.constant 0 : i32
    %c0_i32_1 = arith.constant 0 : i32
    return %arg0, %c0_i32, %c0_i32_0 : i32, i32, i32
  }
  func.func @transform_2(%arg0: i32) -> (i32, i32, i32) {
    %c0_i32 = arith.constant 0 : i32
    %c0_i32_0 = arith.constant 0 : i32
    %c0_i32_1 = arith.constant 0 : i32
    return %arg0, %c0_i32, %c0_i32_0 : i32, i32, i32
  }
}

module attributes {stable_mosaic.version = 11 : i64} {
  func.func @_matmul_kernel(%arg0: i32, %arg1: i32, %arg2: i32, %arg3: memref<16x128xbf16, #tpu.memory_space<vmem>>, %arg4: memref<128x512xbf16, #tpu.memory_space<vmem>>, %arg5: memref<1x512xf32, #tpu.memory_space<vmem>>, %arg6: memref<16x512xf32, #tpu.memory_space<vmem>>, %arg7: memref<16x512xf32, #tpu.memory_space<vmem>>) attributes {dimension_semantics = [#tpu.dimension_semantics<parallel>, #tpu.dimension_semantics<parallel>, #tpu.dimension_semantics<arbitrary>], iteration_bounds = array<i64: 1, 2, 1>, scalar_prefetch = 0 : i64, scratch_operands = 1 : i64, tpu.core_type = #tpu.core_type<tc>, window_params = [{transform_indices = @transform_0, window_bounds = array<i64: 16, 128>}, {transform_indices = @transform_1, window_bounds = array<i64: 128, 512>}, {transform_indices = @transform_2, window_bounds = array<i64: 1, 512>}, {transform_indices = @transform_3, window_bounds = array<i64: 16, 512>}]} {
    %c0_i32 = arith.constant 0 : i32
    %0 = arith.cmpi eq, %arg2, %c0_i32 : i32
    %1 = arith.extui %0 : i1 to i32
    %c0_i32_0 = arith.constant 0 : i32
    %2 = arith.cmpi ne, %1, %c0_i32_0 : i32
    scf.if %2 {
      %cst_10 = arith.constant 0.000000e+00 : f32
      %12 = vector.broadcast %cst_10 : f32 to vector<16x512xf32>
      %c0_11 = arith.constant 0 : index
      %c0_12 = arith.constant 0 : index
      %13 = vector.load %arg7[%c0_11, %c0_12] : memref<16x512xf32, #tpu.memory_space<vmem>>, vector<16x512xf32>
      tpu.vector_store %arg7[%c0_11, %c0_12], %12 {strides = array<i32>} : memref<16x512xf32, #tpu.memory_space<vmem>>, vector<16x512xf32>,
    } else {
    }
    %c0 = arith.constant 0 : index
    %c0_1 = arith.constant 0 : index
    %3 = vector.load %arg7[%c0, %c0_1] : memref<16x512xf32, #tpu.memory_space<vmem>>, vector<16x512xf32>
    %c0_2 = arith.constant 0 : index
    %c0_3 = arith.constant 0 : index
    %4 = vector.load %arg3[%c0_2, %c0_3] : memref<16x128xbf16, #tpu.memory_space<vmem>>, vector<16x128xbf16>
    %c0_4 = arith.constant 0 : index
    %c0_5 = arith.constant 0 : index
    %5 = vector.load %arg4[%c0_4, %c0_5] : memref<128x512xbf16, #tpu.memory_space<vmem>>, vector<128x512xbf16>
    %cst = arith.constant dense<0.000000e+00> : vector<16x512xf32>
    %6 = tpu.matmul %4, %5, %cst {dimension_numbers = #tpu.dot_dimension_numbers<[1], [0], [0], [1], [0, 0, 1, 1], [], []>} : vector<16x128xbf16>, vector<128x512xbf16>, vector<16x512xf32> -> vector<16x512xf32>
    %7 = arith.addf %3, %6 : vector<16x512xf32>
    %c0_6 = arith.constant 0 : index
    %c0_7 = arith.constant 0 : index
    %8 = vector.load %arg7[%c0_6, %c0_7] : memref<16x512xf32, #tpu.memory_space<vmem>>, vector<16x512xf32>
    tpu.vector_store %arg7[%c0_6, %c0_7], %7 {strides = array<i32>} : memref<16x512xf32, #tpu.memory_space<vmem>>, vector<16x512xf32>,
    %c0_i32_8 = arith.constant 0 : i32
    %9 = arith.cmpi eq, %arg2, %c0_i32_8 : i32
    %10 = arith.extui %9 : i1 to i32
    %c0_i32_9 = arith.constant 0 : i32
    %11 = arith.cmpi ne, %10, %c0_i32_9 : i32
    scf.if %11 {
      %c0_10 = arith.constant 0 : index
      %c0_11 = arith.constant 0 : index
      %12 = vector.load %arg7[%c0_10, %c0_11] : memref<16x512xf32, #tpu.memory_space<vmem>>, vector<16x512xf32>
      %c0_12 = arith.constant 0 : index
      %c0_13 = arith.constant 0 : index
      %13 = vector.load %arg5[%c0_12, %c0_13] : memref<1x512xf32, #tpu.memory_space<vmem>>, vector<1x512xf32>
      %14 = vector.broadcast %13 : vector<1x512xf32> to vector<16x512xf32>
      %15 = arith.addf %12, %14 : vector<16x512xf32>
      %c0_14 = arith.constant 0 : index
      %c0_15 = arith.constant 0 : index
      %16 = vector.load %arg6[%c0_14, %c0_15] : memref<16x512xf32, #tpu.memory_space<vmem>>, vector<16x512xf32>
      tpu.vector_store %arg6[%c0_14, %c0_15], %15 {strides = array<i32>} : memref<16x512xf32, #tpu.memory_space<vmem>>, vector<16x512xf32>,
    } else {
    }
    return
  }
  func.func @transform_0(%arg0: i32, %arg1: i32, %arg2: i32) -> (i32, i32) {
    %c0_i32 = arith.constant 0 : i32
    return %arg0, %arg2 : i32, i32
  }
  func.func @transform_1(%arg0: i32, %arg1: i32, %arg2: i32) -> (i32, i32) {
    %c0_i32 = arith.constant 0 : i32
    return %arg2, %arg1 : i32, i32
  }
  func.func @transform_2(%arg0: i32, %arg1: i32, %arg2: i32) -> (i32, i32) {
    %c0_i32 = arith.constant 0 : i32
    %c0_i32_0 = arith.constant 0 : i32
    return %c0_i32, %arg1 : i32, i32
  }
  func.func @transform_3(%arg0: i32, %arg1: i32, %arg2: i32) -> (i32, i32) {
    %c0_i32 = arith.constant 0 : i32
    return %arg0, %arg1 : i32, i32
  }
}

</mosaic_0001>

<bundles_post_ra>
// kernel: transformer_model_forward.44
= control target key start
LH: loop header
LB: loop body
LE: loop exit
PB: predicated region body
PF: predicated region fallthrough
CT: control target
= control target key end

     0   :  { %s145_s0 = inlined_call_operand.vmem [shape: bf16[16,128], index: 0, kind: input, shape index: {}]   ;;  %s146_s1 = inlined_call_operand.vmem [shape: bf16[16,128], index: 1, kind: input, shape index: {}]   ;;  %s147_s2 = inlined_call_operand.vmem [shape: f32[1,128], index: 2, kind: input, shape index: {}]   ;;  %s148_s3 = inlined_call_operand.vmem [shape: f32[1,128], index: 3, kind: input, shape index: {}]   ;;  %s149_s4 = inlined_call_operand.vmem [shape: bf16[16,128], index: 4, kind: output, shape index: {}]  }
   0x1   :  { %v89_v0 = vld [vmem:[%s145_s0] sm:$0xff]  }
   0x2   :  { %v93_v1 = vld [vmem:[%s146_s1] sm:$0xff]   ;;  %v90_v2 = vunpack.c.l.bf16 %v89_v0  ;;  %v91_v4 = vunpack.c.h.bf16 %v89_v0 }
   0x3   :  { %v94_v3 = vunpack.c.l.bf16 %v93_v1  ;;  %v95_v5 = vunpack.c.h.bf16 %v93_v1  ;;  %v82_v24 = vld [vmem:[%s147_s2] ss:$0 sm:$0xff] }
   0x4   :  { %v83_v28 = vld [vmem:[%s148_s3] ss:$0 sm:$0xff] }
   0x5   :  { %v25_v6 = vadd.f32 %v94_v3, %v90_v2  ;;  %v26_v7 = vadd.f32 %v95_v5, %v91_v4 }
   0x7   :  { %27 = vadd.xlane.f32.xlu0 %v25_v6 }
   0xb   :  { %29 = vadd.xlane.f32.xlu0 %v26_v7 }
  0x94   :  { %v28_v8 = vpop.xlane.xlu0 %27 }
  0x95   :  { %v32_v9 = vmul.f32 0.0078125, %v28_v8 }
  0x97   :  { %v34_v10 = vsub.f32 %v25_v6, %v32_v9 }
  0x98   :  { %v30_v11 = vpop.xlane.xlu0 %29 }
  0x99   :  { %v33_v12 = vmul.f32 0.0078125, %v30_v11  ;;  %v36_v13 = vmul.f32 %v34_v10, %v34_v10 }
  0x9b   :  { %v35_v14 = vsub.f32 %v26_v7, %v33_v12  ;;  %38 = vadd.xlane.f32.xlu1 %v36_v13 }
  0x9d   :  { %v37_v15 = vmul.f32 %v35_v14, %v35_v14 }
  0x9f   :  { %40 = vadd.xlane.f32.xlu1 %v37_v15 }
 0x128   :  { %v39_v16 = vpop.xlane.xlu1 %38 }
 0x129   :  { %v42_v17 = vmul.f32 0.0078125, %v39_v16 }
 0x12b   :  { %v44_v18 = vadd.f32 1e-05, %v42_v17 }
 0x12c   :  { %v41_v19 = vpop.xlane.xlu1 %40 }
 0x12d   :  { %101 = vrsqrt.f32 %v44_v18  ;;  %v43_v20 = vmul.f32 0.0078125, %v41_v19 }
 0x12f   :  { %v45_v21 = vadd.f32 1e-05, %v43_v20 }
 0x131   :  { %103 = vrsqrt.f32 %v45_v21 }
 0x137   :  { %v102_v22 = vpop.eup %101 }
 0x138   :  { %v48_v23 = vmul.f32 %v102_v22, %v34_v10 }
 0x13a   :  { %v57_v26 = vmul.f32 %v82_v24, %v48_v23 }
 0x13b   :  { %v104_v25 = vpop.eup %103 }
 0x13c   :  { %v49_v27 = vmul.f32 %v104_v25, %v35_v14  ;;  %v66_v30 = vadd.f32 %v83_v28, %v57_v26 }
 0x13e   :  { %v58_v29 = vmul.f32 %v82_v24, %v49_v27 }
 0x140   :  { %v67_v31 = vadd.f32 %v83_v28, %v58_v29 }
 0x142   :  { %v99_v32 = vpack.c.bf16 %v67_v31, %v66_v30 }
 0x144   :  { %100 = vst [vmem:[%s149_s4] sm:$0xff] %v99_v32  }

// kernel: transformer_model_forward.43
= control target key start
LH: loop header
LB: loop body
LE: loop exit
PB: predicated region body
PF: predicated region fallthrough
CT: control target
= control target key end

     0   :  { %v227_v0 = vmov 0.0   ;;  %vm228_vm0 = vmmov 0   ;;  %s282_s1 = inlined_call_operand.vmem [shape: bf16[128,128], index: 1, kind: input, shape index: {}]   ;;  %s283_s0 = inlined_call_operand.vmem [shape: bf16[16,128], index: 0, kind: input, shape index: {}]   ;;  %s284_s2 = inlined_call_operand.vmem [shape: f32[1,128], index: 2, kind: input, shape index: {}]   ;;  %s285_s3 = inlined_call_operand.vmem [shape: bf16[16,128], index: 3, kind: output, shape index: {}]  }
   0x1   :  { %196 = vmatprep.subr.bf16.mxu0 %v227_v0  ;;  %v218_v1 = vld [vmem:[%s282_s1] sm:$0xff]   ;;  %212 = vmatprep.mubr.msk.bf16.mxu0 %vm228_vm0, %v227_v0  ;;  %v219_v2 = vld [vmem:[%s282_s1 + $0x8] sm:$0xff]   ;;  %v220_v3 = vld [vmem:[%s282_s1 + $0x10] sm:$0xff]  }
   0x2   :  { %197 = vmatpush3.bf16.msra.mxu0 %v218_v1  ;;  %v221_v4 = vld [vmem:[%s282_s1 + $0x18] sm:$0xff]   ;;  %v222_v5 = vld [vmem:[%s282_s1 + $0x20] sm:$0xff]   ;;  %v223_v6 = vld [vmem:[%s282_s1 + $0x28] sm:$0xff]  }
   0x3   :  { %198 = vmatprep.subr.bf16.mxu0 %v227_v0  ;;  %v224_v7 = vld [vmem:[%s282_s1 + $0x30] sm:$0xff]   ;;  %v225_v8 = vld [vmem:[%s282_s1 + $0x38] sm:$0xff]   ;;  %v226_v9 = vld [vmem:[%s283_s0] sm:$0xff]  }
   0x4   :  { %v177_v11 = vld [vmem:[%s284_s2] ss:$0 sm:$0xff] }
   0x6   :  { %199 = vmatpush3.bf16.msra.mxu0 %v219_v2 }
   0x7   :  { %200 = vmatprep.subr.bf16.mxu0 %v227_v0 }
   0xa   :  { %201 = vmatpush3.bf16.msra.mxu0 %v220_v3 }
   0xb   :  { %202 = vmatprep.subr.bf16.mxu0 %v227_v0 }
   0xe   :  { %203 = vmatpush3.bf16.msra.mxu0 %v221_v4 }
   0xf   :  { %204 = vmatprep.subr.bf16.mxu0 %v227_v0 }
  0x12   :  { %205 = vmatpush3.bf16.msra.mxu0 %v222_v5 }
  0x13   :  { %206 = vmatprep.subr.bf16.mxu0 %v227_v0 }
  0x16   :  { %207 = vmatpush3.bf16.msra.mxu0 %v223_v6 }
  0x17   :  { %208 = vmatprep.subr.bf16.mxu0 %v227_v0 }
  0x1a   :  { %209 = vmatpush3.bf16.msra.mxu0 %v224_v7 }
  0x1b   :  { %210 = vmatprep.subr.bf16.mxu0 %v227_v0 }
  0x1e   :  { %211 = vmatpush3.bf16.msra.mxu0 %v225_v8 }
  0x21   :  { %213 = vmatmul.mubr.bf16.vlgmr.msra.gmra.mrb[0].mxu0 %v226_v9 }
  0xf4   :  { %v129_v10 = vpop.f32.mrb[0].mxu0 }
  0xf5   :  { %v214_v12 = vpop.f32.mrb[1].mxu0  ;;  %v152_v14 = vadd.f32 %v177_v11, %v129_v10 }
  0xf6   :  { %v132_v13 = vpop.f32.mrb[2].mxu0 }
  0xf7   :  { %v153_v15 = vadd.f32 %v177_v11, %v132_v13  ;;  %v215_v16 = vpop.f32.mrb[3].mxu0 }
  0xf9   :  { %v185_v17 = vpack.c.bf16 %v153_v15, %v152_v14 }
  0xfb   :  { %186 = vst [vmem:[%s285_s3] sm:$0xff] %v185_v17  }

// kernel: transformer_model_forward.42
= control target key start
LH: loop header
LB: loop body
LE: loop exit
PB: predicated region body
PF: predicated region fallthrough
CT: control target
= control target key end

     0   :  { %s778_s6 = smov 0   ;;  %s869_s0 = inlined_call_operand.vmem [shape: bf16[2,8,384], index: 0, kind: input, shape index: {}]   ;;  %s870_s1 = inlined_call_operand.vmem [shape: bf16[2,8,128], index: 1, kind: output, shape index: {}]  }
   0x1 LB: > { %s640_s7 = sadd.s32 4294967295, %s761_s6   ;;  %p644_p0 = scmp.ge.s32.totalorder %s761_s6, 1  ;;  %s761_s6 = sphi %s778_s6, %s11_s6  }
   0x2   : > { %p87_p1 = scmp.lt.s32.totalorder %s761_s6, 3 }
   0x4   : > { %p88_p2 = pnand %p644_p0, %p87_p1 }
   0x5   : > { %p106_p3 = scmp.lt.s32.totalorder (!%p88_p2), %s640_s7, 1  ;;  %v763_v0 = vmov (!%p88_p2), 0.0   ;;  %vm764_vm0 = vmmov (!%p88_p2), 0   ;;  %vm124_vm1 = vcmask (!%p88_p2), 261120   ;;  %vm171_vm2 = vcmask (!%p88_p2), 64512   ;;  %s765_s12 = smov (!%p88_p2), 96  }
   0x6   : > { %91 = sbr.rel (%p88_p2) target bundleno = 1483 (0x5cb), region = 24  ;;  %675 = vmatprep.subr.bf16.mxu0 (!%p88_p2), %v763_v0  ;;  %677 = vmatprep.mubr.msk.bf16.mxu0 (!%p88_p2), %vm764_vm0, %v763_v0  ;;  %s766_s13 = smov (!%p88_p2), 64   ;;  %vm187_vm3 = vcmask (!%p88_p2), 1043456   ;;  %vm350_vm4 = vcmask (!%p88_p2), 523520   ;;  %vm466_vm5 = vcmask (!%p88_p2), 785920   ;;  %vm582_vm6 = vcmask (!%p88_p2), 1048320  }
   0x7   : > { %681 = vmatprep.subr.bf16.mxu1 (!%p88_p2), %v763_v0  ;;  %683 = vmatprep.mubr.msk.bf16.mxu1 (!%p88_p2), %vm764_vm0, %v763_v0  ;;  %s767_s14 = smov (!%p88_p2), 32  }
   0xd   : > { %s872_s7 = smov (!%p106_p3, %s640_s7), 1 }
   0xe   : > { %s723_s8 = smul.u32 12, %s872_s7  ;;  %s646_s15 = sshll.u32 %s872_s7, 2 }
   0xf   : > { %s114_s18 = scalar_lea.vmem %s870_s1, %s646_s15 }
  0x10   : > { %s798_s11 = scalar_lea.vmem %s869_s0, %s723_s8 }
  0x11   : > { %v116_v1 = vld [vmem:[%s798_s11] sm:$0xff]  ;;  %v814_v17 = vld [vmem:[%s798_s11 + $0x8] sm:$0xf] }
  0x12   : > { %v647_v2 = vcombine.high %v116_v1, %v116_v1  ;;  %v118_v3 = vunpack.c.l.bf16 %v116_v1  ;;  %v189_v18 = vsel %vm187_vm3, %v814_v17, 0  ;;  %v651_v61 = vcombine.low %v814_v17, %v814_v17 }
  0x13   : > { %682 = vmatpush3.bf16.msra.mxu1 %v189_v18 }
  0x14   : > { %v129_v4 = vsel %vm124_vm1, %v647_v2, 0  ;;  %v119_v5 = vmul.f32 0.17677669, %v118_v3  ;;  %235 = vrot.lane.b32.xlu1 %v647_v2, %s765_s12  ;;  %687 = vmatprep.subr.bf16.mxu1 %v763_v0 }
  0x15   : > { %676 = vmatpush3.bf16.xpose.msra.mxu0 %v129_v4 }
  0x16   : > { %693 = vmatprep.subr.bf16.mxu0 %v763_v0  ;;  %v120_v6 = vpack.c.bf16 %v119_v5, %v119_v5 }
  0x18   : > { %233 = vrot.lane.b32.xlu1 %v120_v6, %s765_s12 }
  0x1c   : > { %678 = vmatmul.mubr.msk.bf16.vlgmr.msra.gmra.mrb[0].mxu0 %vm124_vm1, %v120_v6  ;;  %352 = vrot.lane.b32.xlu1 %v120_v6, %s766_s13 }
  0x1d   : > { %695 = vmatprep.mubr.msk.bf16.mxu0 %vm764_vm0, %v763_v0 }
  0x20   : > { %470 = vrot.lane.b32.xlu1 %v647_v2, %s767_s14 }
  0x24   : > { %468 = vrot.lane.b32.xlu1 %v120_v6, %s767_s14 }
  0x86   : > { %v236_v21 = vpop.permute.xlu1 %235 }
  0x87   : > { %v241_v23 = vsel %vm124_vm1, %v236_v21, 0 }
  0x8a   : > { %v234_v25 = vpop.permute.xlu1 %233 }
  0x8e   : > { %v353_v27 = vpop.permute.xlu1 %352 }
  0x92   : > { %v471_v29 = vpop.permute.xlu1 %470 }
  0x93   : > { %v476_v30 = vsel %vm124_vm1, %v471_v29, 0 }
  0x96   : > { %v469_v31 = vpop.permute.xlu1 %468 }
  0xef   : > { %v165_v7 = vpop.f32.mrb[0].mxu0 }
  0xf0   : > { %v679_v8 = vpop.f32.mrb[1].mxu0  ;;  %v172_v9 = vsel %vm171_vm2, %v165_v7, -inf }
  0xf1   : > { %173 = vmax.xlane.f32.xlu0 %v172_v9  ;;  %v168_v10 = vpop.f32.mrb[2].mxu0 }
  0xf2   : > { %v680_v11 = vpop.f32.mrb[3].mxu0 }
 0x17e   : > { %v174_v12 = vpop.xlane.xlu0 %173 }
 0x17f   : > { %v175_v13 = vsub.f32 %v165_v7, %v174_v12 }
 0x181   : > { %v176_v14 = vmul.f32 1.442695, %v175_v13 }
 0x183   : > { %739 = vpow2.f32 %v176_v14 }
 0x18d   : > { %v740_v15 = vpop.eup %739 }
 0x18e   : > { %v178_v16 = vsel %vm171_vm2, %v740_v15, 0.0 }
 0x18f   : > { %179 = vadd.xlane.f32.xlu0 %v178_v16 }
 0x1a5   : > { %354 = vrot.lane.b32.xlu0 %v647_v2, %s766_s13 }
 0x21c   : > { %v180_v19 = vpop.xlane.xlu0 %179 }
 0x21d   : > { %741 = vrcp.f32 %v180_v19 }
 0x220   : > { %v355_v26 = vpop.permute.xlu0 %354 }
 0x221   : > { %v360_v28 = vsel %vm124_vm1, %v355_v26, 0 }
 0x227   : > { %v742_v20 = vpop.eup %741 }
 0x228   : > { %v182_v22 = vmul.f32 %v742_v20, %v740_v15 }
 0x22a   : > { %v183_v24 = vpack.c.bf16 %v182_v22, %v182_v22 }
 0x22c   : > { %684 = vmatmul.mubr.msk.bf16.vlgmr.msra.gmra.mrb[0].mxu1 %vm171_vm2, %v183_v24 }
 0x22d   : > { %688 = vmatpush3.bf16.xpose.msra.mxu1 %v241_v23  ;;  %689 = vmatprep.mubr.msk.bf16.mxu1 %vm764_vm0, %v763_v0 }
 0x22e   : > { %699 = vmatprep.subr.bf16.mxu1 %v763_v0 }
 0x234   : > { %690 = vmatmul.mubr.msk.bf16.vlgmr.msra.gmra.mrb[4].mxu1 %vm124_vm1, %v234_v25 }
 0x235   : > { %700 = vmatpush3.bf16.xpose.msra.mxu1 %v360_v28  ;;  %701 = vmatprep.mubr.msk.bf16.mxu1 %vm764_vm0, %v763_v0 }
 0x236   : > { %711 = vmatprep.subr.bf16.mxu1 %v763_v0 }
 0x23c   : > { %702 = vmatmul.mubr.msk.bf16.vlgmr.msra.gmra.mrb[8].mxu1 %vm124_vm1, %v353_v27 }
 0x23d   : > { %712 = vmatpush3.bf16.xpose.msra.mxu1 %v476_v30  ;;  %713 = vmatprep.mubr.msk.bf16.mxu1 %vm764_vm0, %v763_v0 }
 0x244   : > { %714 = vmatmul.mubr.msk.bf16.vlgmr.msra.gmra.mrb[12].mxu1 %vm124_vm1, %v469_v31 }
 0x2ff   : > { %v225_v32 = vpop.f32.mrb[0].mxu1 }
 0x300   : > { %231 = vst.msk [vmem:[#allocation2] sm:$0xff] %vm124_vm1, %v225_v32  ;;  %v685_v33 = vpop.f32.mrb[1].mxu1 }
 0x301   : > { %v228_v34 = vpop.f32.mrb[2].mxu1 }
 0x302   : > { %v686_v35 = vpop.f32.mrb[3].mxu1 }
 0x307   : > { %v277_v36 = vpop.f32.mrb[4].mxu1 }
 0x308   : > { %v691_v37 = vpop.f32.mrb[5].mxu1  ;;  %v283_v38 = vsel %vm171_vm2, %v277_v36, -inf }
 0x309   : > { %284 = vmax.xlane.f32.xlu1 %v283_v38  ;;  %v280_v39 = vpop.f32.mrb[6].mxu1 }
 0x30a   : > { %v692_v40 = vpop.f32.mrb[7].mxu1 }
 0x30f   : > { %v396_v41 = vpop.f32.mrb[8].mxu1 }
 0x310   : > { %v402_v42 = vsel %vm171_vm2, %v396_v41, -inf  ;;  %v703_v43 = vpop.f32.mrb[9].mxu1 }
 0x311   : > { %403 = vmax.xlane.f32.xlu0 %v402_v42  ;;  %v399_v44 = vpop.f32.mrb[10].mxu1 }
 0x312   : > { %v704_v45 = vpop.f32.mrb[11].mxu1 }
 0x317   : > { %v512_v46 = vpop.f32.mrb[12].mxu1 }
 0x318   : > { %v518_v47 = vsel %vm171_vm2, %v512_v46, -inf  ;;  %v715_v48 = vpop.f32.mrb[13].mxu1 }
 0x319   : > { %519 = vmax.xlane.f32.xlu1 %v518_v47  ;;  %v515_v49 = vpop.f32.mrb[14].mxu1 }
 0x31a   : > { %v716_v50 = vpop.f32.mrb[15].mxu1 }
 0x396   : > { %v285_v51 = vpop.xlane.xlu1 %284 }
 0x397   : > { %v286_v52 = vsub.f32 %v277_v36, %v285_v51 }
 0x399   : > { %v287_v53 = vmul.f32 1.442695, %v286_v52 }
 0x39b   : > { %743 = vpow2.f32 %v287_v53 }
 0x39e   : > { %v404_v54 = vpop.xlane.xlu0 %403 }
 0x39f   : > { %v405_v55 = vsub.f32 %v396_v41, %v404_v54 }
 0x3a1   : > { %v406_v56 = vmul.f32 1.442695, %v405_v55 }
 0x3a3   : > { %745 = vpow2.f32 %v406_v56 }
 0x3a5   : > { %v744_v57 = vpop.eup %743 }
 0x3a6   : > { %v289_v58 = vsel %vm171_vm2, %v744_v57, 0.0  ;;  %v520_v62 = vpop.xlane.xlu1 %519 }
 0x3a7   : > { %290 = vadd.xlane.f32.xlu1 %v289_v58  ;;  %v521_v63 = vsub.f32 %v512_v46, %v520_v62 }
 0x3a9   : > { %v522_v1 = vmul.f32 1.442695, %v521_v63 }
 0x3ab   : > { %747 = vpow2.f32 %v522_v1 }
 0x3ad   : > { %v746_v59 = vpop.eup %745 }
 0x3ae   : > { %v408_v60 = vsel %vm171_vm2, %v746_v59, 0.0 }
 0x3af   : > { %409 = vadd.xlane.f32.xlu0 %v408_v60 }
 0x3b5   : > { %v748_v2 = vpop.eup %747 }
 0x3b6   : > { %v524_v3 = vsel %vm171_vm2, %v748_v2, 0.0 }
 0x3b8   : > { %414 = vrot.lane.b32.xlu1 %v651_v61, %s766_s13 }
 0x3c5   : > { %298 = vrot.lane.b32.xlu0 %v651_v61, %s765_s12 }
 0x3dc   : > { %525 = vadd.xlane.f32.xlu1 %v524_v3 }
 0x3ed   : > { %530 = vrot.lane.b32.xlu1 %v651_v61, %s767_s14 }
 0x434   : > { %v291_v4 = vpop.xlane.xlu1 %290 }
 0x435   : > { %749 = vrcp.f32 %v291_v4 }
 0x438   : > { %v415_v10 = vpop.permute.xlu1 %414 }
 0x439   : > { %v420_v12 = vsel %vm187_vm3, %v415_v10, 0 }
 0x43c   : > { %v410_v5 = vpop.xlane.xlu0 %409 }
 0x43d   : > { %751 = vrcp.f32 %v410_v5 }
 0x43f   : > { %v750_v6 = vpop.eup %749 }
 0x440   : > { %v293_v7 = vmul.f32 %v750_v6, %v744_v57  ;;  %v299_v8 = vpop.permute.xlu0 %298 }
 0x441   : > { %v304_v9 = vsel %vm187_vm3, %v299_v8, 0 }
 0x442   : > { %694 = vmatpush3.bf16.msra.mxu0 %v304_v9  ;;  %v294_v11 = vpack.c.bf16 %v293_v7, %v293_v7 }
 0x443   : > { %705 = vmatprep.subr.bf16.mxu0 %v763_v0 }
 0x445   : > { %696 = vmatmul.mubr.msk.bf16.vlgmr.msra.gmra.mrb[4].mxu0 %vm171_vm2, %v294_v11 }
 0x446   : > { %706 = vmatpush3.bf16.msra.mxu0 %v420_v12  ;;  %707 = vmatprep.mubr.msk.bf16.mxu0 %vm764_vm0, %v763_v0 }
 0x447   : > { %v752_v13 = vpop.eup %751  ;;  %717 = vmatprep.subr.bf16.mxu0 %v763_v0 }
 0x448   : > { %v412_v14 = vmul.f32 %v752_v13, %v746_v59 }
 0x44a   : > { %v413_v15 = vpack.c.bf16 %v412_v14, %v412_v14 }
 0x44d   : > { %708 = vmatmul.mubr.msk.bf16.vlgmr.msra.gmra.mrb[8].mxu0 %vm171_vm2, %v413_v15 }
 0x44e   : > { %719 = vmatprep.mubr.msk.bf16.mxu0 %vm764_vm0, %v763_v0 }
 0x469   : > { %v526_v16 = vpop.xlane.xlu1 %525 }
 0x46a   : > { %753 = vrcp.f32 %v526_v16 }
 0x46d   : > { %v531_v17 = vpop.permute.xlu1 %530 }
 0x46e   : > { %v536_v18 = vsel %vm187_vm3, %v531_v17, 0 }
 0x46f   : > { %718 = vmatpush3.bf16.msra.mxu0 %v536_v18 }
 0x474   : > { %v754_v19 = vpop.eup %753 }
 0x475   : > { %v528_v20 = vmul.f32 %v754_v19, %v748_v2 }
 0x477   : > { %v529_v21 = vpack.c.bf16 %v528_v20, %v528_v20 }
 0x479   : > { %720 = vmatmul.mubr.msk.bf16.vlgmr.msra.gmra.mrb[12].mxu0 %vm171_vm2, %v529_v21 }
 0x518   : > { %v340_v22 = vpop.f32.mrb[4].mxu0 }
 0x519   : > { %347 = vrot.lane.b32.xlu0 %v340_v22, %s767_s14  ;;  %v697_v23 = vpop.f32.mrb[5].mxu0 }
 0x51a   : > { %v343_v24 = vpop.f32.mrb[6].mxu0 }
 0x51b   : > { %v698_v25 = vpop.f32.mrb[7].mxu0 }
 0x520   : > { %v456_v26 = vpop.f32.mrb[8].mxu0 }
 0x521   : > { %463 = vrot.lane.b32.xlu1 %v456_v26, %s766_s13  ;;  %v709_v0 = vpop.f32.mrb[9].mxu0 }
 0x522   : > { %v459_v27 = vpop.f32.mrb[10].mxu0 }
 0x523   : > { %v710_v28 = vpop.f32.mrb[11].mxu0 }
 0x54c   : > { %v572_v29 = vpop.f32.mrb[12].mxu0 }
 0x54d   : > { %579 = vrot.lane.b32.xlu0 %v572_v29, %s765_s12  ;;  %v721_v30 = vpop.f32.mrb[13].mxu0 }
 0x54e   : > { %v575_v31 = vpop.f32.mrb[14].mxu0 }
 0x54f   : > { %v722_v32 = vpop.f32.mrb[15].mxu0 }
 0x58b   : > { %v348_v33 = vpop.permute.xlu0 %347 }
 0x58c   : > { %351 = vst.msk [vmem:[#allocation2] sm:$0xff] %vm350_vm4, %v348_v33 }
 0x593   : > { %v464_v34 = vpop.permute.xlu1 %463 }
 0x594   : > { %467 = vst.msk [vmem:[#allocation2] sm:$0xff] %vm466_vm5, %v464_v34 }
 0x5bf   : > { %v580_v35 = vpop.permute.xlu0 %579 }
 0x5c0   : > { %583 = vst.msk [vmem:[#allocation2] sm:$0xff] %vm582_vm6, %v580_v35 }
 0x5c7   : > { %v584_v36 = vld [vmem:[#allocation2] sm:$0xff] }
 0x5c8   : > { %v585_v37 = vpack.c.bf16 %v584_v36, %v584_v36 }
 0x5ca   : > { %586 = vst [vmem:[%s114_s18] sm:$0xf] %v585_v37 }
 0x5cb PF: > { %s11_s6 = sadd.s32 1, %s761_s6  }
 0x5cc   : > { %p8_p4 = scmp.ge.s32.totalorder %s11_s6, 4  }
 0x5ce   :  { %10 = sbr.rel (!%p8_p4) target bundleno = 1 (0x1), region = 54 }

// kernel: transformer_model_forward.41
= control target key start
LH: loop header
LB: loop body
LE: loop exit
PB: predicated region body
PF: predicated region fallthrough
CT: control target
= control target key end

     0   :  { %v453_v0 = vmov 0.0   ;;  %vm454_vm0 = vmmov 0   ;;  %v455_v3 = vmov 0   ;;  %v306_v27 = vlaneseq  ;;  %s566_s1 = inlined_call_operand.vmem [shape: bf16[128,384], index: 1, kind: input, shape index: {}]   ;;  %s567_s0 = inlined_call_operand.vmem [shape: bf16[16,128], index: 0, kind: input, shape index: {}]   ;;  %s568_s2 = inlined_call_operand.vmem [shape: f32[1,384], index: 2, kind: input, shape index: {}]   ;;  %s569_s3 = inlined_call_operand.vmem [shape: bf16[16,384], index: 3, kind: output, shape index: {}]  }
   0x1   :  { %397 = vmatprep.subr.bf16.mxu1 %v453_v0  ;;  %v420_v1 = vld [vmem:[%s566_s1 + $0x4] ss:$12 sps:$4 sm:$0xff]   ;;  %413 = vmatprep.mubr.msk.bf16.mxu1 %vm454_vm0, %v453_v0  ;;  %v422_v2 = vld [vmem:[%s566_s1 + $0x8] ss:$12 sps:$4 sm:$0xff]   ;;  %v423_v4 = vld [vmem:[%s566_s1] ss:$12 sps:$4 sm:$0xff]  }
   0x2   :  { %231 = vmatprep.mubr.bf16.mxu0 %v455_v3  ;;  %199 = vmatprep.subr.bf16.mxu0 %v420_v1  ;;  %v424_v5 = vld [vmem:[%s566_s1 + $0x1c] ss:$12 sps:$4 sm:$0xff]   ;;  %v426_v6 = vld [vmem:[%s566_s1 + $0x20] ss:$12 sps:$4 sm:$0xff]   ;;  %v427_v7 = vld [vmem:[%s566_s1 + $0x18] ss:$12 sps:$4 sm:$0xff]  }
   0x3   :  { %398 = vmatpush3.bf16.msra.mxu1 %v422_v2  ;;  %200 = vmatpush1.bf16.msra.mxu0 %v423_v4  ;;  %v428_v8 = vld [vmem:[%s566_s1 + $0x34] ss:$12 sps:$4 sm:$0xff]   ;;  %v430_v9 = vld [vmem:[%s566_s1 + $0x38] ss:$12 sps:$4 sm:$0xff]   ;;  %v431_v10 = vld [vmem:[%s566_s1 + $0x30] ss:$12 sps:$4 sm:$0xff]  }
   0x4   :  { %399 = vmatprep.subr.bf16.mxu1 %v453_v0  ;;  %201 = vmatprep.subr.bf16.mxu0 %v424_v5  ;;  %v432_v11 = vld [vmem:[%s566_s1 + $0x4c] ss:$12 sps:$4 sm:$0xff]   ;;  %v434_v12 = vld [vmem:[%s566_s1 + $0x50] ss:$12 sps:$4 sm:$0xff]   ;;  %v435_v13 = vld [vmem:[%s566_s1 + $0x48] ss:$12 sps:$4 sm:$0xff]  }
   0x5   :  { %v436_v14 = vld [vmem:[%s566_s1 + $0x64] ss:$12 sps:$4 sm:$0xff]   ;;  %v438_v15 = vld [vmem:[%s566_s1 + $0x68] ss:$12 sps:$4 sm:$0xff]   ;;  %v439_v16 = vld [vmem:[%s566_s1 + $0x60] ss:$12 sps:$4 sm:$0xff]  }
   0x6   :  { %v440_v17 = vld [vmem:[%s566_s1 + $0x7c] ss:$12 sps:$4 sm:$0xff]   ;;  %v442_v18 = vld [vmem:[%s566_s1 + $0x80] ss:$12 sps:$4 sm:$0xff]   ;;  %v443_v19 = vld [vmem:[%s566_s1 + $0x78] ss:$12 sps:$4 sm:$0xff]  }
   0x7   :  { %400 = vmatpush3.bf16.msra.mxu1 %v426_v6  ;;  %202 = vmatpush1.bf16.msra.mxu0 %v427_v7  ;;  %v444_v20 = vld [vmem:[%s566_s1 + $0x94] ss:$12 sps:$4 sm:$0xff]   ;;  %v446_v21 = vld [vmem:[%s566_s1 + $0x98] ss:$12 sps:$4 sm:$0xff]   ;;  %v447_v22 = vld [vmem:[%s566_s1 + $0x90] ss:$12 sps:$4 sm:$0xff]  }
   0x8   :  { %401 = vmatprep.subr.bf16.mxu1 %v453_v0  ;;  %203 = vmatprep.subr.bf16.mxu0 %v428_v8  ;;  %v448_v23 = vld [vmem:[%s566_s1 + $0xac] ss:$12 sps:$4 sm:$0xff]   ;;  %v450_v24 = vld [vmem:[%s566_s1 + $0xb0] ss:$12 sps:$4 sm:$0xff]   ;;  %v451_v25 = vld [vmem:[%s566_s1 + $0xa8] ss:$12 sps:$4 sm:$0xff]  }
   0x9   :  { %v452_v26 = vld [vmem:[%s567_s0] sm:$0xff]   ;;  %v307_v28 = vshrl.u32 %v306_v27, 7 }
   0xa   :  { %v304_v30 = vld [vmem:[%s568_s2] sm:$0x7] }
   0xb   :  { %402 = vmatpush3.bf16.msra.mxu1 %v430_v9  ;;  %204 = vmatpush1.bf16.msra.mxu0 %v431_v10  ;;  %v316_v29 = vsub.s32 2, %v307_v28  ;;  %v308_v31 = vsub.s32 0, %v307_v28  ;;  %v312_v32 = vsub.s32 1, %v307_v28 }
   0xc   :  { %403 = vmatprep.subr.bf16.mxu1 %v453_v0  ;;  %205 = vmatprep.subr.bf16.mxu0 %v432_v11 }
   0xd   :  { %v317_v33 = vrot.slane %v304_v30, %v316_v29  ;;  %v309_v34 = vrot.slane %v304_v30, %v308_v31  ;;  %v313_v35 = vrot.slane %v304_v30, %v312_v32 }
   0xf   :  { %404 = vmatpush3.bf16.msra.mxu1 %v434_v12  ;;  %206 = vmatpush1.bf16.msra.mxu0 %v435_v13 }
  0x10   :  { %405 = vmatprep.subr.bf16.mxu1 %v453_v0  ;;  %207 = vmatprep.subr.bf16.mxu0 %v436_v14 }
  0x13   :  { %406 = vmatpush3.bf16.msra.mxu1 %v438_v15  ;;  %208 = vmatpush1.bf16.msra.mxu0 %v439_v16 }
  0x14   :  { %407 = vmatprep.subr.bf16.mxu1 %v453_v0  ;;  %209 = vmatprep.subr.bf16.mxu0 %v440_v17 }
  0x17   :  { %408 = vmatpush3.bf16.msra.mxu1 %v442_v18  ;;  %210 = vmatpush1.bf16.msra.mxu0 %v443_v19 }
  0x18   :  { %409 = vmatprep.subr.bf16.mxu1 %v453_v0  ;;  %211 = vmatprep.subr.bf16.mxu0 %v444_v20 }
  0x1b   :  { %410 = vmatpush3.bf16.msra.mxu1 %v446_v21  ;;  %212 = vmatpush1.bf16.msra.mxu0 %v447_v22 }
  0x1c   :  { %411 = vmatprep.subr.bf16.mxu1 %v453_v0  ;;  %213 = vmatprep.subr.bf16.mxu0 %v448_v23 }
  0x1f   :  { %412 = vmatpush3.bf16.msra.mxu1 %v450_v24  ;;  %214 = vmatpush1.bf16.msra.mxu0 %v451_v25 }
  0x22   :  { %414 = vmatmul.mubr.bf16.vlgmr.msra.gmra.mrb[0].mxu1 %v452_v26  ;;  %232 = vmatmul.mubr.bf16.vlgmr.msra.gmra.mrb[0].mxu0 %v452_v26 }
  0xf5   :  { %v276_v36 = vpop.f32.mrb[0].mxu1  ;;  %v233_v38 = vpop.f32.mrb[0].mxu0 }
  0xf6   :  { %v323_v37 = vadd.f32 %v317_v33, %v276_v36  ;;  %v415_v39 = vpop.f32.mrb[1].mxu1  ;;  %v321_v40 = vadd.f32 %v309_v34, %v233_v38  ;;  %v235_v41 = vpop.f32.mrb[1].mxu0 }
  0xf7   :  { %v279_v42 = vpop.f32.mrb[2].mxu1  ;;  %v322_v44 = vadd.f32 %v313_v35, %v235_v41  ;;  %v237_v46 = vpop.f32.mrb[2].mxu0 }
  0xf8   :  { %v385_v43 = vpack.c.bf16 %v323_v37, %v323_v37  ;;  %v326_v45 = vadd.f32 %v317_v33, %v279_v42  ;;  %v416_v47 = vpop.f32.mrb[3].mxu1  ;;  %v324_v48 = vadd.f32 %v309_v34, %v237_v46  ;;  %v239_v49 = vpop.f32.mrb[3].mxu0 }
  0xf9   :  { %v384_v50 = vpack.c.bf16 %v322_v44, %v321_v40  ;;  %v325_v52 = vadd.f32 %v313_v35, %v239_v49 }
  0xfa   :  { %348 = vst [vmem:[%s569_s3 + $0x8] sm:$0xf] %v385_v43  ;;  %v387_v51 = vpack.c.bf16 %v326_v45, %v326_v45 }
  0xfb   :  { %347 = vst [vmem:[%s569_s3] sm:$0xff] %v384_v50  ;;  %v386_v53 = vpack.c.bf16 %v325_v52, %v324_v48 }
  0xfc   :  { %350 = vst [vmem:[%s569_s3 + $0x14] sm:$0xf] %v387_v51 }
  0xfd   :  { %349 = vst [vmem:[%s569_s3 + $0xc] sm:$0xff] %v386_v53 }

// kernel: transformer_model_forward.55
= control target key start
LH: loop header
LB: loop body
LE: loop exit
PB: predicated region body
PF: predicated region fallthrough
CT: control target
= control target key end

     0   :  { %s124_s0 = inlined_call_operand.vmem [shape: bf16[16,128], index: 0, kind: input, shape index: {}]   ;;  %s125_s1 = inlined_call_operand.vmem [shape: f32[1,128], index: 1, kind: input, shape index: {}]   ;;  %s126_s2 = inlined_call_operand.vmem [shape: f32[1,128], index: 2, kind: input, shape index: {}]   ;;  %s127_s3 = inlined_call_operand.vmem [shape: bf16[16,128], index: 3, kind: output, shape index: {}]  }
   0x1   :  { %v80_v0 = vld [vmem:[%s124_s0] sm:$0xff]  }
   0x2   :  { %v81_v1 = vunpack.c.l.bf16 %v80_v0  ;;  %v82_v2 = vunpack.c.h.bf16 %v80_v0  ;;  %v73_v19 = vld [vmem:[%s125_s1] ss:$0 sm:$0xff] }
   0x3   :  { %v74_v23 = vld [vmem:[%s126_s2] ss:$0 sm:$0xff] }
   0x4   :  { %18 = vadd.xlane.f32.xlu0 %v81_v1 }
   0x8   :  { %20 = vadd.xlane.f32.xlu0 %v82_v2 }
  0x91   :  { %v19_v3 = vpop.xlane.xlu0 %18 }
  0x92   :  { %v23_v4 = vmul.f32 0.0078125, %v19_v3 }
  0x94   :  { %v25_v5 = vsub.f32 %v81_v1, %v23_v4 }
  0x95   :  { %v21_v6 = vpop.xlane.xlu0 %20 }
  0x96   :  { %v24_v7 = vmul.f32 0.0078125, %v21_v6  ;;  %v27_v8 = vmul.f32 %v25_v5, %v25_v5 }
  0x98   :  { %v26_v9 = vsub.f32 %v82_v2, %v24_v7  ;;  %29 = vadd.xlane.f32.xlu1 %v27_v8 }
  0x9a   :  { %v28_v10 = vmul.f32 %v26_v9, %v26_v9 }
  0x9c   :  { %31 = vadd.xlane.f32.xlu1 %v28_v10 }
 0x125   :  { %v30_v11 = vpop.xlane.xlu1 %29 }
 0x126   :  { %v33_v12 = vmul.f32 0.0078125, %v30_v11 }
 0x128   :  { %v35_v13 = vadd.f32 1e-05, %v33_v12 }
 0x129   :  { %v32_v14 = vpop.xlane.xlu1 %31 }
 0x12a   :  { %88 = vrsqrt.f32 %v35_v13  ;;  %v34_v15 = vmul.f32 0.0078125, %v32_v14 }
 0x12c   :  { %v36_v16 = vadd.f32 1e-05, %v34_v15 }
 0x12e   :  { %90 = vrsqrt.f32 %v36_v16 }
 0x134   :  { %v89_v17 = vpop.eup %88 }
 0x135   :  { %v39_v18 = vmul.f32 %v89_v17, %v25_v5 }
 0x137   :  { %v48_v21 = vmul.f32 %v73_v19, %v39_v18 }
 0x138   :  { %v91_v20 = vpop.eup %90 }
 0x139   :  { %v40_v22 = vmul.f32 %v91_v20, %v26_v9  ;;  %v57_v25 = vadd.f32 %v74_v23, %v48_v21 }
 0x13b   :  { %v49_v24 = vmul.f32 %v73_v19, %v40_v22 }
 0x13d   :  { %v58_v26 = vadd.f32 %v74_v23, %v49_v24 }
 0x13f   :  { %v86_v27 = vpack.c.bf16 %v58_v26, %v57_v25 }
 0x141   :  { %87 = vst [vmem:[%s127_s3] sm:$0xff] %v86_v27  }

// kernel: transformer_model_forward.45
= control target key start
LH: loop header
LB: loop body
LE: loop exit
PB: predicated region body
PF: predicated region fallthrough
CT: control target
= control target key end

     0   :  { %v509_v1 = vmov 0   ;;  %v350_v34 = vlaneseq  ;;  %s644_s1 = inlined_call_operand.vmem [shape: bf16[128,512], index: 1, kind: input, shape index: {}]   ;;  %s645_s0 = inlined_call_operand.vmem [shape: bf16[16,128], index: 0, kind: input, shape index: {}]   ;;  %s646_s2 = inlined_call_operand.vmem [shape: f32[1,512], index: 2, kind: input, shape index: {}]   ;;  %s647_s3 = inlined_call_operand.vmem [shape: bf16[16,512], index: 3, kind: output, shape index: {}]  }
   0x1   :  { %v460_v0 = vld [vmem:[%s644_s1 + $0x4] ss:$16 sps:$4 sm:$0xff]   ;;  %267 = vmatprep.mubr.bf16.mxu0 %v509_v1  ;;  %310 = vmatprep.mubr.bf16.mxu1 %v509_v1  ;;  %v462_v2 = vld [vmem:[%s644_s1 + $0xc] ss:$16 sps:$4 sm:$0xff]   ;;  %v464_v3 = vld [vmem:[%s644_s1] ss:$16 sps:$4 sm:$0xff]  }
   0x2   :  { %235 = vmatprep.subr.bf16.mxu0 %v460_v0  ;;  %v465_v4 = vld [vmem:[%s644_s1 + $0x8] ss:$16 sps:$4 sm:$0xff]   ;;  %278 = vmatprep.subr.bf16.mxu1 %v462_v2  ;;  %v466_v5 = vld [vmem:[%s644_s1 + $0x24] ss:$16 sps:$4 sm:$0xff]   ;;  %v468_v6 = vld [vmem:[%s644_s1 + $0x2c] ss:$16 sps:$4 sm:$0xff]  }
   0x3   :  { %236 = vmatpush1.bf16.msra.mxu0 %v464_v3  ;;  %279 = vmatpush1.bf16.msra.mxu1 %v465_v4  ;;  %v470_v7 = vld [vmem:[%s644_s1 + $0x20] ss:$16 sps:$4 sm:$0xff]   ;;  %v471_v8 = vld [vmem:[%s644_s1 + $0x28] ss:$16 sps:$4 sm:$0xff]   ;;  %v472_v9 = vld [vmem:[%s644_s1 + $0x44] ss:$16 sps:$4 sm:$0xff]  }
   0x4   :  { %237 = vmatprep.subr.bf16.mxu0 %v466_v5  ;;  %280 = vmatprep.subr.bf16.mxu1 %v468_v6  ;;  %v474_v10 = vld [vmem:[%s644_s1 + $0x4c] ss:$16 sps:$4 sm:$0xff]   ;;  %v476_v11 = vld [vmem:[%s644_s1 + $0x40] ss:$16 sps:$4 sm:$0xff]   ;;  %v477_v12 = vld [vmem:[%s644_s1 + $0x48] ss:$16 sps:$4 sm:$0xff]  }
   0x5   :  { %v478_v13 = vld [vmem:[%s644_s1 + $0x64] ss:$16 sps:$4 sm:$0xff]   ;;  %v480_v14 = vld [vmem:[%s644_s1 + $0x6c] ss:$16 sps:$4 sm:$0xff]   ;;  %v482_v15 = vld [vmem:[%s644_s1 + $0x60] ss:$16 sps:$4 sm:$0xff]  }
   0x6   :  { %v483_v16 = vld [vmem:[%s644_s1 + $0x68] ss:$16 sps:$4 sm:$0xff]   ;;  %v484_v17 = vld [vmem:[%s644_s1 + $0x84] ss:$16 sps:$4 sm:$0xff]   ;;  %v486_v18 = vld [vmem:[%s644_s1 + $0x8c] ss:$16 sps:$4 sm:$0xff]  }
   0x7   :  { %238 = vmatpush1.bf16.msra.mxu0 %v470_v7  ;;  %281 = vmatpush1.bf16.msra.mxu1 %v471_v8  ;;  %v488_v19 = vld [vmem:[%s644_s1 + $0x80] ss:$16 sps:$4 sm:$0xff]   ;;  %v489_v20 = vld [vmem:[%s644_s1 + $0x88] ss:$16 sps:$4 sm:$0xff]   ;;  %v490_v21 = vld [vmem:[%s644_s1 + $0xa4] ss:$16 sps:$4 sm:$0xff]  }
   0x8   :  { %239 = vmatprep.subr.bf16.mxu0 %v472_v9  ;;  %282 = vmatprep.subr.bf16.mxu1 %v474_v10  ;;  %v492_v22 = vld [vmem:[%s644_s1 + $0xac] ss:$16 sps:$4 sm:$0xff]   ;;  %v494_v23 = vld [vmem:[%s644_s1 + $0xa0] ss:$16 sps:$4 sm:$0xff]   ;;  %v495_v24 = vld [vmem:[%s644_s1 + $0xa8] ss:$16 sps:$4 sm:$0xff]  }
   0x9   :  { %v496_v25 = vld [vmem:[%s644_s1 + $0xc4] ss:$16 sps:$4 sm:$0xff]   ;;  %v498_v26 = vld [vmem:[%s644_s1 + $0xcc] ss:$16 sps:$4 sm:$0xff]   ;;  %v500_v27 = vld [vmem:[%s644_s1 + $0xc0] ss:$16 sps:$4 sm:$0xff]  }
   0xa   :  { %v501_v28 = vld [vmem:[%s644_s1 + $0xc8] ss:$16 sps:$4 sm:$0xff]   ;;  %v502_v29 = vld [vmem:[%s644_s1 + $0xe4] ss:$16 sps:$4 sm:$0xff]   ;;  %v504_v30 = vld [vmem:[%s644_s1 + $0xec] ss:$16 sps:$4 sm:$0xff]  }
   0xb   :  { %240 = vmatpush1.bf16.msra.mxu0 %v476_v11  ;;  %283 = vmatpush1.bf16.msra.mxu1 %v477_v12  ;;  %v506_v31 = vld [vmem:[%s644_s1 + $0xe0] ss:$16 sps:$4 sm:$0xff]   ;;  %v507_v32 = vld [vmem:[%s644_s1 + $0xe8] ss:$16 sps:$4 sm:$0xff]   ;;  %v351_v35 = vshrl.u32 %v350_v34, 7 }
   0xc   :  { %241 = vmatprep.subr.bf16.mxu0 %v478_v13  ;;  %284 = vmatprep.subr.bf16.mxu1 %v480_v14  ;;  %v508_v33 = vld [vmem:[%s645_s0] sm:$0xff]  }
   0xd   :  { %v352_v36 = vsub.s32 0, %v351_v35  ;;  %v360_v37 = vsub.s32 2, %v351_v35  ;;  %v348_v38 = vld [vmem:[%s646_s2] sm:$0xf]  ;;  %v356_v39 = vsub.s32 1, %v351_v35  ;;  %v364_v40 = vsub.s32 3, %v351_v35 }
   0xf   :  { %242 = vmatpush1.bf16.msra.mxu0 %v482_v15  ;;  %285 = vmatpush1.bf16.msra.mxu1 %v483_v16  ;;  %v353_v41 = vrot.slane %v348_v38, %v352_v36  ;;  %v361_v42 = vrot.slane %v348_v38, %v360_v37  ;;  %v357_v43 = vrot.slane %v348_v38, %v356_v39 }
  0x10   :  { %243 = vmatprep.subr.bf16.mxu0 %v484_v17  ;;  %286 = vmatprep.subr.bf16.mxu1 %v486_v18  ;;  %v365_v44 = vrot.slane %v348_v38, %v364_v40 }
  0x13   :  { %244 = vmatpush1.bf16.msra.mxu0 %v488_v19  ;;  %287 = vmatpush1.bf16.msra.mxu1 %v489_v20 }
  0x14   :  { %245 = vmatprep.subr.bf16.mxu0 %v490_v21  ;;  %288 = vmatprep.subr.bf16.mxu1 %v492_v22 }
  0x17   :  { %246 = vmatpush1.bf16.msra.mxu0 %v494_v23  ;;  %289 = vmatpush1.bf16.msra.mxu1 %v495_v24 }
  0x18   :  { %247 = vmatprep.subr.bf16.mxu0 %v496_v25  ;;  %290 = vmatprep.subr.bf16.mxu1 %v498_v26 }
  0x1b   :  { %248 = vmatpush1.bf16.msra.mxu0 %v500_v27  ;;  %291 = vmatpush1.bf16.msra.mxu1 %v501_v28 }
  0x1c   :  { %249 = vmatprep.subr.bf16.mxu0 %v502_v29  ;;  %292 = vmatprep.subr.bf16.mxu1 %v504_v30 }
  0x1f   :  { %250 = vmatpush1.bf16.msra.mxu0 %v506_v31  ;;  %293 = vmatpush1.bf16.msra.mxu1 %v507_v32 }
  0x22   :  { %268 = vmatmul.mubr.bf16.vlgmr.msra.gmra.mrb[0].mxu0 %v508_v33  ;;  %311 = vmatmul.mubr.bf16.vlgmr.msra.gmra.mrb[0].mxu1 %v508_v33 }
  0xf5   :  { %v269_v45 = vpop.f32.mrb[0].mxu0  ;;  %v312_v46 = vpop.f32.mrb[0].mxu1 }
  0xf6   :  { %v370_v47 = vadd.f32 %v353_v41, %v269_v45  ;;  %v372_v48 = vadd.f32 %v361_v42, %v312_v46  ;;  %v271_v49 = vpop.f32.mrb[1].mxu0  ;;  %v314_v50 = vpop.f32.mrb[1].mxu1 }
  0xf7   :  { %v371_v51 = vadd.f32 %v357_v43, %v271_v49  ;;  %v373_v52 = vadd.f32 %v365_v44, %v314_v50  ;;  %v273_v53 = vpop.f32.mrb[2].mxu0  ;;  %v316_v54 = vpop.f32.mrb[2].mxu1 }
  0xf8   :  { %v378_v55 = vmax.f32 %v370_v47, 0.0  ;;  %v380_v56 = vmax.f32 %v372_v48, 0.0  ;;  %v374_v57 = vadd.f32 %v353_v41, %v273_v53  ;;  %v376_v58 = vadd.f32 %v361_v42, %v316_v54  ;;  %v275_v59 = vpop.f32.mrb[3].mxu0  ;;  %v318_v60 = vpop.f32.mrb[3].mxu1 }
  0xf9   :  { %v379_v61 = vmax.f32 %v371_v51, 0.0  ;;  %v381_v62 = vmax.f32 %v373_v52, 0.0  ;;  %v375_v63 = vadd.f32 %v357_v43, %v275_v59  ;;  %v377_v0 = vadd.f32 %v365_v44, %v318_v60 }
  0xfa   :  { %v382_v1 = vmax.f32 %v374_v57, 0.0  ;;  %v384_v2 = vmax.f32 %v376_v58, 0.0 }
  0xfb   :  { %v455_v3 = vpack.c.bf16 %v379_v61, %v378_v55  ;;  %v456_v4 = vpack.c.bf16 %v381_v62, %v380_v56  ;;  %v383_v5 = vmax.f32 %v375_v63, 0.0  ;;  %v385_v6 = vmax.f32 %v377_v0, 0.0 }
  0xfd   :  { %410 = vst [vmem:[%s647_s3] sm:$0xff] %v455_v3  ;;  %411 = vst [vmem:[%s647_s3 + $0x8] sm:$0xff] %v456_v4  ;;  %v457_v7 = vpack.c.bf16 %v383_v5, %v382_v1  ;;  %v458_v8 = vpack.c.bf16 %v385_v6, %v384_v2 }
  0xff   :  { %412 = vst [vmem:[%s647_s3 + $0x10] sm:$0xff] %v457_v7  ;;  %413 = vst [vmem:[%s647_s3 + $0x18] sm:$0xff] %v458_v8 }

// kernel: transformer_model_forward.46
= control target key start
LH: loop header
LB: loop body
LE: loop exit
PB: predicated region body
PF: predicated region fallthrough
CT: control target
= control target key end

     0   :  { %s679_s1 = inlined_call_operand.vmem [shape: bf16[512,128], index: 1, kind: input, shape index: {}]   ;;  %s680_s0 = inlined_call_operand.vmem [shape: bf16[16,512], index: 0, kind: input, shape index: {}]   ;;  %s681_s2 = inlined_call_operand.vmem [shape: f32[1,128], index: 2, kind: input, shape index: {}]   ;;  %s682_s3 = inlined_call_operand.vmem [shape: bf16[16,128], index: 3, kind: output, shape index: {}]  }
   0x1   :  { %v507_v0 = vld [vmem:[%s679_s1 + $0x40] sm:$0xff]   ;;  %v511_v4 = vld [vmem:[%s679_s1 + $0x48] sm:$0xff]   ;;  %v515_v8 = vld [vmem:[%s679_s1 + $0x50] sm:$0xff]  }
   0x2   :  { %v508_v1 = vld [vmem:[%s679_s1 + $0xc0] sm:$0xff]   ;;  %463 = vmatprep.subr.bf16.mxu0 %v507_v0  ;;  %v512_v5 = vld [vmem:[%s679_s1 + $0xc8] sm:$0xff]   ;;  %v516_v9 = vld [vmem:[%s679_s1 + $0xd0] sm:$0xff]  }
   0x3   :  { %v509_v2 = vld [vmem:[%s679_s1] sm:$0xff]   ;;  %485 = vmatprep.subr.bf16.mxu1 %v508_v1  ;;  %v513_v6 = vld [vmem:[%s679_s1 + $0x8] sm:$0xff]   ;;  %v517_v10 = vld [vmem:[%s679_s1 + $0x10] sm:$0xff]  }
   0x4   :  { %v510_v3 = vld [vmem:[%s679_s1 + $0x80] sm:$0xff]   ;;  %464 = vmatpush3.bf16.msra.mxu0 %v509_v2  ;;  %v514_v7 = vld [vmem:[%s679_s1 + $0x88] sm:$0xff]   ;;  %v518_v11 = vld [vmem:[%s679_s1 + $0x90] sm:$0xff]  }
   0x5   :  { %486 = vmatpush3.bf16.msra.mxu1 %v510_v3  ;;  %465 = vmatprep.subr.bf16.mxu0 %v511_v4  ;;  %v519_v12 = vld [vmem:[%s679_s1 + $0x58] sm:$0xff]   ;;  %v523_v16 = vld [vmem:[%s679_s1 + $0x60] sm:$0xff]   ;;  %v527_v20 = vld [vmem:[%s679_s1 + $0x68] sm:$0xff]  }
   0x6   :  { %487 = vmatprep.subr.bf16.mxu1 %v512_v5  ;;  %v520_v13 = vld [vmem:[%s679_s1 + $0xd8] sm:$0xff]   ;;  %v524_v17 = vld [vmem:[%s679_s1 + $0xe0] sm:$0xff]   ;;  %v528_v21 = vld [vmem:[%s679_s1 + $0xe8] sm:$0xff]  }
   0x7   :  { %v521_v14 = vld [vmem:[%s679_s1 + $0x18] sm:$0xff]   ;;  %v525_v18 = vld [vmem:[%s679_s1 + $0x20] sm:$0xff]   ;;  %v529_v22 = vld [vmem:[%s679_s1 + $0x28] sm:$0xff]  }
   0x8   :  { %466 = vmatpush3.bf16.msra.mxu0 %v513_v6  ;;  %v522_v15 = vld [vmem:[%s679_s1 + $0x98] sm:$0xff]   ;;  %v526_v19 = vld [vmem:[%s679_s1 + $0xa0] sm:$0xff]   ;;  %v530_v23 = vld [vmem:[%s679_s1 + $0xa8] sm:$0xff]  }
   0x9   :  { %488 = vmatpush3.bf16.msra.mxu1 %v514_v7  ;;  %467 = vmatprep.subr.bf16.mxu0 %v515_v8  ;;  %v531_v24 = vld [vmem:[%s679_s1 + $0x70] sm:$0xff]   ;;  %v535_v28 = vld [vmem:[%s679_s1 + $0x78] sm:$0xff]   ;;  %v453_v49 = vld [vmem:[%s681_s2] ss:$0 sm:$0xff] }
   0xa   :  { %489 = vmatprep.subr.bf16.mxu1 %v516_v9  ;;  %v532_v25 = vld [vmem:[%s679_s1 + $0xf0] sm:$0xff]   ;;  %v536_v29 = vld [vmem:[%s679_s1 + $0xf8] sm:$0xff]  }
   0xb   :  { %v533_v26 = vld [vmem:[%s679_s1 + $0x30] sm:$0xff]   ;;  %v537_v30 = vld [vmem:[%s679_s1 + $0x38] sm:$0xff]  }
   0xc   :  { %468 = vmatpush3.bf16.msra.mxu0 %v517_v10  ;;  %v534_v27 = vld [vmem:[%s679_s1 + $0xb0] sm:$0xff]   ;;  %v538_v31 = vld [vmem:[%s679_s1 + $0xb8] sm:$0xff]  }
   0xd   :  { %490 = vmatpush3.bf16.msra.mxu1 %v518_v11  ;;  %469 = vmatprep.subr.bf16.mxu0 %v519_v12  ;;  %v539_v32 = vld [vmem:[%s680_s0] ss:$16 sps:$4 sm:$0xff]   ;;  %v541_v33 = vld [vmem:[%s680_s0 + $0x4] ss:$16 sps:$4 sm:$0xff]   ;;  %v542_v34 = vld [vmem:[%s680_s0 + $0x8] ss:$16 sps:$4 sm:$0xff]  }
   0xe   :  { %491 = vmatprep.subr.bf16.mxu1 %v520_v13  ;;  %v544_v35 = vld [vmem:[%s680_s0 + $0xc] ss:$16 sps:$4 sm:$0xff]   ;;  %335 = vmatprep.mubr.bf16.mxu0 %v541_v33 }
   0xf   :  { %376 = vmatprep.mubr.bf16.mxu1 %v544_v35 }
  0x10   :  { %470 = vmatpush3.bf16.msra.mxu0 %v521_v14 }
  0x11   :  { %492 = vmatpush3.bf16.msra.mxu1 %v522_v15  ;;  %471 = vmatprep.subr.bf16.mxu0 %v523_v16 }
  0x12   :  { %493 = vmatprep.subr.bf16.mxu1 %v524_v17 }
  0x14   :  { %472 = vmatpush3.bf16.msra.mxu0 %v525_v18 }
  0x15   :  { %494 = vmatpush3.bf16.msra.mxu1 %v526_v19  ;;  %473 = vmatprep.subr.bf16.mxu0 %v527_v20 }
  0x16   :  { %495 = vmatprep.subr.bf16.mxu1 %v528_v21 }
  0x18   :  { %474 = vmatpush3.bf16.msra.mxu0 %v529_v22 }
  0x19   :  { %496 = vmatpush3.bf16.msra.mxu1 %v530_v23  ;;  %475 = vmatprep.subr.bf16.mxu0 %v531_v24 }
  0x1a   :  { %497 = vmatprep.subr.bf16.mxu1 %v532_v25 }
  0x1c   :  { %476 = vmatpush3.bf16.msra.mxu0 %v533_v26 }
  0x1d   :  { %498 = vmatpush3.bf16.msra.mxu1 %v534_v27  ;;  %477 = vmatprep.subr.bf16.mxu0 %v535_v28 }
  0x1e   :  { %499 = vmatprep.subr.bf16.mxu1 %v536_v29 }
  0x20   :  { %478 = vmatpush3.bf16.msra.mxu0 %v537_v30 }
  0x21   :  { %500 = vmatpush3.bf16.msra.mxu1 %v538_v31 }
  0x23   :  { %336 = vmatmul.mubr.bf16.vlgmr.msra.gmra.mrb[0].mxu0 %v539_v32 }
  0x24   :  { %377 = vmatmul.mubr.bf16.vlgmr.msra.gmra.mrb[0].mxu1 %v542_v34 }
  0xf6   :  { %v479_v36 = vpop.f32.mrb[0].mxu0 }
  0xf7   :  { %v501_v37 = vpop.f32.mrb[0].mxu1  ;;  %v480_v38 = vpop.f32.mrb[1].mxu0 }
  0xf8   :  { %v481_v39 = vadd.f32 %v480_v38, %v479_v36  ;;  %v502_v40 = vpop.f32.mrb[1].mxu1  ;;  %v482_v41 = vpop.f32.mrb[2].mxu0 }
  0xf9   :  { %v503_v42 = vadd.f32 %v502_v40, %v501_v37  ;;  %v504_v43 = vpop.f32.mrb[2].mxu1  ;;  %v483_v44 = vpop.f32.mrb[3].mxu0 }
  0xfa   :  { %v484_v45 = vadd.f32 %v483_v44, %v482_v41  ;;  %v505_v46 = vpop.f32.mrb[3].mxu1 }
  0xfb   :  { %v379_v47 = vadd.f32 %v503_v42, %v481_v39  ;;  %v506_v48 = vadd.f32 %v505_v46, %v504_v43 }
  0xfd   :  { %v382_v50 = vadd.f32 %v506_v48, %v484_v45  ;;  %v401_v51 = vadd.f32 %v453_v49, %v379_v47 }
  0xff   :  { %v402_v52 = vadd.f32 %v453_v49, %v382_v50 }
 0x101   :  { %v461_v53 = vpack.c.bf16 %v402_v52, %v401_v51 }
 0x103   :  { %462 = vst [vmem:[%s682_s3] sm:$0xff] %v461_v53  }

// kernel: transformer_model_forward.73
= control target key start
LH: loop header
LB: loop body
LE: loop exit
PB: predicated region body
PF: predicated region fallthrough
CT: control target
= control target key end

     0   :  { %v270_v1 = vmov 0   ;;  %v191_v18 = vlaneseq  ;;  %s351_s1 = inlined_call_operand.vmem [shape: bf16[128,256], index: 1, kind: input, shape index: {}]   ;;  %s352_s0 = inlined_call_operand.vmem [shape: bf16[16,128], index: 0, kind: input, shape index: {}]   ;;  %s353_s2 = inlined_call_operand.vmem [shape: f32[1,256], index: 2, kind: input, shape index: {}]   ;;  %s354_s3 = inlined_call_operand.vmem [shape: bf16[16,256], index: 3, kind: output, shape index: {}]  }
   0x1   :  { %v245_v0 = vld [vmem:[%s351_s1 + $0x4] ss:$8 sps:$4 sm:$0xff]   ;;  %163 = vmatprep.mubr.bf16.mxu0 %v270_v1  ;;  %v247_v2 = vld [vmem:[%s351_s1] ss:$8 sps:$4 sm:$0xff]   ;;  %v248_v3 = vld [vmem:[%s351_s1 + $0x14] ss:$8 sps:$4 sm:$0xff]  }
   0x2   :  { %131 = vmatprep.subr.bf16.mxu0 %v245_v0  ;;  %v250_v4 = vld [vmem:[%s351_s1 + $0x10] ss:$8 sps:$4 sm:$0xff]   ;;  %v251_v5 = vld [vmem:[%s351_s1 + $0x24] ss:$8 sps:$4 sm:$0xff]   ;;  %v253_v6 = vld [vmem:[%s351_s1 + $0x20] ss:$8 sps:$4 sm:$0xff]  }
   0x3   :  { %132 = vmatpush1.bf16.msra.mxu0 %v247_v2  ;;  %v254_v7 = vld [vmem:[%s351_s1 + $0x34] ss:$8 sps:$4 sm:$0xff]   ;;  %v256_v8 = vld [vmem:[%s351_s1 + $0x30] ss:$8 sps:$4 sm:$0xff]   ;;  %v257_v9 = vld [vmem:[%s351_s1 + $0x44] ss:$8 sps:$4 sm:$0xff]  }
   0x4   :  { %133 = vmatprep.subr.bf16.mxu0 %v248_v3  ;;  %v259_v10 = vld [vmem:[%s351_s1 + $0x40] ss:$8 sps:$4 sm:$0xff]   ;;  %v260_v11 = vld [vmem:[%s351_s1 + $0x54] ss:$8 sps:$4 sm:$0xff]   ;;  %v262_v12 = vld [vmem:[%s351_s1 + $0x50] ss:$8 sps:$4 sm:$0xff]  }
   0x5   :  { %v263_v13 = vld [vmem:[%s351_s1 + $0x64] ss:$8 sps:$4 sm:$0xff]   ;;  %v265_v14 = vld [vmem:[%s351_s1 + $0x60] ss:$8 sps:$4 sm:$0xff]   ;;  %v266_v15 = vld [vmem:[%s351_s1 + $0x74] ss:$8 sps:$4 sm:$0xff]  }
   0x6   :  { %v268_v16 = vld [vmem:[%s351_s1 + $0x70] ss:$8 sps:$4 sm:$0xff]   ;;  %v269_v17 = vld [vmem:[%s352_s0] sm:$0xff]   ;;  %v192_v19 = vshrl.u32 %v191_v18, 7 }
   0x7   :  { %134 = vmatpush1.bf16.msra.mxu0 %v250_v4  ;;  %v189_v21 = vld [vmem:[%s353_s2] sm:$0x3] }
   0x8   :  { %135 = vmatprep.subr.bf16.mxu0 %v251_v5  ;;  %v193_v20 = vsub.s32 0, %v192_v19  ;;  %v197_v22 = vsub.s32 1, %v192_v19 }
   0xa   :  { %v194_v23 = vrot.slane %v189_v21, %v193_v20  ;;  %v198_v24 = vrot.slane %v189_v21, %v197_v22 }
   0xb   :  { %136 = vmatpush1.bf16.msra.mxu0 %v253_v6 }
   0xc   :  { %137 = vmatprep.subr.bf16.mxu0 %v254_v7 }
   0xf   :  { %138 = vmatpush1.bf16.msra.mxu0 %v256_v8 }
  0x10   :  { %139 = vmatprep.subr.bf16.mxu0 %v257_v9 }
  0x13   :  { %140 = vmatpush1.bf16.msra.mxu0 %v259_v10 }
  0x14   :  { %141 = vmatprep.subr.bf16.mxu0 %v260_v11 }
  0x17   :  { %142 = vmatpush1.bf16.msra.mxu0 %v262_v12 }
  0x18   :  { %143 = vmatprep.subr.bf16.mxu0 %v263_v13 }
  0x1b   :  { %144 = vmatpush1.bf16.msra.mxu0 %v265_v14 }
  0x1c   :  { %145 = vmatprep.subr.bf16.mxu0 %v266_v15 }
  0x1f   :  { %146 = vmatpush1.bf16.msra.mxu0 %v268_v16 }
  0x22   :  { %164 = vmatmul.mubr.bf16.vlgmr.msra.gmra.mrb[0].mxu0 %v269_v17 }
  0xf5   :  { %v165_v25 = vpop.f32.mrb[0].mxu0 }
  0xf6   :  { %v201_v26 = vadd.f32 %v194_v23, %v165_v25  ;;  %v167_v27 = vpop.f32.mrb[1].mxu0 }
  0xf7   :  { %v202_v28 = vadd.f32 %v198_v24, %v167_v27  ;;  %v169_v29 = vpop.f32.mrb[2].mxu0 }
  0xf8   :  { %v203_v30 = vadd.f32 %v194_v23, %v169_v29  ;;  %v171_v31 = vpop.f32.mrb[3].mxu0 }
  0xf9   :  { %v242_v32 = vpack.c.bf16 %v202_v28, %v201_v26  ;;  %v204_v33 = vadd.f32 %v198_v24, %v171_v31 }
  0xfb   :  { %217 = vst [vmem:[%s354_s3] sm:$0xff] %v242_v32  ;;  %v243_v34 = vpack.c.bf16 %v204_v33, %v203_v30 }
  0xfd   :  { %218 = vst [vmem:[%s354_s3 + $0x8] sm:$0xff] %v243_v34 }

// kernel: transformer_model_forward.62
= control target key start
LH: loop header
LB: loop body
LE: loop exit
PB: predicated region body
PF: predicated region fallthrough
CT: control target
= control target key end

     0   :  { %s840_s9 = smov 0   ;;  %s935_s0 = inlined_call_operand.vmem [shape: bf16[2,8,128], index: 0, kind: input, shape index: {}]   ;;  %s936_s1 = inlined_call_operand.vmem [shape: bf16[2,8,256], index: 1, kind: input, shape index: {}]   ;;  %s937_s2 = inlined_call_operand.vmem [shape: bf16[2,8,128], index: 2, kind: output, shape index: {}]  }
   0x1 LB: > { %s695_s10 = sadd.s32 4294967295, %s818_s9   ;;  %p699_p0 = scmp.ge.s32.totalorder %s818_s9, 1  ;;  %s818_s9 = sphi %s840_s9, %s12_s9  }
   0x2   : > { %p121_p1 = scmp.lt.s32.totalorder %s818_s9, 3 }
   0x4   : > { %p122_p2 = pnand %p699_p0, %p121_p1 }
   0x5   : > { %p146_p3 = scmp.lt.s32.totalorder (!%p122_p2), %s695_s10, 1  ;;  %v820_v0 = vmov (!%p122_p2), 0.0   ;;  %vm821_vm0 = vmmov (!%p122_p2), 0   ;;  %vm165_vm1 = vcmask (!%p122_p2), 261120   ;;  %vm212_vm2 = vcmask (!%p122_p2), 64512   ;;  %s822_s19 = smov (!%p122_p2), 96  }
   0x6   : > { %125 = sbr.rel (%p122_p2) target bundleno = 1481 (0x5c9), region = 28  ;;  %733 = vmatprep.subr.bf16.mxu0 (!%p122_p2), %v820_v0  ;;  %735 = vmatprep.mubr.msk.bf16.mxu0 (!%p122_p2), %vm821_vm0, %v820_v0  ;;  %s823_s20 = smov (!%p122_p2), 64   ;;  %vm231_vm3 = vcmask (!%p122_p2), 1043456   ;;  %vm393_vm4 = vcmask (!%p122_p2), 523520   ;;  %vm509_vm5 = vcmask (!%p122_p2), 785920   ;;  %vm625_vm6 = vcmask (!%p122_p2), 1048320  }
   0x7   : > { %739 = vmatprep.subr.bf16.mxu1 (!%p122_p2), %v820_v0  ;;  %741 = vmatprep.mubr.msk.bf16.mxu1 (!%p122_p2), %vm821_vm0, %v820_v0  ;;  %s824_s21 = smov (!%p122_p2), 32  }
   0xd   : > { %s939_s10 = smov (!%p146_p3, %s695_s10), 1 }
   0xe   : > { %s700_s11 = sshll.u32 %s939_s10, 2  ;;  %s716_s12 = sshll.u32 %s939_s10, 3 }
   0xf   : > { %s149_s15 = scalar_lea.vmem %s935_s0, %s700_s11  ;;  %s154_s18 = scalar_lea.vmem %s936_s1, %s716_s12 }
  0x10   : > { %v160_v1 = vld [vmem:[%s149_s15] sm:$0xf]  ;;  %s158_s24 = scalar_lea.vmem %s937_s2, %s700_s11 }
  0x11   : > { %v161_v2 = vld [vmem:[%s154_s18] sm:$0xff]  ;;  %v162_v4 = vunpack.c.l.bf16 %v160_v1 }
  0x12   : > { %v170_v3 = vsel %vm165_vm1, %v161_v2, 0  ;;  %v707_v12 = vcombine.low %v161_v2, %v161_v2  ;;  %v878_v18 = vcombine.high %v161_v2, %v161_v2 }
  0x13   : > { %734 = vmatpush3.bf16.xpose.msra.mxu0 %v170_v3  ;;  %v163_v5 = vmul.f32 0.17677669, %v162_v4 }
  0x14   : > { %751 = vmatprep.subr.bf16.mxu0 %v820_v0  ;;  %281 = vrot.lane.b32.xlu1 %v707_v12, %s822_s19  ;;  %v233_v19 = vsel %vm231_vm3, %v878_v18, 0 }
  0x15   : > { %v164_v6 = vpack.c.bf16 %v163_v5, %v163_v5  ;;  %740 = vmatpush3.bf16.msra.mxu1 %v233_v19 }
  0x16   : > { %745 = vmatprep.subr.bf16.mxu1 %v820_v0 }
  0x18   : > { %277 = vrot.lane.b32.xlu1 %v164_v6, %s822_s19 }
  0x1a   : > { %736 = vmatmul.mubr.msk.bf16.vlgmr.msra.gmra.mrb[0].mxu0 %vm165_vm1, %v164_v6 }
  0x1b   : > { %753 = vmatprep.mubr.msk.bf16.mxu0 %vm821_vm0, %v820_v0 }
  0x1c   : > { %395 = vrot.lane.b32.xlu1 %v164_v6, %s823_s20 }
  0x20   : > { %513 = vrot.lane.b32.xlu1 %v707_v12, %s824_s21 }
  0x24   : > { %511 = vrot.lane.b32.xlu1 %v164_v6, %s824_s21 }
  0x86   : > { %v282_v22 = vpop.permute.xlu1 %281 }
  0x87   : > { %v287_v24 = vsel %vm165_vm1, %v282_v22, 0 }
  0x8a   : > { %v278_v26 = vpop.permute.xlu1 %277 }
  0x8e   : > { %v396_v28 = vpop.permute.xlu1 %395 }
  0x92   : > { %v514_v30 = vpop.permute.xlu1 %513 }
  0x93   : > { %v519_v31 = vsel %vm165_vm1, %v514_v30, 0 }
  0x96   : > { %v512_v32 = vpop.permute.xlu1 %511 }
  0xed   : > { %v206_v7 = vpop.f32.mrb[0].mxu0 }
  0xee   : > { %v737_v8 = vpop.f32.mrb[1].mxu0  ;;  %v213_v9 = vsel %vm212_vm2, %v206_v7, -inf }
  0xef   : > { %214 = vmax.xlane.f32.xlu0 %v213_v9  ;;  %v209_v10 = vpop.f32.mrb[2].mxu0 }
  0xf0   : > { %v738_v11 = vpop.f32.mrb[3].mxu0 }
 0x17c   : > { %v215_v13 = vpop.xlane.xlu0 %214 }
 0x17d   : > { %v216_v14 = vsub.f32 %v206_v7, %v215_v13 }
 0x17f   : > { %v217_v15 = vmul.f32 1.442695, %v216_v14 }
 0x181   : > { %796 = vpow2.f32 %v217_v15 }
 0x18b   : > { %v797_v16 = vpop.eup %796 }
 0x18c   : > { %v219_v17 = vsel %vm212_vm2, %v797_v16, 0.0 }
 0x18d   : > { %220 = vadd.xlane.f32.xlu0 %v219_v17 }
 0x1a3   : > { %397 = vrot.lane.b32.xlu0 %v707_v12, %s823_s20 }
 0x21a   : > { %v221_v20 = vpop.xlane.xlu0 %220 }
 0x21b   : > { %798 = vrcp.f32 %v221_v20 }
 0x21e   : > { %v398_v27 = vpop.permute.xlu0 %397 }
 0x21f   : > { %v403_v29 = vsel %vm165_vm1, %v398_v27, 0 }
 0x225   : > { %v799_v21 = vpop.eup %798 }
 0x226   : > { %v223_v23 = vmul.f32 %v799_v21, %v797_v16 }
 0x228   : > { %v224_v25 = vpack.c.bf16 %v223_v23, %v223_v23 }
 0x22a   : > { %742 = vmatmul.mubr.msk.bf16.vlgmr.msra.gmra.mrb[0].mxu1 %vm212_vm2, %v224_v25 }
 0x22b   : > { %746 = vmatpush3.bf16.xpose.msra.mxu1 %v287_v24  ;;  %747 = vmatprep.mubr.msk.bf16.mxu1 %vm821_vm0, %v820_v0 }
 0x22c   : > { %757 = vmatprep.subr.bf16.mxu1 %v820_v0 }
 0x232   : > { %748 = vmatmul.mubr.msk.bf16.vlgmr.msra.gmra.mrb[4].mxu1 %vm165_vm1, %v278_v26 }
 0x233   : > { %758 = vmatpush3.bf16.xpose.msra.mxu1 %v403_v29  ;;  %759 = vmatprep.mubr.msk.bf16.mxu1 %vm821_vm0, %v820_v0 }
 0x234   : > { %769 = vmatprep.subr.bf16.mxu1 %v820_v0 }
 0x23a   : > { %760 = vmatmul.mubr.msk.bf16.vlgmr.msra.gmra.mrb[8].mxu1 %vm165_vm1, %v396_v28 }
 0x23b   : > { %770 = vmatpush3.bf16.xpose.msra.mxu1 %v519_v31  ;;  %771 = vmatprep.mubr.msk.bf16.mxu1 %vm821_vm0, %v820_v0 }
 0x242   : > { %772 = vmatmul.mubr.msk.bf16.vlgmr.msra.gmra.mrb[12].mxu1 %vm165_vm1, %v512_v32 }
 0x2fd   : > { %v269_v33 = vpop.f32.mrb[0].mxu1 }
 0x2fe   : > { %275 = vst.msk [vmem:[#allocation2] sm:$0xff] %vm165_vm1, %v269_v33  ;;  %v743_v34 = vpop.f32.mrb[1].mxu1 }
 0x2ff   : > { %v272_v35 = vpop.f32.mrb[2].mxu1 }
 0x300   : > { %v744_v36 = vpop.f32.mrb[3].mxu1 }
 0x305   : > { %v323_v37 = vpop.f32.mrb[4].mxu1 }
 0x306   : > { %v749_v38 = vpop.f32.mrb[5].mxu1  ;;  %v329_v39 = vsel %vm212_vm2, %v323_v37, -inf }
 0x307   : > { %330 = vmax.xlane.f32.xlu1 %v329_v39  ;;  %v326_v40 = vpop.f32.mrb[6].mxu1 }
 0x308   : > { %v750_v41 = vpop.f32.mrb[7].mxu1 }
 0x30d   : > { %v439_v42 = vpop.f32.mrb[8].mxu1 }
 0x30e   : > { %v445_v43 = vsel %vm212_vm2, %v439_v42, -inf  ;;  %v761_v44 = vpop.f32.mrb[9].mxu1 }
 0x30f   : > { %446 = vmax.xlane.f32.xlu0 %v445_v43  ;;  %v442_v45 = vpop.f32.mrb[10].mxu1 }
 0x310   : > { %v762_v46 = vpop.f32.mrb[11].mxu1 }
 0x315   : > { %v555_v47 = vpop.f32.mrb[12].mxu1 }
 0x316   : > { %v561_v48 = vsel %vm212_vm2, %v555_v47, -inf  ;;  %v773_v49 = vpop.f32.mrb[13].mxu1 }
 0x317   : > { %562 = vmax.xlane.f32.xlu1 %v561_v48  ;;  %v558_v50 = vpop.f32.mrb[14].mxu1 }
 0x318   : > { %v774_v51 = vpop.f32.mrb[15].mxu1 }
 0x394   : > { %v331_v52 = vpop.xlane.xlu1 %330 }
 0x395   : > { %v332_v53 = vsub.f32 %v323_v37, %v331_v52 }
 0x397   : > { %v333_v54 = vmul.f32 1.442695, %v332_v53 }
 0x399   : > { %800 = vpow2.f32 %v333_v54 }
 0x39c   : > { %v447_v55 = vpop.xlane.xlu0 %446 }
 0x39d   : > { %v448_v56 = vsub.f32 %v439_v42, %v447_v55 }
 0x39f   : > { %v449_v57 = vmul.f32 1.442695, %v448_v56 }
 0x3a1   : > { %802 = vpow2.f32 %v449_v57 }
 0x3a3   : > { %v801_v58 = vpop.eup %800 }
 0x3a4   : > { %v335_v59 = vsel %vm212_vm2, %v801_v58, 0.0  ;;  %v563_v62 = vpop.xlane.xlu1 %562 }
 0x3a5   : > { %336 = vadd.xlane.f32.xlu1 %v335_v59  ;;  %v564_v63 = vsub.f32 %v555_v47, %v563_v62 }
 0x3a7   : > { %v565_v1 = vmul.f32 1.442695, %v564_v63 }
 0x3a9   : > { %804 = vpow2.f32 %v565_v1 }
 0x3ab   : > { %v803_v60 = vpop.eup %802 }
 0x3ac   : > { %v451_v61 = vsel %vm212_vm2, %v803_v60, 0.0 }
 0x3ad   : > { %452 = vadd.xlane.f32.xlu0 %v451_v61 }
 0x3b3   : > { %v805_v2 = vpop.eup %804 }
 0x3b4   : > { %v567_v3 = vsel %vm212_vm2, %v805_v2, 0.0 }
 0x3b6   : > { %457 = vrot.lane.b32.xlu1 %v878_v18, %s823_s20 }
 0x3c3   : > { %341 = vrot.lane.b32.xlu0 %v878_v18, %s822_s19 }
 0x3da   : > { %568 = vadd.xlane.f32.xlu1 %v567_v3 }
 0x3eb   : > { %573 = vrot.lane.b32.xlu1 %v878_v18, %s824_s21 }
 0x432   : > { %v337_v4 = vpop.xlane.xlu1 %336 }
 0x433   : > { %806 = vrcp.f32 %v337_v4 }
 0x436   : > { %v458_v10 = vpop.permute.xlu1 %457 }
 0x437   : > { %v463_v12 = vsel %vm231_vm3, %v458_v10, 0 }
 0x43a   : > { %v453_v5 = vpop.xlane.xlu0 %452 }
 0x43b   : > { %808 = vrcp.f32 %v453_v5 }
 0x43d   : > { %v807_v6 = vpop.eup %806 }
 0x43e   : > { %v339_v7 = vmul.f32 %v807_v6, %v801_v58  ;;  %v342_v8 = vpop.permute.xlu0 %341 }
 0x43f   : > { %v347_v9 = vsel %vm231_vm3, %v342_v8, 0 }
 0x440   : > { %752 = vmatpush3.bf16.msra.mxu0 %v347_v9  ;;  %v340_v11 = vpack.c.bf16 %v339_v7, %v339_v7 }
 0x441   : > { %763 = vmatprep.subr.bf16.mxu0 %v820_v0 }
 0x443   : > { %754 = vmatmul.mubr.msk.bf16.vlgmr.msra.gmra.mrb[4].mxu0 %vm212_vm2, %v340_v11 }
 0x444   : > { %764 = vmatpush3.bf16.msra.mxu0 %v463_v12  ;;  %765 = vmatprep.mubr.msk.bf16.mxu0 %vm821_vm0, %v820_v0 }
 0x445   : > { %v809_v13 = vpop.eup %808  ;;  %775 = vmatprep.subr.bf16.mxu0 %v820_v0 }
 0x446   : > { %v455_v14 = vmul.f32 %v809_v13, %v803_v60 }
 0x448   : > { %v456_v15 = vpack.c.bf16 %v455_v14, %v455_v14 }
 0x44b   : > { %766 = vmatmul.mubr.msk.bf16.vlgmr.msra.gmra.mrb[8].mxu0 %vm212_vm2, %v456_v15 }
 0x44c   : > { %777 = vmatprep.mubr.msk.bf16.mxu0 %vm821_vm0, %v820_v0 }
 0x467   : > { %v569_v16 = vpop.xlane.xlu1 %568 }
 0x468   : > { %810 = vrcp.f32 %v569_v16 }
 0x46b   : > { %v574_v17 = vpop.permute.xlu1 %573 }
 0x46c   : > { %v579_v18 = vsel %vm231_vm3, %v574_v17, 0 }
 0x46d   : > { %776 = vmatpush3.bf16.msra.mxu0 %v579_v18 }
 0x472   : > { %v811_v19 = vpop.eup %810 }
 0x473   : > { %v571_v20 = vmul.f32 %v811_v19, %v805_v2 }
 0x475   : > { %v572_v21 = vpack.c.bf16 %v571_v20, %v571_v20 }
 0x477   : > { %778 = vmatmul.mubr.msk.bf16.vlgmr.msra.gmra.mrb[12].mxu0 %vm212_vm2, %v572_v21 }
 0x516   : > { %v383_v22 = vpop.f32.mrb[4].mxu0 }
 0x517   : > { %390 = vrot.lane.b32.xlu0 %v383_v22, %s824_s21  ;;  %v755_v23 = vpop.f32.mrb[5].mxu0 }
 0x518   : > { %v386_v24 = vpop.f32.mrb[6].mxu0 }
 0x519   : > { %v756_v25 = vpop.f32.mrb[7].mxu0 }
 0x51e   : > { %v499_v26 = vpop.f32.mrb[8].mxu0 }
 0x51f   : > { %506 = vrot.lane.b32.xlu1 %v499_v26, %s823_s20  ;;  %v767_v0 = vpop.f32.mrb[9].mxu0 }
 0x520   : > { %v502_v27 = vpop.f32.mrb[10].mxu0 }
 0x521   : > { %v768_v28 = vpop.f32.mrb[11].mxu0 }
 0x54a   : > { %v615_v29 = vpop.f32.mrb[12].mxu0 }
 0x54b   : > { %622 = vrot.lane.b32.xlu0 %v615_v29, %s822_s19  ;;  %v779_v30 = vpop.f32.mrb[13].mxu0 }
 0x54c   : > { %v618_v31 = vpop.f32.mrb[14].mxu0 }
 0x54d   : > { %v780_v32 = vpop.f32.mrb[15].mxu0 }
 0x589   : > { %v391_v33 = vpop.permute.xlu0 %390 }
 0x58a   : > { %394 = vst.msk [vmem:[#allocation2] sm:$0xff] %vm393_vm4, %v391_v33 }
 0x591   : > { %v507_v34 = vpop.permute.xlu1 %506 }
 0x592   : > { %510 = vst.msk [vmem:[#allocation2] sm:$0xff] %vm509_vm5, %v507_v34 }
 0x5bd   : > { %v623_v35 = vpop.permute.xlu0 %622 }
 0x5be   : > { %626 = vst.msk [vmem:[#allocation2] sm:$0xff] %vm625_vm6, %v623_v35 }
 0x5c5   : > { %v627_v36 = vld [vmem:[#allocation2] sm:$0xff] }
 0x5c6   : > { %v628_v37 = vpack.c.bf16 %v627_v36, %v627_v36 }
 0x5c8   : > { %629 = vst [vmem:[%s158_s24] sm:$0xf] %v628_v37 }
 0x5c9 PF: > { %s12_s9 = sadd.s32 1, %s818_s9  }
 0x5ca   : > { %p9_p4 = scmp.ge.s32.totalorder %s12_s9, 4  }
 0x5cc   :  { %11 = sbr.rel (!%p9_p4) target bundleno = 1 (0x1), region = 61 }

// kernel: transformer_model_forward.81
= control target key start
LH: loop header
LB: loop body
LE: loop exit
PB: predicated region body
PF: predicated region fallthrough
CT: control target
= control target key end

     0   :  { %s1049_s12 = smov 0   ;;  %s1051_s13 = smov 0   ;;  %s1252_s0 = inlined_call_operand.vmem [shape: bf16[16,128], index: 0, kind: input, shape index: {}]   ;;  %s1253_s1 = inlined_call_operand.vmem [shape: bf16[128,1024], index: 1, kind: input, shape index: {}]   ;;  %s1254_s2 = inlined_call_operand.vmem [shape: f32[1,1024], index: 2, kind: input, shape index: {}]   ;;  %s1255_s3 = inlined_call_operand.vmem [shape: f32[16,1024], index: 3, kind: output, shape index: {}]  }
   0x1   :  { %s1053_s14 = smov 0   ;;  %s1055_s15 = smov 0  }
   0x2   :  { %s1057_s16 = smov 0  }
   0x3 LB: > { %s28_s17 = sadd.s32 1, %s1022_s15  ;;  %s846_s18 = sadd.s32 4294967295, %s1026_s16   ;;  %s1026_s16 = sphi %s1057_s16, %s13_s16   ;;  %s1022_s15 = sphi %s1055_s15, %s1260_s15   ;;  %s1018_s14 = sphi %s1053_s14, %s1259_s14   ;;  %s1014_s13 = sphi %s1051_s13, %s1258_s13   ;;  %s1010_s12 = sphi %s1049_s12, %s1257_s12  }
   0x4   : > { %p30_p0 = scmp.ge.s32.totalorder %s28_s17, 2  ;;  %p76_p1 = scmp.ne.s32.totalorder %s1014_s13, %s1010_s12 }
   0x5   : > { %p77_p2 = scmp.eq.s32.totalorder %s1026_s16, 0  ;;  %p134_p4 = scmp.eq.s32.totalorder %s846_s18, 1 }
   0x6   : > { %s1262_s17 = smov (%p30_p0, %s28_s17), 0  ;;  %s69_s20 = sadd.s32 1, %s1014_s13 }
   0x7   : > { %p78_p3 = por %p77_p2, %p76_p1  ;;  %s65_s19 = ssub.s32 %s1022_s15, %s1262_s17 }
   0x8   : > { %p67_p5 = scmp.eq.s32.totalorder %s65_s19, 0  ;;  %p1084_p6 = por %p134_p4, %p76_p1 }
   0x9   : > { %p850_p7 = scmp.ge.s32.totalorder %s1026_s16, 2 }
   0xa   : > { %s1089_s22 = scalar_select %p67_p5, %s1014_s13, %s69_s20  }
   0xb   : > { %168 = sbr.rel (%p850_p7) target bundleno = 38 (0x26), region = 20 }
  0x12   : > { %171 = sbr.rel (!%p78_p3) target bundleno = 38 (0x26), region = 24  ;;  %s173_s23 = sand.u32 (%p78_p3), 1, %s1014_s13  }
  0x13   : > { %s896_s24 = sshll.u32 (%p78_p3), %s1022_s15, 4  ;;  %s851_s25 = sshll.u32 (%p78_p3), %s173_s23, 8 }
  0x14   : > { %s1097_s28 = scalar_lea.vmem (%p78_p3), %s1253_s1, %s896_s24  ;;  %s1102_s29 = scalar_lea.vmem (%p78_p3), [#allocation3], %s851_s25 }
  0x15   : > { %v194_v0 = vld [vmem:[%s1097_s28] sm:$0xff] (%p78_p3)  ;;  %v196_v1 = vld [vmem:[%s1097_s28 + $0x8] sm:$0xff] (%p78_p3) }
  0x16   : > { %v198_v2 = vld [vmem:[%s1097_s28 + $0x20] sm:$0xff] (%p78_p3)  ;;  %195 = vst [vmem:[%s1102_s29] sm:$0xff] (%p78_p3), %v194_v0  ;;  %197 = vst [vmem:[%s1102_s29 + $0x8] sm:$0xff] (%p78_p3), %v196_v1  ;;  %v200_v3 = vld [vmem:[%s1097_s28 + $0x28] sm:$0xff] (%p78_p3) }
  0x17   : > { %199 = vst [vmem:[%s1102_s29 + $0x10] sm:$0xff] (%p78_p3), %v198_v2  ;;  %v202_v4 = vld [vmem:[%s1097_s28 + $0x40] sm:$0xff] (%p78_p3)  ;;  %v204_v5 = vld [vmem:[%s1097_s28 + $0x48] sm:$0xff] (%p78_p3)  ;;  %201 = vst [vmem:[%s1102_s29 + $0x18] sm:$0xff] (%p78_p3), %v200_v3 }
  0x18   : > { %203 = vst [vmem:[%s1102_s29 + $0x20] sm:$0xff] (%p78_p3), %v202_v4  ;;  %205 = vst [vmem:[%s1102_s29 + $0x28] sm:$0xff] (%p78_p3), %v204_v5  ;;  %v206_v6 = vld [vmem:[%s1097_s28 + $0x60] sm:$0xff] (%p78_p3)  ;;  %v208_v7 = vld [vmem:[%s1097_s28 + $0x68] sm:$0xff] (%p78_p3) }
  0x19   : > { %v210_v8 = vld [vmem:[%s1097_s28 + $0x80] sm:$0xff]  ;;  %207 = vst [vmem:[%s1102_s29 + $0x30] sm:$0xff] %v206_v6  ;;  %209 = vst [vmem:[%s1102_s29 + $0x38] sm:$0xff] %v208_v7  ;;  %v212_v9 = vld [vmem:[%s1097_s28 + $0x88] sm:$0xff] }
  0x1a   : > { %211 = vst [vmem:[%s1102_s29 + $0x40] sm:$0xff] %v210_v8  ;;  %v214_v10 = vld [vmem:[%s1097_s28 + $0xa0] sm:$0xff]  ;;  %v216_v11 = vld [vmem:[%s1097_s28 + $0xa8] sm:$0xff]  ;;  %213 = vst [vmem:[%s1102_s29 + $0x48] sm:$0xff] %v212_v9 }
  0x1b   : > { %215 = vst [vmem:[%s1102_s29 + $0x50] sm:$0xff] %v214_v10  ;;  %217 = vst [vmem:[%s1102_s29 + $0x58] sm:$0xff] %v216_v11  ;;  %v218_v12 = vld [vmem:[%s1097_s28 + $0xc0] sm:$0xff]  ;;  %v220_v13 = vld [vmem:[%s1097_s28 + $0xc8] sm:$0xff] }
  0x1c   : > { %v222_v14 = vld [vmem:[%s1097_s28 + $0xe0] sm:$0xff]  ;;  %219 = vst [vmem:[%s1102_s29 + $0x60] sm:$0xff] %v218_v12  ;;  %221 = vst [vmem:[%s1102_s29 + $0x68] sm:$0xff] %v220_v13  ;;  %v224_v15 = vld [vmem:[%s1097_s28 + $0xe8] sm:$0xff] }
  0x1d   : > { %223 = vst [vmem:[%s1102_s29 + $0x70] sm:$0xff] %v222_v14  ;;  %v226_v16 = vld [vmem:[%s1097_s28 + $0x100] sm:$0xff]  ;;  %v228_v17 = vld [vmem:[%s1097_s28 + $0x108] sm:$0xff]  ;;  %225 = vst [vmem:[%s1102_s29 + $0x78] sm:$0xff] %v224_v15 }
  0x1e   : > { %227 = vst [vmem:[%s1102_s29 + $0x80] sm:$0xff] %v226_v16  ;;  %229 = vst [vmem:[%s1102_s29 + $0x88] sm:$0xff] %v228_v17  ;;  %v230_v18 = vld [vmem:[%s1097_s28 + $0x120] sm:$0xff]  ;;  %v232_v19 = vld [vmem:[%s1097_s28 + $0x128] sm:$0xff] }
  0x1f   : > { %v234_v20 = vld [vmem:[%s1097_s28 + $0x140] sm:$0xff]  ;;  %231 = vst [vmem:[%s1102_s29 + $0x90] sm:$0xff] %v230_v18  ;;  %233 = vst [vmem:[%s1102_s29 + $0x98] sm:$0xff] %v232_v19  ;;  %v236_v21 = vld [vmem:[%s1097_s28 + $0x148] sm:$0xff] }
  0x20   : > { %235 = vst [vmem:[%s1102_s29 + $0xa0] sm:$0xff] %v234_v20  ;;  %v238_v22 = vld [vmem:[%s1097_s28 + $0x160] sm:$0xff]  ;;  %v240_v23 = vld [vmem:[%s1097_s28 + $0x168] sm:$0xff]  ;;  %237 = vst [vmem:[%s1102_s29 + $0xa8] sm:$0xff] %v236_v21 }
  0x21   : > { %239 = vst [vmem:[%s1102_s29 + $0xb0] sm:$0xff] %v238_v22  ;;  %241 = vst [vmem:[%s1102_s29 + $0xb8] sm:$0xff] %v240_v23  ;;  %v242_v24 = vld [vmem:[%s1097_s28 + $0x180] sm:$0xff]  ;;  %v244_v25 = vld [vmem:[%s1097_s28 + $0x188] sm:$0xff] }
  0x22   : > { %v246_v26 = vld [vmem:[%s1097_s28 + $0x1a0] sm:$0xff]  ;;  %243 = vst [vmem:[%s1102_s29 + $0xc0] sm:$0xff] %v242_v24  ;;  %245 = vst [vmem:[%s1102_s29 + $0xc8] sm:$0xff] %v244_v25  ;;  %v248_v27 = vld [vmem:[%s1097_s28 + $0x1a8] sm:$0xff] }
  0x23   : > { %247 = vst [vmem:[%s1102_s29 + $0xd0] sm:$0xff] %v246_v26  ;;  %v250_v28 = vld [vmem:[%s1097_s28 + $0x1c0] sm:$0xff]  ;;  %v252_v29 = vld [vmem:[%s1097_s28 + $0x1c8] sm:$0xff]  ;;  %249 = vst [vmem:[%s1102_s29 + $0xd8] sm:$0xff] %v248_v27 }
  0x24   : > { %251 = vst [vmem:[%s1102_s29 + $0xe0] sm:$0xff] %v250_v28  ;;  %253 = vst [vmem:[%s1102_s29 + $0xe8] sm:$0xff] %v252_v29  ;;  %v254_v30 = vld [vmem:[%s1097_s28 + $0x1e0] sm:$0xff]  ;;  %v256_v31 = vld [vmem:[%s1097_s28 + $0x1e8] sm:$0xff] }
  0x25   : > { %255 = vst [vmem:[%s1102_s29 + $0xf0] sm:$0xff] %v254_v30  ;;  %257 = vst [vmem:[%s1102_s29 + $0xf8] sm:$0xff] %v256_v31 }
  0x26 PF: > { %p854_p8 = scmp.ge.s32.totalorder %s1026_s16, 1  ;;  %p270_p9 = scmp.lt.s32.totalorder %s1026_s16, 3 }
  0x28   : > { %p271_p10 = pnand %p854_p8, %p270_p9 }
  0x29   : > { %s277_s30 = sand.u32 (!%p271_p10), 1, %s1010_s12   ;;  %v1028_v32 = vmov (!%p271_p10), 0   ;;  %v987_v1 = vld [vmem:[%s1252_s0] sm:$0xff] (!%p271_p10)   ;;  %s857_s8 = sshll.u32 (!%p271_p10), %s1018_s14, 2  ;;  %v665_v2 = vlaneseq (!%p271_p10) }
  0x2a   : > { %274 = sbr.rel (%p271_p10) target bundleno = 303 (0x12f), region = 51  ;;  %s855_s4 = sshll.u32 (!%p271_p10), %s277_s30, 8  ;;  %582 = vmatprep.mubr.bf16.mxu0 (!%p271_p10), %v1028_v32  ;;  %625 = vmatprep.mubr.bf16.mxu1 (!%p271_p10), %v1028_v32 }
  0x2b   : > { %s1170_s5 = scalar_lea.vmem (!%p271_p10), [#allocation3], %s855_s4  ;;  %p323_p11 = scmp.lt.s32.totalorder (!%p271_p10), %s857_s8, 7  ;;  %v666_v3 = vshrl.u32 (!%p271_p10), %v665_v2, 7 }
  0x2c   : > { %v939_v33 = vld [vmem:[%s1170_s5 + $0x4] ss:$16 sps:$4 sm:$0xff] (!%p271_p10)   ;;  %v941_v34 = vld [vmem:[%s1170_s5 + $0xc] ss:$16 sps:$4 sm:$0xff] (!%p271_p10)   ;;  %v943_v35 = vld [vmem:[%s1170_s5] ss:$16 sps:$4 sm:$0xff] (!%p271_p10)  }
  0x2d   : > { %550 = vmatprep.subr.bf16.mxu0 (!%p271_p10), %v939_v33  ;;  %v944_v36 = vld [vmem:[%s1170_s5 + $0x8] ss:$16 sps:$4 sm:$0xff] (!%p271_p10)   ;;  %593 = vmatprep.subr.bf16.mxu1 (!%p271_p10), %v941_v34  ;;  %v945_v37 = vld [vmem:[%s1170_s5 + $0x24] ss:$16 sps:$4 sm:$0xff] (!%p271_p10)   ;;  %v947_v38 = vld [vmem:[%s1170_s5 + $0x2c] ss:$16 sps:$4 sm:$0xff] (!%p271_p10)  }
  0x2e   : > { %551 = vmatpush1.bf16.msra.mxu0 (!%p271_p10), %v943_v35  ;;  %594 = vmatpush1.bf16.msra.mxu1 (!%p271_p10), %v944_v36  ;;  %v949_v39 = vld [vmem:[%s1170_s5 + $0x20] ss:$16 sps:$4 sm:$0xff] (!%p271_p10)   ;;  %v950_v40 = vld [vmem:[%s1170_s5 + $0x28] ss:$16 sps:$4 sm:$0xff] (!%p271_p10)   ;;  %v951_v41 = vld [vmem:[%s1170_s5 + $0x44] ss:$16 sps:$4 sm:$0xff] (!%p271_p10)  }
  0x2f   : > { %552 = vmatprep.subr.bf16.mxu0 (!%p271_p10), %v945_v37  ;;  %595 = vmatprep.subr.bf16.mxu1 (!%p271_p10), %v947_v38  ;;  %v953_v42 = vld [vmem:[%s1170_s5 + $0x4c] ss:$16 sps:$4 sm:$0xff] (!%p271_p10)   ;;  %v955_v43 = vld [vmem:[%s1170_s5 + $0x40] ss:$16 sps:$4 sm:$0xff] (!%p271_p10)   ;;  %v956_v44 = vld [vmem:[%s1170_s5 + $0x48] ss:$16 sps:$4 sm:$0xff] (!%p271_p10)  }
  0x30   : > { %v957_v45 = vld [vmem:[%s1170_s5 + $0x64] ss:$16 sps:$4 sm:$0xff] (!%p271_p10)   ;;  %v959_v46 = vld [vmem:[%s1170_s5 + $0x6c] ss:$16 sps:$4 sm:$0xff] (!%p271_p10)   ;;  %v961_v47 = vld [vmem:[%s1170_s5 + $0x60] ss:$16 sps:$4 sm:$0xff] (!%p271_p10)  }
  0x31   : > { %v962_v48 = vld [vmem:[%s1170_s5 + $0x68] ss:$16 sps:$4 sm:$0xff]   ;;  %v963_v49 = vld [vmem:[%s1170_s5 + $0x84] ss:$16 sps:$4 sm:$0xff]   ;;  %v965_v50 = vld [vmem:[%s1170_s5 + $0x8c] ss:$16 sps:$4 sm:$0xff]  }
  0x32   : > { %553 = vmatpush1.bf16.msra.mxu0 %v949_v39  ;;  %596 = vmatpush1.bf16.msra.mxu1 %v950_v40  ;;  %v967_v51 = vld [vmem:[%s1170_s5 + $0x80] ss:$16 sps:$4 sm:$0xff]   ;;  %v968_v52 = vld [vmem:[%s1170_s5 + $0x88] ss:$16 sps:$4 sm:$0xff]   ;;  %v969_v53 = vld [vmem:[%s1170_s5 + $0xa4] ss:$16 sps:$4 sm:$0xff]  }
  0x33   : > { %554 = vmatprep.subr.bf16.mxu0 %v951_v41  ;;  %597 = vmatprep.subr.bf16.mxu1 %v953_v42  ;;  %v971_v54 = vld [vmem:[%s1170_s5 + $0xac] ss:$16 sps:$4 sm:$0xff]   ;;  %v973_v55 = vld [vmem:[%s1170_s5 + $0xa0] ss:$16 sps:$4 sm:$0xff]   ;;  %v974_v56 = vld [vmem:[%s1170_s5 + $0xa8] ss:$16 sps:$4 sm:$0xff]  }
  0x34   : > { %v975_v57 = vld [vmem:[%s1170_s5 + $0xc4] ss:$16 sps:$4 sm:$0xff]   ;;  %v977_v58 = vld [vmem:[%s1170_s5 + $0xcc] ss:$16 sps:$4 sm:$0xff]   ;;  %v979_v59 = vld [vmem:[%s1170_s5 + $0xc0] ss:$16 sps:$4 sm:$0xff]  }
  0x35   : > { %v980_v60 = vld [vmem:[%s1170_s5 + $0xc8] ss:$16 sps:$4 sm:$0xff]   ;;  %v981_v61 = vld [vmem:[%s1170_s5 + $0xe4] ss:$16 sps:$4 sm:$0xff]   ;;  %v983_v62 = vld [vmem:[%s1170_s5 + $0xec] ss:$16 sps:$4 sm:$0xff]  }
  0x36   : > { %555 = vmatpush1.bf16.msra.mxu0 %v955_v43  ;;  %598 = vmatpush1.bf16.msra.mxu1 %v956_v44  ;;  %v985_v63 = vld [vmem:[%s1170_s5 + $0xe0] ss:$16 sps:$4 sm:$0xff]   ;;  %v986_v0 = vld [vmem:[%s1170_s5 + $0xe8] ss:$16 sps:$4 sm:$0xff]   ;;  %s1264_s8 = smov (!%p323_p11, %s857_s8), 7  ;;  %v667_v4 = vsub.s32 0, %v666_v3 }
  0x37   : > { %556 = vmatprep.subr.bf16.mxu0 %v957_v45  ;;  %599 = vmatprep.subr.bf16.mxu1 %v959_v46  ;;  %s325_s11 = scalar_lea.vmem %s1254_s2, %s1264_s8  ;;  %v675_v5 = vsub.s32 2, %v666_v3  ;;  %v671_v7 = vsub.s32 1, %v666_v3  ;;  %v679_v8 = vsub.s32 3, %v666_v3  ;;  %s856_s18 = sshll.u32 %s277_s30, 6 }
  0x38   : > { %v663_v6 = vld [vmem:[%s325_s11] sm:$0xf]  ;;  %s1213_s19 = scalar_lea.vmem [#allocation4], %s856_s18  ;;  %s897_s12 = sshll.u32 (%p1084_p6), %s1018_s14, 5 }
  0x39   : > { %v668_v9 = vrot.slane %v663_v6, %v667_v4  ;;  %v676_v10 = vrot.slane %v663_v6, %v675_v5  ;;  %v672_v11 = vrot.slane %v663_v6, %v671_v7  ;;  %v680_v12 = vrot.slane %v663_v6, %v679_v8  ;;  %s713_s24 = scalar_lea.vmem (%p1084_p6), %s1255_s3, %s897_s12 }
  0x3a   : > { %557 = vmatpush1.bf16.msra.mxu0 %v961_v47  ;;  %600 = vmatpush1.bf16.msra.mxu1 %v962_v48 }
  0x3b   : > { %558 = vmatprep.subr.bf16.mxu0 %v963_v49  ;;  %601 = vmatprep.subr.bf16.mxu1 %v965_v50 }
  0x3e   : > { %559 = vmatpush1.bf16.msra.mxu0 %v967_v51  ;;  %602 = vmatpush1.bf16.msra.mxu1 %v968_v52 }
  0x3f   : > { %560 = vmatprep.subr.bf16.mxu0 %v969_v53  ;;  %603 = vmatprep.subr.bf16.mxu1 %v971_v54 }
  0x42   : > { %561 = vmatpush1.bf16.msra.mxu0 %v973_v55  ;;  %604 = vmatpush1.bf16.msra.mxu1 %v974_v56 }
  0x43   : > { %562 = vmatprep.subr.bf16.mxu0 %v975_v57  ;;  %605 = vmatprep.subr.bf16.mxu1 %v977_v58 }
  0x46   : > { %563 = vmatpush1.bf16.msra.mxu0 %v979_v59  ;;  %606 = vmatpush1.bf16.msra.mxu1 %v980_v60 }
  0x47   : > { %564 = vmatprep.subr.bf16.mxu0 %v981_v61  ;;  %607 = vmatprep.subr.bf16.mxu1 %v983_v62 }
  0x4a   : > { %565 = vmatpush1.bf16.msra.mxu0 %v985_v63  ;;  %608 = vmatpush1.bf16.msra.mxu1 %v986_v0 }
  0x4d   : > { %583 = vmatmul.mubr.bf16.vlgmr.msra.gmra.mrb[0].mxu0 %v987_v1  ;;  %626 = vmatmul.mubr.bf16.vlgmr.msra.gmra.mrb[0].mxu1 %v987_v1 }
 0x120   : > { %v584_v13 = vpop.f32.mrb[0].mxu0  ;;  %v627_v14 = vpop.f32.mrb[0].mxu1  ;;  %707 = sbr.rel (!%p1084_p6) target bundleno = 303 (0x12f), region = 67 }
 0x121   : > { %v685_v15 = vadd.f32 %v668_v9, %v584_v13  ;;  %v687_v16 = vadd.f32 %v676_v10, %v627_v14  ;;  %v586_v17 = vpop.f32.mrb[1].mxu0  ;;  %v629_v18 = vpop.f32.mrb[1].mxu1 }
 0x122   : > { %v686_v19 = vadd.f32 %v672_v11, %v586_v17  ;;  %v688_v20 = vadd.f32 %v680_v12, %v629_v18  ;;  %v588_v21 = vpop.f32.mrb[2].mxu0  ;;  %v631_v22 = vpop.f32.mrb[2].mxu1 }
 0x123   : > { %693 = vst [vmem:[%s1213_s19] sm:$0xff] %v685_v15  ;;  %695 = vst [vmem:[%s1213_s19 + $0x10] sm:$0xff] %v687_v16  ;;  %v689_v23 = vadd.f32 %v668_v9, %v588_v21  ;;  %v691_v24 = vadd.f32 %v676_v10, %v631_v22  ;;  %v590_v25 = vpop.f32.mrb[3].mxu0  ;;  %v633_v26 = vpop.f32.mrb[3].mxu1 }
 0x124   : > { %694 = vst [vmem:[%s1213_s19 + $0x8] sm:$0xff] %v686_v19  ;;  %696 = vst [vmem:[%s1213_s19 + $0x18] sm:$0xff] %v688_v20  ;;  %v690_v27 = vadd.f32 %v672_v11, %v590_v25  ;;  %v692_v28 = vadd.f32 %v680_v12, %v633_v26 }
 0x125   : > { %697 = vst [vmem:[%s1213_s19 + $0x20] sm:$0xff] %v689_v23  ;;  %699 = vst [vmem:[%s1213_s19 + $0x30] sm:$0xff] %v691_v24 }
 0x126   : > { %698 = vst [vmem:[%s1213_s19 + $0x28] sm:$0xff] %v690_v27  ;;  %700 = vst [vmem:[%s1213_s19 + $0x38] sm:$0xff] %v692_v28 }
 0x12a   : > { %v726_v29 = vld [vmem:[%s1213_s19] sm:$0xff]  ;;  %v730_v31 = vld [vmem:[%s1213_s19 + $0x10] sm:$0xff] }
 0x12b   : > { %v728_v30 = vld [vmem:[%s1213_s19 + $0x8] sm:$0xff]  ;;  %v732_v32 = vld [vmem:[%s1213_s19 + $0x18] sm:$0xff]  ;;  %727 = vst [vmem:[%s713_s24] sm:$0xff] %v726_v29  ;;  %731 = vst [vmem:[%s713_s24 + $0x10] sm:$0xff] %v730_v31 }
 0x12c   : > { %v734_v33 = vld [vmem:[%s1213_s19 + $0x20] sm:$0xff]  ;;  %729 = vst [vmem:[%s713_s24 + $0x8] sm:$0xff] %v728_v30  ;;  %733 = vst [vmem:[%s713_s24 + $0x18] sm:$0xff] %v732_v32  ;;  %v738_v35 = vld [vmem:[%s1213_s19 + $0x30] sm:$0xff] }
 0x12d   : > { %v736_v34 = vld [vmem:[%s1213_s19 + $0x28] sm:$0xff]  ;;  %735 = vst [vmem:[%s713_s24 + $0x40] sm:$0xff] %v734_v33  ;;  %v740_v36 = vld [vmem:[%s1213_s19 + $0x38] sm:$0xff]  ;;  %739 = vst [vmem:[%s713_s24 + $0x50] sm:$0xff] %v738_v35 }
 0x12e   : > { %737 = vst [vmem:[%s713_s24 + $0x48] sm:$0xff] %v736_v34  ;;  %741 = vst [vmem:[%s713_s24 + $0x58] sm:$0xff] %v740_v36 }
 0x12f PF: > { %s13_s16 = sadd.s32 1, %s1026_s16   ;;  %s1257_s12 = smov %s1014_s13 }
 0x130   : > { %p10_p12 = scmp.ge.s32.totalorder %s13_s16, 4   ;;  %s1258_s13 = smov %s1089_s22 }
 0x131   : > { %s1259_s14 = smov %s1022_s15  ;;  %s1260_s15 = smov %s1262_s17 }
 0x132   :  { %12 = sbr.rel (!%p10_p12) target bundleno = 3 (0x3), region = 127 }

</bundles_post_ra>
